<compile_context>
chip_gen: v7x
topology: tpu7x:2x2x1
jax: 0.10.0
libtpu: 0.0.40
codegen_flags: <defaults>
</compile_context>

<pallas_src>
import jax
import jax.numpy as jnp
from jax.experimental import pallas as pl
from jax.experimental.pallas import tpu as pltpu


# ----------------------------------------------------------------------------
# evolly-style round_filters (make divisible by 8, keep >= 90% of original).
# ----------------------------------------------------------------------------
def round_filters(f, divisor=8):
    new_f = max(divisor, int(f + divisor / 2) // divisor * divisor)
    if new_f < 0.9 * f:
        new_f += divisor
    return int(new_f)


# ----------------------------------------------------------------------------
# Pallas kernel: the whole block for B batch elements per grid step.
# ----------------------------------------------------------------------------
def _inception_block_kernel(
    x_ref,                                  # (B, H, W, Cin)  f32
    wstem_ref, bstem_ref,                   # (Cin, 3*f1) bf16 / (1, 3*f1) f32  [s2|s3|s1]
    w23_ref, b23_ref,                       # (9*2*f1, f1+f3_2) bf16 / (1, f1+f3_2) f32
    w3c_ref, b3c_ref,                       # (9*f3_2, f3_3)    bf16 / (1, f3_3)    f32
    wln1_ref, wln2_ref, wln3_ref, bln_ref,  # (f1,Cin)/(f1,Cin)/(f3_3,Cin) bf16, (1,Cin) f32
    bnln_ref,                               # (2, Cin) f32
    wproj_ref, bproj_ref,                   # (Cin, Cout) bf16 / (1, Cout) f32
    out_ref,                                # (B, H, W, Cout) f32
    pad_ref,                                # scratch (B, H+2, W+2, cmax) f32
):
    B, H, W, Cin = x_ref.shape
    M = B * H * W
    f1 = wstem_ref.shape[1] // 3
    bf16 = jnp.bfloat16
    f32 = jnp.float32

    relu = lambda v: jnp.maximum(v, 0.0)

    # Zero only the 1-wide halo border frame (NOT the whole buffer): the interior is
    # fully rewritten before every read inside this grid step, and doing it every step
    # keeps it correct under megacore "parallel" sharding (per-core scratch).
    Hp, Wp, Cm = H + 2, W + 2, pad_ref.shape[3]
    zrow = jnp.zeros((B, 1, Wp, Cm), f32)
    zcol = jnp.zeros((B, Hp, 1, Cm), f32)
    pad_ref[:, 0:1, :, :] = zrow
    pad_ref[:, Hp - 1:Hp, :, :] = zrow
    pad_ref[:, :, 0:1, :] = zcol
    pad_ref[:, :, Wp - 1:Wp, :] = zcol

    # (B, H, W, Cin) -> (B*H*W, Cin): cheap relayout (W is a multiple of 8).
    xf = x_ref[...].reshape(M, Cin)

    def matmul(a_bf16, w_ref, b_ref):
        return jnp.dot(a_bf16, w_ref[...], preferred_element_type=f32) + b_ref[...]

    # --- fused stem: the three 1x1 convs (branchNxN[0], branchNxNdbl[0], branch1x1)
    #     in ONE MXU dispatch; channel order [s2 | s3 | s1].
    stem = relu(matmul(xf.astype(bf16), wstem_ref, bstem_ref))        # (M, 3*f1) f32

    def conv3x3(v_f32, w_ref, b_ref):
        """'same' 3x3 conv via im2col: one K = 9*cin matmul."""
        cin = w_ref.shape[0] // 9
        # Interior of the (H+2, W+2) halo buffer (static slice offsets).
        pad_ref[:, 1:H + 1, 1:W + 1, :cin] = v_f32.reshape(B, H, W, cin)
        # 9 statically-shifted windows concatenated along channels -> (M, 9*cin).
        cols = [pad_ref[:, ky:ky + H, kx:kx + W, :cin].reshape(M, cin)
                for ky in range(3) for kx in range(3)]
        patches = jnp.concatenate(cols, axis=-1)
        return relu(matmul(patches.astype(bf16), w_ref, b_ref))

    # First-stage 3x3 convs of branchNxN + branchNxNdbl fused into one block-diagonal
    # matmul over the first 2*f1 stem channels (one halo write, one im2col, one dot).
    fused = conv3x3(stem[:, 0:2 * f1], w23_ref, b23_ref)              # (M, f1 + f3_2)
    b2 = fused[:, 0:f1]                                               # branchNxN output
    b3 = conv3x3(fused[:, f1:], w3c_ref, b3c_ref)                     # branchNxNdbl output
    b1 = stem[:, 2 * f1:3 * f1]                                       # branch1x1 output

    # conv_ln (1x1 conv with real bias) as three accumulating matmuls over row-slabs of
    # wln (no sub-128-lane channel concat), then relu.
    ln = relu(jnp.dot(b1.astype(bf16), wln1_ref[...], preferred_element_type=f32)
              + jnp.dot(b2.astype(bf16), wln2_ref[...], preferred_element_type=f32)
              + jnp.dot(b3.astype(bf16), wln3_ref[...], preferred_element_type=f32)
              + bln_ref[...])

    # residual add with inputs (strides == 1 -> no downsample), bn_ln, relu
    res = xf + ln
    bnln = bnln_ref[...]
    res = relu(res * bnln[0:1, :] + bnln[1:2, :])

    # projection (BN scale folded into wproj, bias added here) + skip connection
    out = matmul(res.astype(bf16), wproj_ref, bproj_ref) + xf

    out_ref[...] = out.reshape(B, H, W, -1).astype(out_ref.dtype)


# ----------------------------------------------------------------------------
# Wrapper: pallas_call with a grid over batch tiles.
# ----------------------------------------------------------------------------
_KP_ORDER = ("wstem", "bstem", "w23", "b23", "w3c", "b3c",
             "wln1", "wln2", "wln3", "bln", "bnln", "wproj", "bproj")


def _pick_b_tile(n):
    # Large tiles amortize the ~0.35us per-grid-step overhead; keep >= 2 grid steps
    # whenever N >= 2 so v7x can shard the "parallel" axis across both TensorCores.
    if n < 2:
        return 1
    return max(1, min(32, n // 2))


@jax.jit
def inception_resnet_block_a(x, kparams):
    N, H, W, Cin = x.shape
    Cout = kparams["wproj"].shape[1]
    cmax = max(kparams["w23"].shape[0] // 9, kparams["w3c"].shape[0] // 9)

    b_tile = _pick_b_tile(N)
    n_steps = pl.cdiv(N, b_tile)
    n_pad = n_steps * b_tile
    if n_pad != N:
        # Robust to non-divisible N: pad the batch with zeros and slice the result back.
        x = jnp.concatenate(
            [x, jnp.zeros((n_pad - N, H, W, Cin), x.dtype)], axis=0)

    weights = [kparams[k] for k in _KP_ORDER]

    in_specs = [pl.BlockSpec((b_tile, H, W, Cin), lambda n: (n, 0, 0, 0))]
    for a in weights:
        in_specs.append(pl.BlockSpec(a.shape, lambda n, _nd=a.ndim: (0,) * _nd))

    out = pl.pallas_call(
        _inception_block_kernel,
        out_shape=jax.ShapeDtypeStruct((n_pad, H, W, Cout), jnp.float32),
        grid=(n_steps,),
        in_specs=in_specs,
        out_specs=pl.BlockSpec((b_tile, H, W, Cout), lambda n: (n, 0, 0, 0)),
        scratch_shapes=[pltpu.VMEM((b_tile, H + 2, W + 2, cmax), jnp.float32)],
        compiler_params=pltpu.CompilerParams(
            dimension_semantics=("parallel",),
            vmem_limit_bytes=64 * 1024 * 1024),
    )(x, *weights)

    return out[:N] if n_pad != N else out


# ----------------------------------------------------------------------------
# Deterministic "module" parameters (shapes follow the module's __init__), with
# BatchNorm already folded (inference) to a per-channel (scale, bias).
# ----------------------------------------------------------------------------
def make_params(key, filters_in, filters_out):
    f1 = round_filters(filters_in / 8)        # filterB1_1 = B2_1 = B2_2 = B3_1
    f3_2 = round_filters(filters_in / 4)      # filterB3_2
    f3_3 = round_filters(filters_in / 2)      # filterB3_3
    cat_c = f1 + f1 + f3_3

    keys = iter(jax.random.split(key, 32))

    def w(shape):
        return 0.1 * jax.random.normal(next(keys), shape, jnp.float32)

    def bn_fold(c, eps):
        kg, kb, km, kv = jax.random.split(next(keys), 4)
        gamma = 1.0 + 0.1 * jax.random.normal(kg, (c,), jnp.float32)
        beta = 0.1 * jax.random.normal(kb, (c,), jnp.float32)
        mean = 0.1 * jax.random.normal(km, (c,), jnp.float32)
        var = 1.0 + 0.1 * jax.random.uniform(kv, (c,), jnp.float32)
        scale = gamma / jnp.sqrt(var + eps)
        bias = beta - mean * scale
        return jnp.stack([scale, bias], axis=0)        # (2, c)

    return {
        # branch1x1
        "w1": w((filters_in, f1)),           "bn1": bn_fold(f1, 1e-3),
        # branchNxN
        "w2a": w((filters_in, f1)),          "bn2a": bn_fold(f1, 1e-3),
        "w2b": w((3, 3, f1, f1)),            "bn2b": bn_fold(f1, 1e-3),
        # branchNxNdbl
        "w3a": w((filters_in, f1)),          "bn3a": bn_fold(f1, 1e-3),
        "w3b": w((3, 3, f1, f3_2)),          "bn3b": bn_fold(f3_2, 1e-3),
        "w3c": w((3, 3, f3_2, f3_3)),        "bn3c": bn_fold(f3_3, 1e-3),
        # conv_ln (has bias) + bn_ln (default eps=1e-5)
        "wln": w((cat_c, filters_in)),
        "bln": 0.1 * jax.random.normal(next(keys), (1, filters_in), jnp.float32),
        "bnln": bn_fold(filters_in, 1e-5),
        # projection (no bias) + bn_project
        "wproj": w((filters_in, filters_out)),
        "bnproj": bn_fold(filters_out, 1e-5),
    }


# ----------------------------------------------------------------------------
# Wrapper-side weight preparation: fold BN scale into conv weights, fuse the three
# stem 1x1 convs, fuse the two first-stage 3x3 convs into one block-diagonal im2col
# weight, split wln into per-branch row-slabs, cast MXU operands to bf16.
# ----------------------------------------------------------------------------
def prepare_kernel_params(p):
    bf16 = jnp.bfloat16

    def fold1x1(w, bn):                       # w: (cin, cout)
        return w * bn[0][None, :], bn[1][None, :]

    def fold3x3(w, bn):                       # w: (3, 3, cin, cout)
        return w * bn[0][None, None, None, :], bn[1][None, :]

    w1, b1 = fold1x1(p["w1"], p["bn1"])
    w2a, b2a = fold1x1(p["w2a"], p["bn2a"])
    w3a, b3a = fold1x1(p["w3a"], p["bn3a"])
    w2b, b2b = fold3x3(p["w2b"], p["bn2b"])   # (3,3,f1,f1)
    w3b, b3b = fold3x3(p["w3b"], p["bn3b"])   # (3,3,f1,f3_2)
    w3c, b3c = fold3x3(p["w3c"], p["bn3c"])   # (3,3,f3_2,f3_3)
    wproj, bproj = fold1x1(p["wproj"], p["bnproj"])

    f1 = w2b.shape[2]
    f3_2 = w3b.shape[3]
    f3_3 = w3c.shape[3]

    # Fused stem, channel order [branchNxN | branchNxNdbl | branch1x1] so the fused
    # 3x3 input slice starts at lane offset 0.
    wstem = jnp.concatenate([w2a, w3a, w1], axis=1).astype(bf16)       # (Cin, 3*f1)
    bstem = jnp.concatenate([b2a, b3a, b1], axis=1)                    # (1, 3*f1)

    # Block-diagonal fusion of the two first-stage 3x3 convs.
    w23 = jnp.zeros((3, 3, 2 * f1, f1 + f3_2), jnp.float32)
    w23 = w23.at[:, :, :f1, :f1].set(w2b)
    w23 = w23.at[:, :, f1:, f1:].set(w3b)
    w23 = w23.reshape(9 * 2 * f1, f1 + f3_2).astype(bf16)
    b23 = jnp.concatenate([b2b, b3b], axis=1)

    wln = p["wln"]   # rows ordered [branch1 | branch2 | branch3] (PyTorch cat order)

    return {
        "wstem": wstem, "bstem": bstem,
        "w23": w23, "b23": b23,
        "w3c": w3c.reshape(9 * f3_2, f3_3).astype(bf16), "b3c": b3c,
        "wln1": wln[0:f1].astype(bf16),
        "wln2": wln[f1:2 * f1].astype(bf16),
        "wln3": wln[2 * f1:].astype(bf16),
        "bln": p["bln"],
        "bnln": p["bnln"],
        "wproj": wproj.astype(bf16), "bproj": bproj,
    }


# ----------------------------------------------------------------------------
# Pure-JAX reference (lax convolutions, same bf16-operand / f32-accumulate math).
# ----------------------------------------------------------------------------
def reference_forward(x, kp):
    relu = lambda v: jnp.maximum(v, 0.0)

    def conv(v, w_hwio):
        return jax.lax.conv_general_dilated(
            v.astype(jnp.bfloat16), w_hwio, (1, 1), "SAME",
            dimension_numbers=("NHWC", "HWIO", "NHWC"),
            preferred_element_type=jnp.float32)

    def as1x1(w):
        return w.reshape(1, 1, *w.shape)

    def as3x3(wflat):
        cin = wflat.shape[0] // 9
        return wflat.reshape(3, 3, cin, wflat.shape[1])

    f1 = kp["wstem"].shape[1] // 3
    stem = relu(conv(x, as1x1(kp["wstem"])) + kp["bstem"][0])
    s23 = stem[..., 0:2 * f1]
    b1 = stem[..., 2 * f1:3 * f1]
    fused = relu(conv(s23, as3x3(kp["w23"])) + kp["b23"][0])
    b2 = fused[..., 0:f1]
    b3 = relu(conv(fused[..., f1:], as3x3(kp["w3c"])) + kp["b3c"][0])

    wln = jnp.concatenate([kp["wln1"], kp["wln2"], kp["wln3"]], axis=0)
    cat = jnp.concatenate([b1, b2, b3], axis=-1)
    ln = relu(conv(cat, as1x1(wln)) + kp["bln"][0])

    out = x + ln
    out = relu(out * kp["bnln"][0] + kp["bnln"][1])
    out = conv(out, as1x1(kp["wproj"])) + kp["bproj"][0]
    return out + x


if __name__ == "__main__":
    N, H, W = 2, 16, 16
    filters_in = filters_out = 32

    key = jax.random.PRNGKey(0)
    kx, kp = jax.random.split(key)
    # NHWC input (equivalent PyTorch NCHW shape would be (2, 32, 16, 16)).
    x = jax.random.normal(kx, (N, H, W, filters_in), jnp.float32)
    raw_params = make_params(kp, filters_in, filters_out)
    kparams = prepare_kernel_params(raw_params)

    out = inception_resnet_block_a(x, kparams)
    out = jax.block_until_ready(out)

    ref = reference_forward(x, kparams)
    err = float(jnp.max(jnp.abs(out - ref)))
    assert out.shape == (N, H, W, filters_out)
    assert err < 1e-2, f"mismatch vs reference: {err}"

    print("KERNEL_OK")
</pallas_src>

<mosaic_0001>
module attributes {stable_mosaic.version = 11 : i64} {
  func.func @_inception_block_kernel(%arg0: i32, %arg1: memref<1x16x16x32xf32, #tpu.memory_space<vmem>>, %arg2: memref<32x24xbf16, #tpu.memory_space<vmem>>, %arg3: memref<1x24xf32, #tpu.memory_space<vmem>>, %arg4: memref<144x16xbf16, #tpu.memory_space<vmem>>, %arg5: memref<1x16xf32, #tpu.memory_space<vmem>>, %arg6: memref<72x16xbf16, #tpu.memory_space<vmem>>, %arg7: memref<1x16xf32, #tpu.memory_space<vmem>>, %arg8: memref<8x32xbf16, #tpu.memory_space<vmem>>, %arg9: memref<8x32xbf16, #tpu.memory_space<vmem>>, %arg10: memref<16x32xbf16, #tpu.memory_space<vmem>>, %arg11: memref<1x32xf32, #tpu.memory_space<vmem>>, %arg12: memref<2x32xf32, #tpu.memory_space<vmem>>, %arg13: memref<32x32xbf16, #tpu.memory_space<vmem>>, %arg14: memref<1x32xf32, #tpu.memory_space<vmem>>, %arg15: memref<1x16x16x32xf32, #tpu.memory_space<vmem>>, %arg16: memref<1x18x18x16xf32, #tpu.memory_space<vmem>>) attributes {dimension_semantics = [#tpu.dimension_semantics<parallel>], iteration_bounds = array<i64: 2>, scalar_prefetch = 0 : i64, scratch_operands = 1 : i64, tpu.core_type = #tpu.core_type<tc>, window_params = [{transform_indices = @transform_0, window_bounds = array<i64: 1, 16, 16, 32>}, {pipeline_mode = #tpu.pipeline_mode<synchronous>, transform_indices = @transform_1, window_bounds = array<i64: 32, 24>}, {pipeline_mode = #tpu.pipeline_mode<synchronous>, transform_indices = @transform_2, window_bounds = array<i64: 1, 24>}, {pipeline_mode = #tpu.pipeline_mode<synchronous>, transform_indices = @transform_3, window_bounds = array<i64: 144, 16>}, {pipeline_mode = #tpu.pipeline_mode<synchronous>, transform_indices = @transform_4, window_bounds = array<i64: 1, 16>}, {pipeline_mode = #tpu.pipeline_mode<synchronous>, transform_indices = @transform_5, window_bounds = array<i64: 72, 16>}, {pipeline_mode = #tpu.pipeline_mode<synchronous>, transform_indices = @transform_6, window_bounds = array<i64: 1, 16>}, {pipeline_mode = #tpu.pipeline_mode<synchronous>, transform_indices = @transform_7, window_bounds = array<i64: 8, 32>}, {pipeline_mode = #tpu.pipeline_mode<synchronous>, transform_indices = @transform_8, window_bounds = array<i64: 8, 32>}, {pipeline_mode = #tpu.pipeline_mode<synchronous>, transform_indices = @transform_9, window_bounds = array<i64: 16, 32>}, {pipeline_mode = #tpu.pipeline_mode<synchronous>, transform_indices = @transform_10, window_bounds = array<i64: 1, 32>}, {pipeline_mode = #tpu.pipeline_mode<synchronous>, transform_indices = @transform_11, window_bounds = array<i64: 2, 32>}, {pipeline_mode = #tpu.pipeline_mode<synchronous>, transform_indices = @transform_12, window_bounds = array<i64: 32, 32>}, {pipeline_mode = #tpu.pipeline_mode<synchronous>, transform_indices = @transform_13, window_bounds = array<i64: 1, 32>}, {transform_indices = @transform_14, window_bounds = array<i64: 1, 16, 16, 32>}]} {
    %cst = arith.constant 0.000000e+00 : f32
    %0 = vector.broadcast %cst : f32 to vector<1x1x18x16xf32>
    %cst_0 = arith.constant 0.000000e+00 : f32
    %1 = vector.broadcast %cst_0 : f32 to vector<1x18x1x16xf32>
    %c0 = arith.constant 0 : index
    %c0_1 = arith.constant 0 : index
    %c0_2 = arith.constant 0 : index
    %c0_3 = arith.constant 0 : index
    %2 = vector.load %arg16[%c0, %c0_1, %c0_2, %c0_3] : memref<1x18x18x16xf32, #tpu.memory_space<vmem>>, vector<1x1x18x16xf32>
    tpu.vector_store %arg16[%c0, %c0_1, %c0_2, %c0_3], %0 {strides = array<i32>} : memref<1x18x18x16xf32, #tpu.memory_space<vmem>>, vector<1x1x18x16xf32>,
    %c0_4 = arith.constant 0 : index
    %c17 = arith.constant 17 : index
    %c0_5 = arith.constant 0 : index
    %c0_6 = arith.constant 0 : index
    %3 = vector.load %arg16[%c0_4, %c17, %c0_5, %c0_6] : memref<1x18x18x16xf32, #tpu.memory_space<vmem>>, vector<1x1x18x16xf32>
    tpu.vector_store %arg16[%c0_4, %c17, %c0_5, %c0_6], %0 {strides = array<i32>} : memref<1x18x18x16xf32, #tpu.memory_space<vmem>>, vector<1x1x18x16xf32>,
    %c0_7 = arith.constant 0 : index
    %c0_8 = arith.constant 0 : index
    %c0_9 = arith.constant 0 : index
    %c0_10 = arith.constant 0 : index
    %4 = vector.load %arg16[%c0_7, %c0_8, %c0_9, %c0_10] : memref<1x18x18x16xf32, #tpu.memory_space<vmem>>, vector<1x18x1x16xf32>
    tpu.vector_store %arg16[%c0_7, %c0_8, %c0_9, %c0_10], %1 {strides = array<i32>} : memref<1x18x18x16xf32, #tpu.memory_space<vmem>>, vector<1x18x1x16xf32>,
    %c0_11 = arith.constant 0 : index
    %c0_12 = arith.constant 0 : index
    %c17_13 = arith.constant 17 : index
    %c0_14 = arith.constant 0 : index
    %5 = vector.load %arg16[%c0_11, %c0_12, %c17_13, %c0_14] : memref<1x18x18x16xf32, #tpu.memory_space<vmem>>, vector<1x18x1x16xf32>
    tpu.vector_store %arg16[%c0_11, %c0_12, %c17_13, %c0_14], %1 {strides = array<i32>} : memref<1x18x18x16xf32, #tpu.memory_space<vmem>>, vector<1x18x1x16xf32>,
    %c0_15 = arith.constant 0 : index
    %c0_16 = arith.constant 0 : index
    %c0_17 = arith.constant 0 : index
    %c0_18 = arith.constant 0 : index
    %6 = vector.load %arg1[%c0_15, %c0_16, %c0_17, %c0_18] : memref<1x16x16x32xf32, #tpu.memory_space<vmem>>, vector<1x16x16x32xf32>
    %7 = vector.shape_cast %6 : vector<1x16x16x32xf32> to vector<256x32xf32>
    %8 = arith.truncf %7 : vector<256x32xf32> to vector<256x32xbf16>
    %c0_19 = arith.constant 0 : index
    %c0_20 = arith.constant 0 : index
    %9 = vector.load %arg2[%c0_19, %c0_20] : memref<32x24xbf16, #tpu.memory_space<vmem>>, vector<32x24xbf16>
    %cst_21 = arith.constant dense<0.000000e+00> : vector<256x24xf32>
    %10 = tpu.matmul %8, %9, %cst_21 {dimension_numbers = #tpu.dot_dimension_numbers<[1], [0], [0], [1], [0, 0, 1, 1], [], []>} : vector<256x32xbf16>, vector<32x24xbf16>, vector<256x24xf32> -> vector<256x24xf32>
    %c0_22 = arith.constant 0 : index
    %c0_23 = arith.constant 0 : index
    %11 = vector.load %arg3[%c0_22, %c0_23] : memref<1x24xf32, #tpu.memory_space<vmem>>, vector<1x24xf32>
    %12 = vector.broadcast %11 : vector<1x24xf32> to vector<256x24xf32>
    %13 = arith.addf %10, %12 : vector<256x24xf32>
    %cst_24 = arith.constant 0.000000e+00 : f32
    %14 = vector.broadcast %cst_24 : f32 to vector<256x24xf32>
    %15 = arith.maximumf %13, %14 : vector<256x24xf32>
    %16 = vector.extract_strided_slice %15 {offsets = [0, 0], sizes = [256, 16], strides = [1, 1]} : vector<256x24xf32> to vector<256x16xf32>
    %17 = vector.shape_cast %16 : vector<256x16xf32> to vector<1x16x16x16xf32>
    %c0_25 = arith.constant 0 : index
    %c1 = arith.constant 1 : index
    %c1_26 = arith.constant 1 : index
    %c0_27 = arith.constant 0 : index
    %18 = vector.load %arg16[%c0_25, %c1, %c1_26, %c0_27] : memref<1x18x18x16xf32, #tpu.memory_space<vmem>>, vector<1x16x16x16xf32>
    tpu.vector_store %arg16[%c0_25, %c1, %c1_26, %c0_27], %17 {strides = array<i32>} : memref<1x18x18x16xf32, #tpu.memory_space<vmem>>, vector<1x16x16x16xf32>,
    %c0_28 = arith.constant 0 : index
    %c0_29 = arith.constant 0 : index
    %c0_30 = arith.constant 0 : index
    %c0_31 = arith.constant 0 : index
    %19 = vector.load %arg16[%c0_28, %c0_29, %c0_30, %c0_31] : memref<1x18x18x16xf32, #tpu.memory_space<vmem>>, vector<1x16x16x16xf32>
    %20 = vector.shape_cast %19 : vector<1x16x16x16xf32> to vector<256x16xf32>
    %c0_32 = arith.constant 0 : index
    %c0_33 = arith.constant 0 : index
    %c1_34 = arith.constant 1 : index
    %c0_35 = arith.constant 0 : index
    %21 = vector.load %arg16[%c0_32, %c0_33, %c1_34, %c0_35] : memref<1x18x18x16xf32, #tpu.memory_space<vmem>>, vector<1x16x16x16xf32>
    %22 = vector.shape_cast %21 : vector<1x16x16x16xf32> to vector<256x16xf32>
    %c0_36 = arith.constant 0 : index
    %c0_37 = arith.constant 0 : index
    %c2 = arith.constant 2 : index
    %c0_38 = arith.constant 0 : index
    %23 = vector.load %arg16[%c0_36, %c0_37, %c2, %c0_38] : memref<1x18x18x16xf32, #tpu.memory_space<vmem>>, vector<1x16x16x16xf32>
    %24 = vector.shape_cast %23 : vector<1x16x16x16xf32> to vector<256x16xf32>
    %c0_39 = arith.constant 0 : index
    %c1_40 = arith.constant 1 : index
    %c0_41 = arith.constant 0 : index
    %c0_42 = arith.constant 0 : index
    %25 = vector.load %arg16[%c0_39, %c1_40, %c0_41, %c0_42] : memref<1x18x18x16xf32, #tpu.memory_space<vmem>>, vector<1x16x16x16xf32>
    %26 = vector.shape_cast %25 : vector<1x16x16x16xf32> to vector<256x16xf32>
    %c0_43 = arith.constant 0 : index
    %c1_44 = arith.constant 1 : index
    %c1_45 = arith.constant 1 : index
    %c0_46 = arith.constant 0 : index
    %27 = vector.load %arg16[%c0_43, %c1_44, %c1_45, %c0_46] : memref<1x18x18x16xf32, #tpu.memory_space<vmem>>, vector<1x16x16x16xf32>
    %28 = vector.shape_cast %27 : vector<1x16x16x16xf32> to vector<256x16xf32>
    %c0_47 = arith.constant 0 : index
    %c1_48 = arith.constant 1 : index
    %c2_49 = arith.constant 2 : index
    %c0_50 = arith.constant 0 : index
    %29 = vector.load %arg16[%c0_47, %c1_48, %c2_49, %c0_50] : memref<1x18x18x16xf32, #tpu.memory_space<vmem>>, vector<1x16x16x16xf32>
    %30 = vector.shape_cast %29 : vector<1x16x16x16xf32> to vector<256x16xf32>
    %c0_51 = arith.constant 0 : index
    %c2_52 = arith.constant 2 : index
    %c0_53 = arith.constant 0 : index
    %c0_54 = arith.constant 0 : index
    %31 = vector.load %arg16[%c0_51, %c2_52, %c0_53, %c0_54] : memref<1x18x18x16xf32, #tpu.memory_space<vmem>>, vector<1x16x16x16xf32>
    %32 = vector.shape_cast %31 : vector<1x16x16x16xf32> to vector<256x16xf32>
    %c0_55 = arith.constant 0 : index
    %c2_56 = arith.constant 2 : index
    %c1_57 = arith.constant 1 : index
    %c0_58 = arith.constant 0 : index
    %33 = vector.load %arg16[%c0_55, %c2_56, %c1_57, %c0_58] : memref<1x18x18x16xf32, #tpu.memory_space<vmem>>, vector<1x16x16x16xf32>
    %34 = vector.shape_cast %33 : vector<1x16x16x16xf32> to vector<256x16xf32>
    %c0_59 = arith.constant 0 : index
    %c2_60 = arith.constant 2 : index
    %c2_61 = arith.constant 2 : index
    %c0_62 = arith.constant 0 : index
    %35 = vector.load %arg16[%c0_59, %c2_60, %c2_61, %c0_62] : memref<1x18x18x16xf32, #tpu.memory_space<vmem>>, vector<1x16x16x16xf32>
    %36 = vector.shape_cast %35 : vector<1x16x16x16xf32> to vector<256x16xf32>
    %37 = tpu.concatenate %20, %22, %24, %26, %28, %30, %32, %34, %36 in 1 : vector<256x16xf32>, vector<256x16xf32>, vector<256x16xf32>, vector<256x16xf32>, vector<256x16xf32>, vector<256x16xf32>, vector<256x16xf32>, vector<256x16xf32>, vector<256x16xf32> -> vector<256x144xf32>
    %38 = arith.truncf %37 : vector<256x144xf32> to vector<256x144xbf16>
    %c0_63 = arith.constant 0 : index
    %c0_64 = arith.constant 0 : index
    %39 = vector.load %arg4[%c0_63, %c0_64] : memref<144x16xbf16, #tpu.memory_space<vmem>>, vector<144x16xbf16>
    %cst_65 = arith.constant dense<0.000000e+00> : vector<256x16xf32>
    %40 = tpu.matmul %38, %39, %cst_65 {dimension_numbers = #tpu.dot_dimension_numbers<[1], [0], [0], [1], [0, 0, 1, 1], [], []>} : vector<256x144xbf16>, vector<144x16xbf16>, vector<256x16xf32> -> vector<256x16xf32>
    %c0_66 = arith.constant 0 : index
    %c0_67 = arith.constant 0 : index
    %41 = vector.load %arg5[%c0_66, %c0_67] : memref<1x16xf32, #tpu.memory_space<vmem>>, vector<1x16xf32>
    %42 = vector.broadcast %41 : vector<1x16xf32> to vector<256x16xf32>
    %43 = arith.addf %40, %42 : vector<256x16xf32>
    %cst_68 = arith.constant 0.000000e+00 : f32
    %44 = vector.broadcast %cst_68 : f32 to vector<256x16xf32>
    %45 = arith.maximumf %43, %44 : vector<256x16xf32>
    %46 = vector.extract_strided_slice %45 {offsets = [0, 0], sizes = [256, 8], strides = [1, 1]} : vector<256x16xf32> to vector<256x8xf32>
    %47 = vector.extract_strided_slice %45 {offsets = [0, 8], sizes = [256, 8], strides = [1, 1]} : vector<256x16xf32> to vector<256x8xf32>
    %48 = vector.shape_cast %47 : vector<256x8xf32> to vector<1x16x16x8xf32>
    %c0_69 = arith.constant 0 : index
    %c1_70 = arith.constant 1 : index
    %c1_71 = arith.constant 1 : index
    %c0_72 = arith.constant 0 : index
    %49 = vector.load %arg16[%c0_69, %c1_70, %c1_71, %c0_72] : memref<1x18x18x16xf32, #tpu.memory_space<vmem>>, vector<1x16x16x8xf32>
    tpu.vector_store %arg16[%c0_69, %c1_70, %c1_71, %c0_72], %48 {strides = array<i32>} : memref<1x18x18x16xf32, #tpu.memory_space<vmem>>, vector<1x16x16x8xf32>,
    %c0_73 = arith.constant 0 : index
    %c0_74 = arith.constant 0 : index
    %c0_75 = arith.constant 0 : index
    %c0_76 = arith.constant 0 : index
    %50 = vector.load %arg16[%c0_73, %c0_74, %c0_75, %c0_76] : memref<1x18x18x16xf32, #tpu.memory_space<vmem>>, vector<1x16x16x8xf32>
    %51 = vector.shape_cast %50 : vector<1x16x16x8xf32> to vector<256x8xf32>
    %c0_77 = arith.constant 0 : index
    %c0_78 = arith.constant 0 : index
    %c1_79 = arith.constant 1 : index
    %c0_80 = arith.constant 0 : index
    %52 = vector.load %arg16[%c0_77, %c0_78, %c1_79, %c0_80] : memref<1x18x18x16xf32, #tpu.memory_space<vmem>>, vector<1x16x16x8xf32>
    %53 = vector.shape_cast %52 : vector<1x16x16x8xf32> to vector<256x8xf32>
    %c0_81 = arith.constant 0 : index
    %c0_82 = arith.constant 0 : index
    %c2_83 = arith.constant 2 : index
    %c0_84 = arith.constant 0 : index
    %54 = vector.load %arg16[%c0_81, %c0_82, %c2_83, %c0_84] : memref<1x18x18x16xf32, #tpu.memory_space<vmem>>, vector<1x16x16x8xf32>
    %55 = vector.shape_cast %54 : vector<1x16x16x8xf32> to vector<256x8xf32>
    %c0_85 = arith.constant 0 : index
    %c1_86 = arith.constant 1 : index
    %c0_87 = arith.constant 0 : index
    %c0_88 = arith.constant 0 : index
    %56 = vector.load %arg16[%c0_85, %c1_86, %c0_87, %c0_88] : memref<1x18x18x16xf32, #tpu.memory_space<vmem>>, vector<1x16x16x8xf32>
    %57 = vector.shape_cast %56 : vector<1x16x16x8xf32> to vector<256x8xf32>
    %c0_89 = arith.constant 0 : index
    %c1_90 = arith.constant 1 : index
    %c1_91 = arith.constant 1 : index
    %c0_92 = arith.constant 0 : index
    %58 = vector.load %arg16[%c0_89, %c1_90, %c1_91, %c0_92] : memref<1x18x18x16xf32, #tpu.memory_space<vmem>>, vector<1x16x16x8xf32>
    %59 = vector.shape_cast %58 : vector<1x16x16x8xf32> to vector<256x8xf32>
    %c0_93 = arith.constant 0 : index
    %c1_94 = arith.constant 1 : index
    %c2_95 = arith.constant 2 : index
    %c0_96 = arith.constant 0 : index
    %60 = vector.load %arg16[%c0_93, %c1_94, %c2_95, %c0_96] : memref<1x18x18x16xf32, #tpu.memory_space<vmem>>, vector<1x16x16x8xf32>
    %61 = vector.shape_cast %60 : vector<1x16x16x8xf32> to vector<256x8xf32>
    %c0_97 = arith.constant 0 : index
    %c2_98 = arith.constant 2 : index
    %c0_99 = arith.constant 0 : index
    %c0_100 = arith.constant 0 : index
    %62 = vector.load %arg16[%c0_97, %c2_98, %c0_99, %c0_100] : memref<1x18x18x16xf32, #tpu.memory_space<vmem>>, vector<1x16x16x8xf32>
    %63 = vector.shape_cast %62 : vector<1x16x16x8xf32> to vector<256x8xf32>
    %c0_101 = arith.constant 0 : index
    %c2_102 = arith.constant 2 : index
    %c1_103 = arith.constant 1 : index
    %c0_104 = arith.constant 0 : index
    %64 = vector.load %arg16[%c0_101, %c2_102, %c1_103, %c0_104] : memref<1x18x18x16xf32, #tpu.memory_space<vmem>>, vector<1x16x16x8xf32>
    %65 = vector.shape_cast %64 : vector<1x16x16x8xf32> to vector<256x8xf32>
    %c0_105 = arith.constant 0 : index
    %c2_106 = arith.constant 2 : index
    %c2_107 = arith.constant 2 : index
    %c0_108 = arith.constant 0 : index
    %66 = vector.load %arg16[%c0_105, %c2_106, %c2_107, %c0_108] : memref<1x18x18x16xf32, #tpu.memory_space<vmem>>, vector<1x16x16x8xf32>
    %67 = vector.shape_cast %66 : vector<1x16x16x8xf32> to vector<256x8xf32>
    %68 = tpu.concatenate %51, %53, %55, %57, %59, %61, %63, %65, %67 in 1 : vector<256x8xf32>, vector<256x8xf32>, vector<256x8xf32>, vector<256x8xf32>, vector<256x8xf32>, vector<256x8xf32>, vector<256x8xf32>, vector<256x8xf32>, vector<256x8xf32> -> vector<256x72xf32>
    %69 = arith.truncf %68 : vector<256x72xf32> to vector<256x72xbf16>
    %c0_109 = arith.constant 0 : index
    %c0_110 = arith.constant 0 : index
    %70 = vector.load %arg6[%c0_109, %c0_110] : memref<72x16xbf16, #tpu.memory_space<vmem>>, vector<72x16xbf16>
    %cst_111 = arith.constant dense<0.000000e+00> : vector<256x16xf32>
    %71 = tpu.matmul %69, %70, %cst_111 {dimension_numbers = #tpu.dot_dimension_numbers<[1], [0], [0], [1], [0, 0, 1, 1], [], []>} : vector<256x72xbf16>, vector<72x16xbf16>, vector<256x16xf32> -> vector<256x16xf32>
    %c0_112 = arith.constant 0 : index
    %c0_113 = arith.constant 0 : index
    %72 = vector.load %arg7[%c0_112, %c0_113] : memref<1x16xf32, #tpu.memory_space<vmem>>, vector<1x16xf32>
    %73 = vector.broadcast %72 : vector<1x16xf32> to vector<256x16xf32>
    %74 = arith.addf %71, %73 : vector<256x16xf32>
    %cst_114 = arith.constant 0.000000e+00 : f32
    %75 = vector.broadcast %cst_114 : f32 to vector<256x16xf32>
    %76 = arith.maximumf %74, %75 : vector<256x16xf32>
    %77 = vector.extract_strided_slice %15 {offsets = [0, 16], sizes = [256, 8], strides = [1, 1]} : vector<256x24xf32> to vector<256x8xf32>
    %78 = arith.truncf %77 : vector<256x8xf32> to vector<256x8xbf16>
    %c0_115 = arith.constant 0 : index
    %c0_116 = arith.constant 0 : index
    %79 = vector.load %arg8[%c0_115, %c0_116] : memref<8x32xbf16, #tpu.memory_space<vmem>>, vector<8x32xbf16>
    %cst_117 = arith.constant dense<0.000000e+00> : vector<256x32xf32>
    %80 = tpu.matmul %78, %79, %cst_117 {dimension_numbers = #tpu.dot_dimension_numbers<[1], [0], [0], [1], [0, 0, 1, 1], [], []>} : vector<256x8xbf16>, vector<8x32xbf16>, vector<256x32xf32> -> vector<256x32xf32>
    %81 = arith.truncf %46 : vector<256x8xf32> to vector<256x8xbf16>
    %c0_118 = arith.constant 0 : index
    %c0_119 = arith.constant 0 : index
    %82 = vector.load %arg9[%c0_118, %c0_119] : memref<8x32xbf16, #tpu.memory_space<vmem>>, vector<8x32xbf16>
    %cst_120 = arith.constant dense<0.000000e+00> : vector<256x32xf32>
    %83 = tpu.matmul %81, %82, %cst_120 {dimension_numbers = #tpu.dot_dimension_numbers<[1], [0], [0], [1], [0, 0, 1, 1], [], []>} : vector<256x8xbf16>, vector<8x32xbf16>, vector<256x32xf32> -> vector<256x32xf32>
    %84 = arith.addf %80, %83 : vector<256x32xf32>
    %85 = arith.truncf %76 : vector<256x16xf32> to vector<256x16xbf16>
    %c0_121 = arith.constant 0 : index
    %c0_122 = arith.constant 0 : index
    %86 = vector.load %arg10[%c0_121, %c0_122] : memref<16x32xbf16, #tpu.memory_space<vmem>>, vector<16x32xbf16>
    %cst_123 = arith.constant dense<0.000000e+00> : vector<256x32xf32>
    %87 = tpu.matmul %85, %86, %cst_123 {dimension_numbers = #tpu.dot_dimension_numbers<[1], [0], [0], [1], [0, 0, 1, 1], [], []>} : vector<256x16xbf16>, vector<16x32xbf16>, vector<256x32xf32> -> vector<256x32xf32>
    %88 = arith.addf %84, %87 : vector<256x32xf32>
    %c0_124 = arith.constant 0 : index
    %c0_125 = arith.constant 0 : index
    %89 = vector.load %arg11[%c0_124, %c0_125] : memref<1x32xf32, #tpu.memory_space<vmem>>, vector<1x32xf32>
    %90 = vector.broadcast %89 : vector<1x32xf32> to vector<256x32xf32>
    %91 = arith.addf %88, %90 : vector<256x32xf32>
    %cst_126 = arith.constant 0.000000e+00 : f32
    %92 = vector.broadcast %cst_126 : f32 to vector<256x32xf32>
    %93 = arith.maximumf %91, %92 : vector<256x32xf32>
    %94 = arith.addf %7, %93 : vector<256x32xf32>
    %c0_127 = arith.constant 0 : index
    %c0_128 = arith.constant 0 : index
    %95 = vector.load %arg12[%c0_127, %c0_128] : memref<2x32xf32, #tpu.memory_space<vmem>>, vector<2x32xf32>
    %96 = vector.extract_strided_slice %95 {offsets = [0, 0], sizes = [1, 32], strides = [1, 1]} : vector<2x32xf32> to vector<1x32xf32>
    %97 = vector.broadcast %96 : vector<1x32xf32> to vector<256x32xf32>
    %98 = arith.mulf %94, %97 : vector<256x32xf32>
    %99 = vector.extract_strided_slice %95 {offsets = [1, 0], sizes = [1, 32], strides = [1, 1]} : vector<2x32xf32> to vector<1x32xf32>
    %100 = vector.broadcast %99 : vector<1x32xf32> to vector<256x32xf32>
    %101 = arith.addf %98, %100 : vector<256x32xf32>
    %cst_129 = arith.constant 0.000000e+00 : f32
    %102 = vector.broadcast %cst_129 : f32 to vector<256x32xf32>
    %103 = arith.maximumf %101, %102 : vector<256x32xf32>
    %104 = arith.truncf %103 : vector<256x32xf32> to vector<256x32xbf16>
    %c0_130 = arith.constant 0 : index
    %c0_131 = arith.constant 0 : index
    %105 = vector.load %arg13[%c0_130, %c0_131] : memref<32x32xbf16, #tpu.memory_space<vmem>>, vector<32x32xbf16>
    %cst_132 = arith.constant dense<0.000000e+00> : vector<256x32xf32>
    %106 = tpu.matmul %104, %105, %cst_132 {dimension_numbers = #tpu.dot_dimension_numbers<[1], [0], [0], [1], [0, 0, 1, 1], [], []>} : vector<256x32xbf16>, vector<32x32xbf16>, vector<256x32xf32> -> vector<256x32xf32>
    %c0_133 = arith.constant 0 : index
    %c0_134 = arith.constant 0 : index
    %107 = vector.load %arg14[%c0_133, %c0_134] : memref<1x32xf32, #tpu.memory_space<vmem>>, vector<1x32xf32>
    %108 = vector.broadcast %107 : vector<1x32xf32> to vector<256x32xf32>
    %109 = arith.addf %106, %108 : vector<256x32xf32>
    %110 = arith.addf %109, %7 : vector<256x32xf32>
    %111 = vector.shape_cast %110 : vector<256x32xf32> to vector<1x16x16x32xf32>
    %c0_135 = arith.constant 0 : index
    %c0_136 = arith.constant 0 : index
    %c0_137 = arith.constant 0 : index
    %c0_138 = arith.constant 0 : index
    %112 = vector.load %arg15[%c0_135, %c0_136, %c0_137, %c0_138] : memref<1x16x16x32xf32, #tpu.memory_space<vmem>>, vector<1x16x16x32xf32>
    tpu.vector_store %arg15[%c0_135, %c0_136, %c0_137, %c0_138], %111 {strides = array<i32>} : memref<1x16x16x32xf32, #tpu.memory_space<vmem>>, vector<1x16x16x32xf32>,
    return
  }
  func.func @transform_0(%arg0: i32) -> (i32, i32, i32, i32) {
    %c0_i32 = arith.constant 0 : i32
    %c0_i32_0 = arith.constant 0 : i32
    %c0_i32_1 = arith.constant 0 : i32
    %c0_i32_2 = arith.constant 0 : i32
    return %arg0, %c0_i32, %c0_i32_0, %c0_i32_1 : i32, i32, i32, i32
  }
  func.func @transform_1(%arg0: i32) -> (i32, i32) {
    %c0_i32 = arith.constant 0 : i32
    %c0_i32_0 = arith.constant 0 : i32
    %c0_i32_1 = arith.constant 0 : i32
    return %c0_i32, %c0_i32_0 : i32, i32
  }
  func.func @transform_2(%arg0: i32) -> (i32, i32) {
    %c0_i32 = arith.constant 0 : i32
    %c0_i32_0 = arith.constant 0 : i32
    %c0_i32_1 = arith.constant 0 : i32
    return %c0_i32, %c0_i32_0 : i32, i32
  }
  func.func @transform_3(%arg0: i32) -> (i32, i32) {
    %c0_i32 = arith.constant 0 : i32
    %c0_i32_0 = arith.constant 0 : i32
    %c0_i32_1 = arith.constant 0 : i32
    return %c0_i32, %c0_i32_0 : i32, i32
  }
  func.func @transform_4(%arg0: i32) -> (i32, i32) {
    %c0_i32 = arith.constant 0 : i32
    %c0_i32_0 = arith.constant 0 : i32
    %c0_i32_1 = arith.constant 0 : i32
    return %c0_i32, %c0_i32_0 : i32, i32
  }
  func.func @transform_5(%arg0: i32) -> (i32, i32) {
    %c0_i32 = arith.constant 0 : i32
    %c0_i32_0 = arith.constant 0 : i32
    %c0_i32_1 = arith.constant 0 : i32
    return %c0_i32, %c0_i32_0 : i32, i32
  }
  func.func @transform_6(%arg0: i32) -> (i32, i32) {
    %c0_i32 = arith.constant 0 : i32
    %c0_i32_0 = arith.constant 0 : i32
    %c0_i32_1 = arith.constant 0 : i32
    return %c0_i32, %c0_i32_0 : i32, i32
  }
  func.func @transform_7(%arg0: i32) -> (i32, i32) {
    %c0_i32 = arith.constant 0 : i32
    %c0_i32_0 = arith.constant 0 : i32
    %c0_i32_1 = arith.constant 0 : i32
    return %c0_i32, %c0_i32_0 : i32, i32
  }
  func.func @transform_8(%arg0: i32) -> (i32, i32) {
    %c0_i32 = arith.constant 0 : i32
    %c0_i32_0 = arith.constant 0 : i32
    %c0_i32_1 = arith.constant 0 : i32
    return %c0_i32, %c0_i32_0 : i32, i32
  }
  func.func @transform_9(%arg0: i32) -> (i32, i32) {
    %c0_i32 = arith.constant 0 : i32
    %c0_i32_0 = arith.constant 0 : i32
    %c0_i32_1 = arith.constant 0 : i32
    return %c0_i32, %c0_i32_0 : i32, i32
  }
  func.func @transform_10(%arg0: i32) -> (i32, i32) {
    %c0_i32 = arith.constant 0 : i32
    %c0_i32_0 = arith.constant 0 : i32
    %c0_i32_1 = arith.constant 0 : i32
    return %c0_i32, %c0_i32_0 : i32, i32
  }
  func.func @transform_11(%arg0: i32) -> (i32, i32) {
    %c0_i32 = arith.constant 0 : i32
    %c0_i32_0 = arith.constant 0 : i32
    %c0_i32_1 = arith.constant 0 : i32
    return %c0_i32, %c0_i32_0 : i32, i32
  }
  func.func @transform_12(%arg0: i32) -> (i32, i32) {
    %c0_i32 = arith.constant 0 : i32
    %c0_i32_0 = arith.constant 0 : i32
    %c0_i32_1 = arith.constant 0 : i32
    return %c0_i32, %c0_i32_0 : i32, i32
  }
  func.func @transform_13(%arg0: i32) -> (i32, i32) {
    %c0_i32 = arith.constant 0 : i32
    %c0_i32_0 = arith.constant 0 : i32
    %c0_i32_1 = arith.constant 0 : i32
    return %c0_i32, %c0_i32_0 : i32, i32
  }
  func.func @transform_14(%arg0: i32) -> (i32, i32, i32, i32) {
    %c0_i32 = arith.constant 0 : i32
    %c0_i32_0 = arith.constant 0 : i32
    %c0_i32_1 = arith.constant 0 : i32
    %c0_i32_2 = arith.constant 0 : i32
    return %arg0, %c0_i32, %c0_i32_0, %c0_i32_1 : i32, i32, i32, i32
  }
}

</mosaic_0001>

<bundles_post_ra>
// kernel: inception_resnet_block_a.1
= control target key start
LH: loop header
LB: loop body
LE: loop exit
PB: predicated region body
PF: predicated region fallthrough
CT: control target
= control target key end

     0   :  { %s11654_s0 = inlined_call_operand.hbm [shape: f32[2,16,16,32], index: 0, kind: input, shape index: {}]   ;;  %s11655_s1 = inlined_call_operand.hbm [shape: bf16[32,24], index: 1, kind: input, shape index: {}]   ;;  %s11656_s2 = inlined_call_operand.hbm [shape: f32[1,24], index: 2, kind: input, shape index: {}]   ;;  %s11657_s3 = inlined_call_operand.hbm [shape: bf16[144,16], index: 3, kind: input, shape index: {}]   ;;  %s11658_s4 = inlined_call_operand.hbm [shape: f32[1,16], index: 4, kind: input, shape index: {}]   ;;  %s11659_s5 = inlined_call_operand.hbm [shape: bf16[72,16], index: 5, kind: input, shape index: {}]   ;;  %s11660_s6 = inlined_call_operand.hbm [shape: f32[1,16], index: 6, kind: input, shape index: {}]   ;;  %s11661_s7 = inlined_call_operand.hbm [shape: bf16[8,32], index: 7, kind: input, shape index: {}]   ;;  %s11662_s8 = inlined_call_operand.hbm [shape: bf16[8,32], index: 8, kind: input, shape index: {}]   ;;  %s11663_s9 = inlined_call_operand.hbm [shape: bf16[16,32], index: 9, kind: input, shape index: {}]   ;;  %s11664_s10 = inlined_call_operand.hbm [shape: f32[1,32], index: 10, kind: input, shape index: {}]   ;;  %s11665_s11 = inlined_call_operand.hbm [shape: f32[2,32], index: 11, kind: input, shape index: {}]   ;;  %s11666_s12 = inlined_call_operand.hbm [shape: bf16[32,32], index: 12, kind: input, shape index: {}]   ;;  %s11667_s13 = inlined_call_operand.hbm [shape: f32[1,32], index: 13, kind: input, shape index: {}]   ;;  %s11668_s14 = inlined_call_operand.hbm [shape: f32[2,16,16,32], index: 14, kind: output, shape index: {}]  }
   0x1   :  { %11679 = sst [smem:[#allocation49_spill]] %s11654_s0 }
   0x2   :  { %11680 = sst [smem:[#allocation50_spill]] %s11655_s1 }
   0x3   :  { %11681 = sst [smem:[#allocation51_spill]] %s11656_s2 }
   0x4   :  { %11682 = sst [smem:[#allocation52_spill]] %s11668_s14 }
   0x5   :  { %19 = vsyncpa [#allocation4], 0 }
   0x6   :  { %21 = vsyncpa [#allocation4 + $0x1], 0 }
   0x7   :  { %22 = vsyncpa [#allocation7], 0 }
   0x8   :  { %23 = vsyncpa [#allocation10], 0 }
   0x9   :  { %24 = vsyncpa [#allocation13], 0 }
   0xa   :  { %25 = vsyncpa [#allocation16], 0 }
   0xb   :  { %26 = vsyncpa [#allocation19], 0 }
   0xc   :  { %27 = vsyncpa [#allocation22], 0 }
   0xd   :  { %28 = vsyncpa [#allocation25], 0 }
   0xe   :  { %29 = vsyncpa [#allocation5], 0 }
   0xf   :  { %31 = vsyncpa [#allocation5 + $0x1], 0  ;;  %s8975_s29 = smov 0   ;;  %s8977_s30 = smov 0  }
  0x10   :  { %s8979_s15 = smov 0   ;;  %s8981_s16 = smov 0  }
  0x11 LB: > { %11683 = sst [smem:[#allocation36_spill]] %s8852_s29  ;;  %s8866_s17 = smov [#allocation6]   ;;  %s8864_s16 = sphi %s8981_s16, %s11746_s16   ;;  %s8860_s15 = sphi %s8979_s15, %s11745_s15   ;;  %s8856_s30 = sphi %s8977_s30, %s11744_s30   ;;  %s8852_s29 = sphi %s8975_s29, %s11743_s29  }
  0x12   : > { %11684 = sst [smem:[#allocation37_spill]] %s8856_s30  ;;  %s379_s18 = sshll.u32 %s8866_s17, 4  ;;  %s9001_s18 = int_to_ptr.vmem [resolvable:$true] %s379_s18 }
  0x13   : > { %s8996_s19 = sadd.s32 4294967295, %s8864_s16   ;;  %p6358_p0 = scmp.ge.s32.totalorder %s8864_s16, 1 }
  0x14   : > { %11685 = sst [smem:[#allocation38_spill]] %s8996_s19  ;;  %p11676_p1 = scmp.eq.s32.totalorder %s8996_s19, 0 }
  0x15   : > { %p367_p2 = scmp.lt.s32.totalorder %s8864_s16, 3  ;;  %s8867_s21 = smov [#allocation9]  }
  0x16   : > { %s403_s22 = sshll.u32 %s8867_s21, 4  ;;  %s8868_s24 = smov [#allocation12]   ;;  %s9016_s22 = int_to_ptr.vmem [resolvable:$true] %s403_s22 }
  0x17   : > { %p9003_p3 = pnand %p6358_p0, %p367_p2  ;;  %s427_s25 = sshll.u32 %s8868_s24, 4  ;;  %s9018_s25 = int_to_ptr.vmem [resolvable:$true] %s427_s25 }
  0x18   : > { %s11689_s1 = sld [smem:[#allocation50_spill]] }
  0x19   : > { %s11686_s20 = scalar_select %p9003_p3, 1, 0 }
  0x1a   : > { %p6982_p5 = pneg %p9003_p3 }
  0x1b   : > { %11687 = sst [smem:[#allocation39_spill]] %s11686_s20 }
  0x1c   : > { %p9012_p6 = pnand %p6982_p5, %p11676_p1 }
  0x1e   : > { %s8376_s28 = scalar_lea.hbm %s11689_s1, 256  ;;  %p9028_p8 = pneg %p9012_p6 }
  0x1f   : > { %p8377_p7 = scmp.ne.s32.totalorder %s11689_s1, %s8376_s28  ;;  %p8383_p11 = scmp.lt.u32.totalorder %s8376_s28, %s11689_s1 }
  0x21   : > { %p8379_p9 = pnand %p9028_p8, %p8377_p7 }
  0x23   : > { %p8380_p10 = pneg %p8379_p9 }
  0x25   : > { %p8385_p12 = pnand %p8383_p11, %p8380_p10 }
  0x27   : > { %8388 = shalt.err (!%p8385_p12)
}
  0x28   : > { %s8389_s14 = scalar_lea.vmem %s9001_s18, 256  ;;  %p8397_p5 = scmp.lt.s32.totalorder %s9001_s18, %s9001_s18 }
  0x29   : > { %p8390_p13 = scmp.ne.s32.totalorder %s9001_s18, %s8389_s14  ;;  %p8398_p4 = scmp.lt.s32.totalorder %s8389_s14, %s8389_s14 }
  0x2b   : > { %p8392_p0 = pnand %p8390_p13, %p9028_p8  ;;  %p8399_p7 = por %p8398_p4, %p8397_p5 }
  0x2d   : > { %p8393_p2 = pneg %p8392_p0 }
  0x2f   : > { %p8400_p9 = pnand %p8399_p7, %p8393_p2 }
  0x31   : > { %8403 = shalt.err (!%p8400_p9)
}
  0x32   : > { %s8869_s26 = smov 64   ;;  %s8870_s20 = smov 4  }
  0x33   : > { %6985 = dma.hbm_to_vmem [thread:$0]  (!%p9012_p6), %s11689_s1, 256, %s9001_s18, [#allocation7], %s8869_s26, %s8869_s26, %s8870_s20  }
  0x34   : > { %s8404_s14 = scalar_lea.hbm %s11657_s3, 1152 }
  0x35   : > { %p8405_p4 = scmp.ne.s32.totalorder %s11657_s3, %s8404_s14  ;;  %p8411_p12 = scmp.lt.u32.totalorder %s8404_s14, %s11657_s3 }
  0x37   : > { %p8407_p10 = pnand %p8405_p4, %p9028_p8 }
  0x39   : > { %p8408_p11 = pneg %p8407_p10 }
  0x3b   : > { %p8413_p13 = pnand %p8411_p12, %p8408_p11 }
  0x3d   : > { %8416 = shalt.err (!%p8413_p13)
}
  0x3e   : > { %s8417_s18 = scalar_lea.vmem %s9016_s22, 1152  ;;  %p8425_p7 = scmp.lt.s32.totalorder %s9016_s22, %s9016_s22 }
  0x3f   : > { %p8418_p0 = scmp.ne.s32.totalorder %s9016_s22, %s8417_s18  ;;  %p8426_p9 = scmp.lt.s32.totalorder %s8417_s18, %s8417_s18 }
  0x41   : > { %p8420_p2 = pnand %p8418_p0, %p9028_p8  ;;  %p8427_p4 = por %p8426_p9, %p8425_p7 }
  0x43   : > { %p8421_p5 = pneg %p8420_p2 }
  0x45   : > { %p8428_p10 = pnand %p8427_p4, %p8421_p5 }
  0x47   : > { %8431 = shalt.err (!%p8428_p10)
}
  0x48   : > { %6991 = dma.hbm_to_vmem [thread:$0]  (!%p9012_p6), %s11657_s3, 1152, %s9016_s22, [#allocation10], %s8869_s26, %s8869_s26, %s8870_s20  }
  0x49   : > { %s8432_s27 = scalar_lea.hbm %s11659_s5, 576 }
  0x4a   : > { %p8433_p11 = scmp.ne.s32.totalorder %s11659_s5, %s8432_s27  ;;  %p8439_p0 = scmp.lt.u32.totalorder %s8432_s27, %s11659_s5 }
  0x4c   : > { %p8435_p12 = pnand %p8433_p11, %p9028_p8 }
  0x4e   : > { %p8436_p13 = pneg %p8435_p12 }
  0x50   : > { %p8441_p2 = pnand %p8439_p0, %p8436_p13 }
  0x52   : > { %8444 = shalt.err (!%p8441_p2)
}
  0x53   : > { %s8445_s22 = scalar_lea.vmem %s9018_s25, 576  ;;  %p8453_p4 = scmp.lt.s32.totalorder %s9018_s25, %s9018_s25 }
  0x54   : > { %p8446_p5 = scmp.ne.s32.totalorder %s9018_s25, %s8445_s22  ;;  %p8454_p10 = scmp.lt.s32.totalorder %s8445_s22, %s8445_s22 }
  0x56   : > { %p8448_p7 = pnand %p8446_p5, %p9028_p8  ;;  %p8455_p11 = por %p8454_p10, %p8453_p4 }
  0x58   : > { %p8449_p9 = pneg %p8448_p7 }
  0x5a   : > { %p8456_p12 = pnand %p8455_p11, %p8449_p9 }
  0x5c   : > { %8459 = shalt.err (!%p8456_p12)
}
  0x5d   : > { %6997 = dma.hbm_to_vmem [thread:$0]  (!%p9012_p6), %s11659_s5, 576, %s9018_s25, [#allocation13], %s8869_s26, %s8869_s26, %s8870_s20  }
  0x5e   : > { %s8871_s29 = smov [#allocation15]   ;;  %s8872_s19 = smov [#allocation18]  }
  0x5f   : > { %s452_s30 = sshll.u32 %s8871_s29, 4  ;;  %s473_s27 = sshll.u32 %s8872_s19, 4  ;;  %s453_s30 = int_to_ptr.vmem [resolvable:$true] %s452_s30  ;;  %s474_s27 = int_to_ptr.vmem [resolvable:$true] %s473_s27 }
  0x60   : > { %s8460_s24 = scalar_lea.hbm %s11661_s7, 64 }
  0x61   : > { %p8461_p13 = scmp.ne.s32.totalorder %s11661_s7, %s8460_s24  ;;  %p8467_p5 = scmp.lt.u32.totalorder %s8460_s24, %s11661_s7 }
  0x63   : > { %p8463_p0 = pnand %p8461_p13, %p9028_p8 }
  0x65   : > { %p8464_p2 = pneg %p8463_p0 }
  0x67   : > { %p8469_p7 = pnand %p8467_p5, %p8464_p2 }
  0x69   : > { %8472 = shalt.err (!%p8469_p7)
}
  0x6a   : > { %s8473_s25 = scalar_lea.vmem %s453_s30, 64  ;;  %p8481_p11 = scmp.lt.s32.totalorder %s453_s30, %s453_s30 }
  0x6b   : > { %p8474_p9 = scmp.ne.s32.totalorder %s453_s30, %s8473_s25  ;;  %p8482_p12 = scmp.lt.s32.totalorder %s8473_s25, %s8473_s25 }
  0x6d   : > { %p8476_p4 = pnand %p8474_p9, %p9028_p8  ;;  %p8483_p1 = por %p8482_p12, %p8481_p11 }
  0x6f   : > { %p8477_p10 = pneg %p8476_p4 }
  0x71   : > { %p8484_p3 = pnand %p8483_p1, %p8477_p10 }
  0x73   : > { %8487 = shalt.err (!%p8484_p3)
}
  0x74   : > { %7003 = dma.hbm_to_vmem [thread:$0]  (!%p9012_p6), %s11661_s7, 64, %s453_s30, [#allocation16]  }
  0x75   : > { %s8488_s28 = scalar_lea.hbm %s11663_s9, 128 }
  0x76   : > { %p8489_p13 = scmp.ne.s32.totalorder %s11663_s9, %s8488_s28  ;;  %p8495_p3 = scmp.lt.u32.totalorder %s8488_s28, %s11663_s9 }
  0x78   : > { %p8491_p0 = pnand %p8489_p13, %p9028_p8 }
  0x7a   : > { %p8492_p1 = pneg %p8491_p0 }
  0x7c   : > { %p8497_p2 = pnand %p8495_p3, %p8492_p1 }
  0x7e   : > { %8500 = shalt.err (!%p8497_p2)
}
  0x7f   : > { %s8501_s18 = scalar_lea.vmem %s474_s27, 128  ;;  %p8509_p4 = scmp.lt.s32.totalorder %s474_s27, %s474_s27 }
  0x80   : > { %p8502_p5 = scmp.ne.s32.totalorder %s474_s27, %s8501_s18  ;;  %p8510_p10 = scmp.lt.s32.totalorder %s8501_s18, %s8501_s18 }
  0x82   : > { %p8504_p7 = pnand %p8502_p5, %p9028_p8  ;;  %p8511_p11 = por %p8510_p10, %p8509_p4 }
  0x84   : > { %p8505_p9 = pneg %p8504_p7 }
  0x86   : > { %p8512_p12 = pnand %p8511_p11, %p8505_p9 }
  0x88   : > { %8515 = shalt.err (!%p8512_p12)
}
  0x89   : > { %7009 = dma.hbm_to_vmem [thread:$0]  (!%p9012_p6), %s11663_s9, 128, %s474_s27, [#allocation19], %s8869_s26, %s8869_s26, %s8870_s20  }
  0x8a   : > { %s8873_s0 = smov [#allocation21]   ;;  %s8874_s1 = smov [#allocation8]  }
  0x8b   : > { %s498_s29 = sshll.u32 %s8873_s0, 4  ;;  %s393_s19 = sshll.u32 %s8874_s1, 4  ;;  %s499_s29 = int_to_ptr.vmem [resolvable:$true] %s498_s29  ;;  %s394_s19 = int_to_ptr.vmem [resolvable:$true] %s393_s19 }
  0x8c   : > { %s8516_s24 = scalar_lea.hbm %s11665_s11, 32 }
  0x8d   : > { %p8517_p13 = scmp.ne.s32.totalorder %s11665_s11, %s8516_s24  ;;  %p8523_p3 = scmp.lt.u32.totalorder %s8516_s24, %s11665_s11 }
  0x8f   : > { %p8519_p0 = pnand %p8517_p13, %p9028_p8 }
  0x91   : > { %p8520_p1 = pneg %p8519_p0 }
  0x93   : > { %p8525_p2 = pnand %p8523_p3, %p8520_p1 }
  0x95   : > { %8528 = shalt.err (!%p8525_p2)
}
  0x96   : > { %s8529_s27 = scalar_lea.vmem %s499_s29, 32  ;;  %p8537_p4 = scmp.lt.s32.totalorder %s499_s29, %s499_s29 }
  0x97   : > { %p8530_p5 = scmp.ne.s32.totalorder %s499_s29, %s8529_s27  ;;  %p8538_p10 = scmp.lt.s32.totalorder %s8529_s27, %s8529_s27 }
  0x99   : > { %p8532_p7 = pnand %p8530_p5, %p9028_p8  ;;  %p8539_p11 = por %p8538_p10, %p8537_p4 }
  0x9b   : > { %p8533_p9 = pneg %p8532_p7 }
  0x9d   : > { %p8540_p12 = pnand %p8539_p11, %p8533_p9 }
  0x9f   : > { %8543 = shalt.err (!%p8540_p12)
}
  0xa0   : > { %7015 = dma.hbm_to_vmem [thread:$0]  (!%p9012_p6), %s11665_s11, 32, %s499_s29, [#allocation22]  }
  0xa1   : > { %s11691_s2 = sld [smem:[#allocation51_spill]] }
  0xa7   : > { %s8544_s17 = scalar_lea.hbm %s11691_s2, 16 }
  0xa8   : > { %p8545_p13 = scmp.ne.s32.totalorder %s11691_s2, %s8544_s17  ;;  %p8551_p3 = scmp.lt.u32.totalorder %s8544_s17, %s11691_s2 }
  0xaa   : > { %p8547_p0 = pnand %p8545_p13, %p9028_p8 }
  0xac   : > { %p8548_p1 = pneg %p8547_p0 }
  0xae   : > { %p8553_p2 = pnand %p8551_p3, %p8548_p1 }
  0xb0   : > { %8556 = shalt.err (!%p8553_p2)
}
  0xb1   : > { %s8557_s30 = scalar_lea.vmem %s394_s19, 16  ;;  %s8564_s29 = scalar_lea.vmem %s394_s19, 32 }
  0xb2   : > { %p8558_p5 = scmp.ne.s32.totalorder %s394_s19, %s8557_s30  ;;  %p8565_p4 = scmp.lt.s32.totalorder %s394_s19, %s394_s19 }
  0xb3   : > { %p8566_p10 = scmp.lt.s32.totalorder %s8564_s29, %s8557_s30 }
  0xb4   : > { %p8560_p7 = pnand %p8558_p5, %p9028_p8 }
  0xb5   : > { %p8567_p11 = por %p8566_p10, %p8565_p4 }
  0xb6   : > { %p8561_p9 = pneg %p8560_p7 }
  0xb8   : > { %p8568_p12 = pnand %p8567_p11, %p8561_p9 }
  0xba   : > { %8571 = shalt.err (!%p8568_p12)
}
  0xbb   : > { %6988 = dma.hbm_to_vmem [thread:$0]  (!%p9012_p6), %s11691_s2, 16, %s394_s19, [#allocation7]  }
  0xbc   : > { %s8875_s0 = smov [#allocation11]   ;;  %s8876_s28 = smov [#allocation14]  }
  0xbd   : > { %s417_s1 = sshll.u32 %s8875_s0, 4  ;;  %s441_s17 = sshll.u32 %s8876_s28, 4  ;;  %s418_s1 = int_to_ptr.vmem [resolvable:$true] %s417_s1  ;;  %s442_s17 = int_to_ptr.vmem [resolvable:$true] %s441_s17 }
  0xbe   : > { %s8572_s22 = scalar_lea.hbm %s11658_s4, 16 }
  0xbf   : > { %p8573_p13 = scmp.ne.s32.totalorder %s11658_s4, %s8572_s22  ;;  %p8579_p3 = scmp.lt.u32.totalorder %s8572_s22, %s11658_s4 }
  0xc1   : > { %p8575_p0 = pnand %p8573_p13, %p9028_p8 }
  0xc3   : > { %p8576_p1 = pneg %p8575_p0 }
  0xc5   : > { %p8581_p2 = pnand %p8579_p3, %p8576_p1 }
  0xc7   : > { %8584 = shalt.err (!%p8581_p2)
}
  0xc8   : > { %s8585_s19 = scalar_lea.vmem %s418_s1, 16  ;;  %s8592_s25 = scalar_lea.vmem %s418_s1, 32 }
  0xc9   : > { %p8586_p5 = scmp.ne.s32.totalorder %s418_s1, %s8585_s19  ;;  %p8593_p4 = scmp.lt.s32.totalorder %s418_s1, %s418_s1 }
  0xca   : > { %p8594_p10 = scmp.lt.s32.totalorder %s8592_s25, %s8585_s19 }
  0xcb   : > { %p8588_p7 = pnand %p8586_p5, %p9028_p8 }
  0xcc   : > { %p8595_p11 = por %p8594_p10, %p8593_p4 }
  0xcd   : > { %p8589_p9 = pneg %p8588_p7 }
  0xcf   : > { %p8596_p12 = pnand %p8595_p11, %p8589_p9 }
  0xd1   : > { %8599 = shalt.err (!%p8596_p12)
}
  0xd2   : > { %6994 = dma.hbm_to_vmem [thread:$0]  (!%p9012_p6), %s11658_s4, 16, %s418_s1, [#allocation10]  }
  0xd3   : > { %s8600_s22 = scalar_lea.hbm %s11660_s6, 16 }
  0xd4   : > { %p8601_p13 = scmp.ne.s32.totalorder %s11660_s6, %s8600_s22  ;;  %p8607_p3 = scmp.lt.u32.totalorder %s8600_s22, %s11660_s6 }
  0xd6   : > { %p8603_p0 = pnand %p8601_p13, %p9028_p8 }
  0xd8   : > { %p8604_p1 = pneg %p8603_p0 }
  0xda   : > { %p8609_p2 = pnand %p8607_p3, %p8604_p1 }
  0xdc   : > { %8612 = shalt.err (!%p8609_p2)
}
  0xdd   : > { %s8613_s19 = scalar_lea.vmem %s442_s17, 16  ;;  %s8620_s1 = scalar_lea.vmem %s442_s17, 32 }
  0xde   : > { %p8614_p5 = scmp.ne.s32.totalorder %s442_s17, %s8613_s19  ;;  %p8621_p4 = scmp.lt.s32.totalorder %s442_s17, %s442_s17 }
  0xdf   : > { %p8622_p10 = scmp.lt.s32.totalorder %s8620_s1, %s8613_s19 }
  0xe0   : > { %p8616_p7 = pnand %p8614_p5, %p9028_p8 }
  0xe1   : > { %p8623_p11 = por %p8622_p10, %p8621_p4 }
  0xe2   : > { %p8617_p9 = pneg %p8616_p7 }
  0xe4   : > { %p8624_p12 = pnand %p8623_p11, %p8617_p9 }
  0xe6   : > { %8627 = shalt.err (!%p8624_p12)
}
  0xe7   : > { %7000 = dma.hbm_to_vmem [thread:$0]  (!%p9012_p6), %s11660_s6, 16, %s442_s17, [#allocation13]  }
  0xe8   : > { %s8877_s28 = smov [#allocation17]   ;;  %s8878_s14 = smov [#allocation20]  }
  0xe9   : > { %s463_s24 = sshll.u32 %s8877_s28, 4  ;;  %s487_s22 = sshll.u32 %s8878_s14, 4  ;;  %s464_s24 = int_to_ptr.vmem [resolvable:$true] %s463_s24  ;;  %s488_s22 = int_to_ptr.vmem [resolvable:$true] %s487_s22 }
  0xea   : > { %s8628_s29 = scalar_lea.hbm %s11662_s8, 64 }
  0xeb   : > { %p8629_p13 = scmp.ne.s32.totalorder %s11662_s8, %s8628_s29  ;;  %p8635_p3 = scmp.lt.u32.totalorder %s8628_s29, %s11662_s8 }
  0xed   : > { %p8631_p0 = pnand %p8629_p13, %p9028_p8 }
  0xef   : > { %p8632_p1 = pneg %p8631_p0 }
  0xf1   : > { %p8637_p2 = pnand %p8635_p3, %p8632_p1 }
  0xf3   : > { %8640 = shalt.err (!%p8637_p2)
}
  0xf4   : > { %s8641_s17 = scalar_lea.vmem %s464_s24, 64  ;;  %p8649_p4 = scmp.lt.s32.totalorder %s464_s24, %s464_s24 }
  0xf5   : > { %p8642_p5 = scmp.ne.s32.totalorder %s464_s24, %s8641_s17  ;;  %p8650_p10 = scmp.lt.s32.totalorder %s8641_s17, %s8641_s17 }
  0xf7   : > { %p8644_p7 = pnand %p8642_p5, %p9028_p8  ;;  %p8651_p11 = por %p8650_p10, %p8649_p4 }
  0xf9   : > { %p8645_p9 = pneg %p8644_p7 }
  0xfb   : > { %p8652_p12 = pnand %p8651_p11, %p8645_p9 }
  0xfd   : > { %8655 = shalt.err (!%p8652_p12)
}
  0xfe   : > { %7006 = dma.hbm_to_vmem [thread:$0]  (!%p9012_p6), %s11662_s8, 64, %s464_s24, [#allocation16]  }
  0xff   : > { %s8656_s30 = scalar_lea.hbm %s11664_s10, 16 }
 0x100   : > { %p8657_p13 = scmp.ne.s32.totalorder %s11664_s10, %s8656_s30  ;;  %p8663_p3 = scmp.lt.u32.totalorder %s8656_s30, %s11664_s10 }
 0x102   : > { %p8659_p0 = pnand %p8657_p13, %p9028_p8 }
 0x104   : > { %p8660_p1 = pneg %p8659_p0 }
 0x106   : > { %p8665_p2 = pnand %p8663_p3, %p8660_p1 }
 0x108   : > { %8668 = shalt.err (!%p8665_p2)
}
 0x109   : > { %s8669_s25 = scalar_lea.vmem %s488_s22, 16  ;;  %s8676_s24 = scalar_lea.vmem %s488_s22, 32 }
 0x10a   : > { %p8670_p5 = scmp.ne.s32.totalorder %s488_s22, %s8669_s25  ;;  %p8677_p4 = scmp.lt.s32.totalorder %s488_s22, %s488_s22 }
 0x10b   : > { %p8678_p10 = scmp.lt.s32.totalorder %s8676_s24, %s8669_s25 }
 0x10c   : > { %p8672_p7 = pnand %p8670_p5, %p9028_p8 }
 0x10d   : > { %p8679_p11 = por %p8678_p10, %p8677_p4 }
 0x10e   : > { %p8673_p9 = pneg %p8672_p7 }
 0x110   : > { %p8680_p12 = pnand %p8679_p11, %p8673_p9 }
 0x112   : > { %8683 = shalt.err (!%p8680_p12)
}
 0x113   : > { %7012 = dma.hbm_to_vmem [thread:$0]  (!%p9012_p6), %s11664_s10, 16, %s488_s22, [#allocation19]  }
 0x114   : > { %s8879_s28 = smov [#allocation23]   ;;  %s8880_s18 = smov [#allocation24]  }
 0x115   : > { %s508_s14 = sshll.u32 %s8879_s28, 4  ;;  %s522_s30 = sshll.u32 %s8880_s18, 4  ;;  %s509_s14 = int_to_ptr.vmem [resolvable:$true] %s508_s14  ;;  %s523_s30 = int_to_ptr.vmem [resolvable:$true] %s522_s30 }
 0x116   : > { %s8684_s19 = scalar_lea.hbm %s11666_s12, 256 }
 0x117   : > { %p8685_p13 = scmp.ne.s32.totalorder %s11666_s12, %s8684_s19  ;;  %p8691_p3 = scmp.lt.u32.totalorder %s8684_s19, %s11666_s12 }
 0x119   : > { %p8687_p0 = pnand %p8685_p13, %p9028_p8 }
 0x11b   : > { %p8688_p1 = pneg %p8687_p0 }
 0x11d   : > { %p8693_p2 = pnand %p8691_p3, %p8688_p1 }
 0x11f   : > { %8696 = shalt.err (!%p8693_p2)
}
 0x120   : > { %s8697_s22 = scalar_lea.vmem %s509_s14, 256  ;;  %p8705_p4 = scmp.lt.s32.totalorder %s509_s14, %s509_s14 }
 0x121   : > { %p8698_p5 = scmp.ne.s32.totalorder %s509_s14, %s8697_s22  ;;  %p8706_p10 = scmp.lt.s32.totalorder %s8697_s22, %s8697_s22 }
 0x123   : > { %p8700_p7 = pnand %p8698_p5, %p9028_p8  ;;  %p8707_p11 = por %p8706_p10, %p8705_p4 }
 0x125   : > { %p8701_p9 = pneg %p8700_p7 }
 0x127   : > { %p8708_p12 = pnand %p8707_p11, %p8701_p9 }
 0x129   : > { %8711 = shalt.err (!%p8708_p12)
}
 0x12a   : > { %7018 = dma.hbm_to_vmem [thread:$0]  (!%p9012_p6), %s11666_s12, 256, %s509_s14, [#allocation22], %s8869_s26, %s8869_s26, %s8870_s20  }
 0x12b   : > { %s8712_s27 = scalar_lea.hbm %s11667_s13, 16 }
 0x12c   : > { %p8713_p13 = scmp.ne.s32.totalorder %s11667_s13, %s8712_s27  ;;  %p8719_p3 = scmp.lt.u32.totalorder %s8712_s27, %s11667_s13 }
 0x12e   : > { %p8715_p0 = pnand %p8713_p13, %p9028_p8 }
 0x130   : > { %p8716_p1 = pneg %p8715_p0 }
 0x132   : > { %p8721_p2 = pnand %p8719_p3, %p8716_p1 }
 0x134   : > { %8724 = shalt.err (!%p8721_p2)
}
 0x135   : > { %s8725_s17 = scalar_lea.vmem %s523_s30, 16  ;;  %s8732_s26 = scalar_lea.vmem %s523_s30, 32 }
 0x136   : > { %p8726_p5 = scmp.ne.s32.totalorder %s523_s30, %s8725_s17  ;;  %p8733_p4 = scmp.lt.s32.totalorder %s523_s30, %s523_s30 }
 0x137   : > { %p8734_p10 = scmp.lt.s32.totalorder %s8732_s26, %s8725_s17 }
 0x138   : > { %p8728_p7 = pnand %p8726_p5, %p9028_p8 }
 0x139   : > { %p8735_p11 = por %p8734_p10, %p8733_p4 }
 0x13a   : > { %p8729_p9 = pneg %p8728_p7 }
 0x13c   : > { %p8736_p12 = pnand %p8735_p11, %p8729_p9 }
 0x13e   : > { %8739 = shalt.err (!%p8736_p12)
}
 0x13f   : > { %s11692_s22 = sld [smem:[#allocation37_spill]]  ;;  %s11693_s21 = sld [smem:[#allocation36_spill]] }
 0x140   : > { %s11694_s0 = sld [smem:[#allocation38_spill]]  ;;  %s6357_s28 = sadd.s32 4294967294, %s8864_s16  }
 0x141   : > { %7021 = dma.hbm_to_vmem [thread:$0]  (!%p9012_p6), %s11667_s13, 16, %s523_s30, [#allocation25]  }
 0x142   : > { %s9292_s23 = sadd.s32 1, %s8864_s16   ;;  %s44_s18 = sadd.s32 1, %s8860_s15 }
 0x143   : > { %s41_s29 = ssub.s32 %s8864_s16, %s9292_s23  ;;  %p52_p0 = scmp.eq.s32.totalorder %s8864_s16, 0 }
 0x144   : > { %p42_p13 = scmp.eq.s32.totalorder %s41_s29, 0  ;;  %p360_p9 = scmp.eq.s32.totalorder %s6357_s28, 1 }
 0x145   : > { %p51_p8 = scmp.ne.s32.totalorder %s8860_s15, %s11692_s22  ;;  %p57_p1 = scmp.ne.s32.totalorder %s11692_s22, %s11693_s21 }
 0x146   : > { %p354_p3 = scmp.eq.s32.totalorder %s11694_s0, 1  ;;  %p11695_p5 = scmp.eq.s32.totalorder %s11694_s0, 0 }
 0x147   : > { %s9304_s27 = scalar_select %p42_p13, %s8860_s15, %s44_s18  }
 0x148   : > { %p53_p2 = por %p52_p0, %p51_p8  ;;  %p9308_p7 = por %p11695_p5, %p57_p1 }
 0x149   : > { %p9312_p6 = por %p354_p3, %p51_p8  ;;  %p7043_p4 = scmp.lt.s32.totalorder %s8864_s16, 2 }
 0x14a   : > { %s533_s1 = sand.u32 1, %s8860_s15   ;;  %p9318_p10 = por %p360_p9, %p57_p1 }
 0x14b   : > { %s11697_s30 = scalar_select %p9312_p6, 1, 0 }
 0x14c   : > { %s11698_s25 = scalar_select %p9318_p10, 1, 0 }
 0x14d   : > { %s6373_s24 = sshll.u32 %s533_s1, 8  ;;  %s6533_s17 = sshll.u32 %s8864_s16, 12 }
 0x14e   : > { %s11699_s14 = sld [smem:[#allocation49_spill]]  ;;  %s537_s21 = scalar_lea.vmem [#allocation3], %s6373_s24 }
 0x14f   : > { %s544_s0 = sshll.u32 %s537_s21, 4  ;;  %p9328_p11 = pnand %p7043_p4, %p53_p2  ;;  %s9332_s0 = int_to_ptr.vmem [resolvable:$true] %s544_s0 }
 0x150   : > { %s9334_s18 = scalar_lea.sflag [#allocation4], %s533_s1 }
 0x151   : > { %p8742_p8 = pneg %p9328_p11 }
 0x154   : > { %s9326_s22 = scalar_lea.hbm %s11699_s14, %s6533_s17  ;;  %s8745_s26 = scalar_lea.hbm %s11699_s14, 8192 }
 0x155   : > { %s8740_s29 = scalar_lea.hbm %s9326_s22, 4096  ;;  %p8746_p1 = scmp.lt.u32.totalorder %s9326_s22, %s11699_s14 }
 0x156   : > { %p8741_p12 = scmp.ne.s32.totalorder %s9326_s22, %s8740_s29  ;;  %p8747_p3 = scmp.lt.u32.totalorder %s8745_s26, %s8740_s29 }
 0x157   : > { %p8749_p5 = scmp.lt.u32.totalorder %s8740_s29, %s9326_s22 }
 0x158   : > { %p8743_p13 = pnand %p8742_p8, %p8741_p12  ;;  %p8748_p2 = por %p8747_p3, %p8746_p1 }
 0x15a   : > { %p8744_p0 = pneg %p8743_p13  ;;  %p8750_p9 = por %p8749_p5, %p8748_p2 }
 0x15c   : > { %p8751_p4 = pnand %p8750_p9, %p8744_p0 }
 0x15e   : > { %8754 = shalt.err (!%p8751_p4)
}
 0x15f   : > { %s8755_s1 = scalar_lea.vmem %s9332_s0, 4096  ;;  %s8881_s24 = smov [#allocation3]  }
 0x160   : > { %p8756_p12 = scmp.ne.s32.totalorder %s9332_s0, %s8755_s1  ;;  %s8760_s17 = sshll.u32 %s8881_s24, 4  ;;  %s8761_s17 = int_to_ptr.vmem [resolvable:$false] %s8760_s17 }
 0x161   : > { %s8762_s20 = scalar_lea.vmem %s8761_s17, 8192  ;;  %p8763_p6 = scmp.lt.s32.totalorder %s9332_s0, %s8761_s17 }
 0x162   : > { %p8758_p13 = pnand %p8756_p12, %p8742_p8  ;;  %p8764_p1 = scmp.lt.s32.totalorder %s8762_s20, %s8755_s1 }
 0x164   : > { %p8759_p10 = pneg %p8758_p13  ;;  %p8765_p3 = por %p8764_p1, %p8763_p6 }
 0x166   : > { %p8766_p2 = pnand %p8765_p3, %p8759_p10 }
 0x168   : > { %8769 = shalt.err (!%p8766_p2)
}
 0x169   : > { %s8882_s29 = smov 128   ;;  %s8883_s26 = smov 8  }
 0x16a   : > { %7025 = dma.hbm_to_vmem [thread:$0]  (!%p9328_p11), %s9326_s22, 4096, %s9332_s0, %s9334_s18, %s8882_s29, %s8882_s29, %s8883_s26  }
 0x16b   : > { %s11701_s21 = sld [smem:[#allocation39_spill]] }
 0x171   : > { %p11702_p8 = scmp.ne.s32.totalorder %s11701_s21, 0 }
 0x173   : > { %556 = sbr.rel (%p11702_p8) target bundleno = 2266 (0x8da), region = 76 }
 0x17a   : > { %s11703_s2 = sld [smem:[#allocation37_spill]] }
 0x180   : > { %s9365_s24 = sand.u32 1, %s11703_s2  }
 0x181   : > { %s6377_s1 = sshll.u32 %s9365_s24, 8  ;;  %s559_s17 = scalar_lea.sflag [#allocation4], %s9365_s24 }
 0x182   : > { %s9371_s20 = scalar_lea.vmem [#allocation3], %s6377_s1 }
 0x183   : > { %8815 = dma.done.wait (%p9308_p7), %s559_s17, 4096  }
 0x184   : > { %8817 = vsyncadd (%p9308_p7), %s559_s17, 4294963200  ;;  %s11704_s22 = sld [smem:[#allocation38_spill]] }
 0x18a   : > { %p11705_p6 = scmp.eq.s32.totalorder %s11704_s22, 0 }
 0x18c   : > { %8819 = dma.done.wait (%p11705_p6), [#allocation7], 272   ;;  %p11706_p10 = pmov %p11705_p6 }
 0x18d   : > { %p11707_p11 = pmov %p11705_p6 }
 0x18e   : > { %8821 = vsyncadd (%p11706_p10), [#allocation7], 4294967024 }
 0x18f   : > { %8823 = dma.done.wait (%p11707_p11), [#allocation10], 1168   ;;  %p11708_p0 = pmov %p11705_p6 }
 0x191   : > { %8825 = vsyncadd (%p11708_p0), [#allocation10], 4294966128  ;;  %p11709_p5 = pmov %p11708_p0 }
 0x192   : > { %p11710_p9 = pmov %p11708_p0 }
 0x193   : > { %8827 = dma.done.wait (%p11709_p5), [#allocation13], 592  }
 0x194   : > { %8829 = vsyncadd (%p11710_p9), [#allocation13], 4294966704  ;;  %p11711_p7 = pmov %p11708_p0 }
 0x195   : > { %p11712_p4 = pmov %p11708_p0 }
 0x196   : > { %8831 = dma.done.wait (%p11711_p7), [#allocation16], 128  }
 0x197   : > { %8833 = vsyncadd (%p11712_p4), [#allocation16], 4294967168  ;;  %p11713_p12 = pmov %p11708_p0 }
 0x198   : > { %p11714_p13 = pmov %p11708_p0 }
 0x199   : > { %8835 = dma.done.wait (%p11713_p12), [#allocation19], 144  }
 0x19a   : > { %8837 = vsyncadd (%p11714_p13), [#allocation19], 4294967152  ;;  %p11715_p1 = pmov %p11708_p0 }
 0x19b   : > { %p11716_p3 = pmov %p11708_p0 }
 0x19c   : > { %8839 = dma.done.wait (%p11715_p1), [#allocation22], 288  }
 0x19d   : > { %8841 = vsyncadd (%p11716_p3), [#allocation22], 4294967008  ;;  %p11717_p2 = pmov %p11708_p0 }
 0x19e   : > { %p11718_p8 = pmov %p11708_p0 }
 0x19f   : > { %8843 = dma.done.wait (%p11717_p2), [#allocation25], 16  }
 0x1a0   : > { %8845 = vsyncadd (%p11718_p8), [#allocation25], 4294967280  ;;  %v8322_v0 = vld [vmem:[#allocation6] sm:$0xff]   ;;  %v8323_v1 = vld [vmem:[#allocation6 + $0x8] sm:$0xff]   ;;  %vm777_vm0 = vcmask 261120   ;;  %vm660_vm1 = vcmask 130048  }
 0x1a1   : > { %6643 = vmatprep.subr.bf16.mxu1 %v8322_v0  ;;  %v706_v2 = vld [vmem:[%s9371_s20] sm:$0xff]  ;;  %v707_v3 = vld [vmem:[%s9371_s20 + $0x8] sm:$0xff]  ;;  %v708_v5 = vld [vmem:[%s9371_s20 + $0x10] sm:$0xff]  ;;  %vm663_vm2 = vcmask 123904   ;;  %v8884_v50 = vmov 0.0   ;;  %vm669_vm3 = vcmask 122880  }
 0x1a2   : > { %6644 = vmatpush3.bf16.msra.mxu1 %v8322_v0  ;;  %v738_v4 = vpack.c.bf16 %v707_v3, %v706_v2  ;;  %v709_v6 = vld [vmem:[%s9371_s20 + $0x18] sm:$0xff]  ;;  %v710_v7 = vld [vmem:[%s9371_s20 + $0x20] sm:$0xff]  ;;  %v711_v8 = vld [vmem:[%s9371_s20 + $0x28] sm:$0xff]  ;;  %661 = vst.msk [vmem:[#allocation2] sm:$0xff] %vm660_vm1, %v8884_v50  ;;  %s8885_s2 = smov 16   ;;  %s8886_s19 = smov 32  }
 0x1a3   : > { %6645 = vmatprep.subr.bf16.mxu1 %v8323_v1  ;;  %v739_v9 = vpack.c.bf16 %v709_v6, %v708_v5  ;;  %v740_v10 = vpack.c.bf16 %v711_v8, %v710_v7  ;;  %v712_v11 = vld [vmem:[%s9371_s20 + $0x30] sm:$0xff]  ;;  %v713_v12 = vld [vmem:[%s9371_s20 + $0x38] sm:$0xff]  ;;  %v714_v13 = vld [vmem:[%s9371_s20 + $0x40] sm:$0xff]  ;;  %662 = vst.msk [vmem:[#allocation2 + $0x8] sm:$0xff] %vm660_vm1, %v8884_v50  ;;  %v8887_v58 = vmov 0   ;;  %s8888_s0 = smov 96  }
 0x1a4   : > { %6647 = vmatprep.mubr.msk.bf16.mxu1 %vm777_vm0, %v738_v4  ;;  %v715_v14 = vld [vmem:[%s9371_s20 + $0x48] sm:$0xff]  ;;  %v741_v15 = vpack.c.bf16 %v713_v12, %v712_v11  ;;  %v716_v17 = vld [vmem:[%s9371_s20 + $0x50] sm:$0xff]  ;;  %v717_v18 = vld [vmem:[%s9371_s20 + $0x58] sm:$0xff]  ;;  %664 = vst.msk [vmem:[#allocation2 + $0x10] sm:$0x3] %vm663_vm2, %v8884_v50  ;;  %s8889_s28 = smov 112  }
 0x1a5   : > { %v742_v16 = vpack.c.bf16 %v715_v14, %v714_v13  ;;  %v718_v19 = vld [vmem:[%s9371_s20 + $0x60] sm:$0xff]  ;;  %v719_v20 = vld [vmem:[%s9371_s20 + $0x68] sm:$0xff]  ;;  %v743_v21 = vpack.c.bf16 %v717_v18, %v716_v17  ;;  %v720_v23 = vld [vmem:[%s9371_s20 + $0x70] sm:$0xff]  ;;  %668 = vst.msk [vmem:[#allocation2 + $0x1a8] sm:$0x3] %vm663_vm2, %v8884_v50  ;;  %s8890_s18 = smov 48  }
 0x1a6   : > { %6646 = vmatpush3.bf16.msra.mxu1 %v8323_v1  ;;  %v744_v22 = vpack.c.bf16 %v719_v20, %v718_v19  ;;  %v721_v24 = vld [vmem:[%s9371_s20 + $0x78] sm:$0xff]  ;;  %v722_v25 = vld [vmem:[%s9371_s20 + $0x80] sm:$0xff]  ;;  %v723_v26 = vld [vmem:[%s9371_s20 + $0x88] sm:$0xff]  ;;  %666 = vst.msk [vmem:[#allocation2 + $0x198] sm:$0xff] %vm660_vm1, %v8884_v50  ;;  %s8891_s29 = smov 64   ;;  %s8892_s26 = smov 80  }
 0x1a7   : > { %v745_v27 = vpack.c.bf16 %v721_v24, %v720_v23  ;;  %v746_v28 = vpack.c.bf16 %v723_v26, %v722_v25  ;;  %v724_v29 = vld [vmem:[%s9371_s20 + $0x90] sm:$0xff]  ;;  %v725_v30 = vld [vmem:[%s9371_s20 + $0x98] sm:$0xff]  ;;  %v726_v31 = vld [vmem:[%s9371_s20 + $0xa0] sm:$0xff]  ;;  %667 = vst.msk [vmem:[#allocation2 + $0x1a0] sm:$0xff] %vm660_vm1, %v8884_v50  ;;  %2625 = vmatprep.subr.bf16.mxu1 %v8887_v58  ;;  %vm2301_vm4 = vcmask 392192   ;;  %vm2334_vm5 = vcmask 523264  }
 0x1a8   : > { %v727_v32 = vld [vmem:[%s9371_s20 + $0xa8] sm:$0xff]  ;;  %v747_v33 = vpack.c.bf16 %v725_v30, %v724_v29  ;;  %v728_v35 = vld [vmem:[%s9371_s20 + $0xb0] sm:$0xff]  ;;  %v729_v36 = vld [vmem:[%s9371_s20 + $0xb8] sm:$0xff]  ;;  %688 = vst.msk [vmem:[#allocation2 + $0x11] sm:$0x1] %vm669_vm3, %v8884_v50  ;;  %vm2367_vm6 = vcmask 654336  }
 0x1a9   : > { %6648 = vmatmul.mubr.msk.bf16.vlgmr.msra.gmra.mrb[0].mxu1 %vm777_vm0, %v739_v9  ;;  %v748_v34 = vpack.c.bf16 %v727_v32, %v726_v31  ;;  %v730_v37 = vld [vmem:[%s9371_s20 + $0xc0] sm:$0xff]  ;;  %v731_v38 = vld [vmem:[%s9371_s20 + $0xc8] sm:$0xff]  ;;  %v749_v39 = vpack.c.bf16 %v729_v36, %v728_v35  ;;  %v732_v41 = vld [vmem:[%s9371_s20 + $0xd0] sm:$0xff]  ;;  %670 = vst.msk [vmem:[#allocation2] sm:$0x1] %vm669_vm3, %v8884_v50  ;;  %vm2400_vm7 = vcmask 785408  }
 0x1aa   : > { %6651 = vmatprep.mubr.msk.bf16.mxu1 %vm777_vm0, %v740_v10  ;;  %v750_v40 = vpack.c.bf16 %v731_v38, %v730_v37  ;;  %v733_v42 = vld [vmem:[%s9371_s20 + $0xd8] sm:$0xff]  ;;  %v734_v43 = vld [vmem:[%s9371_s20 + $0xe0] sm:$0xff]  ;;  %v735_v44 = vld [vmem:[%s9371_s20 + $0xe8] sm:$0xff]  ;;  %671 = vst.msk [vmem:[#allocation2 + $0x18] sm:$0x1] %vm669_vm3, %v8884_v50  ;;  %vm2433_vm8 = vcmask 916480  }
 0x1ab   : > { %v751_v45 = vpack.c.bf16 %v733_v42, %v732_v41  ;;  %v752_v46 = vpack.c.bf16 %v735_v44, %v734_v43  ;;  %v736_v47 = vld [vmem:[%s9371_s20 + $0xf0] sm:$0xff]  ;;  %v737_v48 = vld [vmem:[%s9371_s20 + $0xf8] sm:$0xff]  ;;  %672 = vst.msk [vmem:[#allocation2 + $0x30] sm:$0x1] %vm669_vm3, %v8884_v50  ;;  %673 = vst.msk [vmem:[#allocation2 + $0x48] sm:$0x1] %vm669_vm3, %v8884_v50 }
 0x1ac   : > { %v753_v49 = vpack.c.bf16 %v737_v48, %v736_v47  ;;  %674 = vst.msk [vmem:[#allocation2 + $0x60] sm:$0x1] %vm669_vm3, %v8884_v50  ;;  %675 = vst.msk [vmem:[#allocation2 + $0x78] sm:$0x1] %vm669_vm3, %v8884_v50  ;;  %v1084_v51 = vld [vmem:[#allocation2 + $0x1] sm:$0xff]  ;;  %v1085_v52 = vld [vmem:[#allocation2 + $0x9] sm:$0xff] }
 0x1ad   : > { %676 = vst.msk [vmem:[#allocation2 + $0x90] sm:$0x1] %vm669_vm3, %v8884_v50  ;;  %677 = vst.msk [vmem:[#allocation2 + $0xa8] sm:$0x1] %vm669_vm3, %v8884_v50  ;;  %v7122_v53 = vpack.i.bf16 %v1085_v52, %v1084_v51  ;;  %v1116_v54 = vld [vmem:[#allocation2 + $0x2] sm:$0xff]  ;;  %v8325_v60 = vld [vmem:[#allocation9 + $0x8] sm:$0xff]  }
 0x1ae   : > { %678 = vst.msk [vmem:[#allocation2 + $0xc0] sm:$0x1] %vm669_vm3, %v8884_v50  ;;  %679 = vst.msk [vmem:[#allocation2 + $0xd8] sm:$0x1] %vm669_vm3, %v8884_v50  ;;  %v8324_v57 = vld [vmem:[#allocation9] sm:$0xff]   ;;  %v8326_v7 = vld [vmem:[#allocation9 + $0x10] sm:$0xff]  }
 0x1af   : > { %680 = vst.msk [vmem:[#allocation2 + $0xf0] sm:$0x1] %vm669_vm3, %v8884_v50  ;;  %681 = vst.msk [vmem:[#allocation2 + $0x108] sm:$0x1] %vm669_vm3, %v8884_v50  ;;  %7123 = vrot.lane.b32.xlu0 %v7122_v53, %s8885_s2  ;;  %v1117_v55 = vld [vmem:[#allocation2 + $0xa] sm:$0xff]  ;;  %2626 = vmatpush1.bf16.msra.mxu1 %v8324_v57  ;;  %v8327_v13 = vld [vmem:[#allocation9 + $0x18] sm:$0xff]  }
 0x1b0   : > { %682 = vst.msk [vmem:[#allocation2 + $0x120] sm:$0x1] %vm669_vm3, %v8884_v50  ;;  %683 = vst.msk [vmem:[#allocation2 + $0x138] sm:$0x1] %vm669_vm3, %v8884_v50  ;;  %v7127_v56 = vpack.i.bf16 %v1117_v55, %v1116_v54  ;;  %2627 = vmatprep.subr.bf16.mxu1 %v8887_v58  ;;  %v9497_v59 = vld [vmem:[#allocation8] ss:$0 sm:$0xff] }
 0x1b1   : > { %6652 = vmatmul.mubr.msk.bf16.gmra.mrb[4].mxu1 %vm777_vm0, %v741_v15  ;;  %684 = vst.msk [vmem:[#allocation2 + $0x150] sm:$0x1] %vm669_vm3, %v8884_v50  ;;  %685 = vst.msk [vmem:[#allocation2 + $0x168] sm:$0x1] %vm669_vm3, %v8884_v50  ;;  %v8328_v23 = vld [vmem:[#allocation9 + $0x20] sm:$0xff]   ;;  %v8329_v38 = vld [vmem:[#allocation9 + $0x28] sm:$0xff]  }
 0x1b2   : > { %6655 = vmatprep.mubr.msk.bf16.mxu1 %vm777_vm0, %v742_v16  ;;  %686 = vst.msk [vmem:[#allocation2 + $0x180] sm:$0x1] %vm669_vm3, %v8884_v50  ;;  %687 = vst.msk [vmem:[#allocation2 + $0x198] sm:$0x1] %vm669_vm3, %v8884_v50  ;;  %v8330_v48 = vld [vmem:[#allocation9 + $0x30] sm:$0xff]   ;;  %v8331_v55 = vld [vmem:[#allocation9 + $0x38] sm:$0xff]  }
 0x1b3   : > { %689 = vst.msk [vmem:[#allocation2 + $0x29] sm:$0x1] %vm669_vm3, %v8884_v50  ;;  %690 = vst.msk [vmem:[#allocation2 + $0x41] sm:$0x1] %vm669_vm3, %v8884_v50  ;;  %7128 = vrot.lane.b32.xlu0 %v7127_v56, %s8886_s19  ;;  %2628 = vmatpush1.bf16.msra.mxu1 %v8325_v60  ;;  %s8893_s21 = smov 8   ;;  %s8894_s17 = smov 56  }
 0x1b4   : > { %691 = vst.msk [vmem:[#allocation2 + $0x59] sm:$0x1] %vm669_vm3, %v8884_v50  ;;  %692 = vst.msk [vmem:[#allocation2 + $0x71] sm:$0x1] %vm669_vm3, %v8884_v50  ;;  %2629 = vmatprep.subr.bf16.mxu1 %v8887_v58  ;;  %vm2946_vm9 = vcmask 64512   ;;  %vm4658_vm10 = vcmask 1043456  }
 0x1b5   : > { %693 = vst.msk [vmem:[#allocation2 + $0x89] sm:$0x1] %vm669_vm3, %v8884_v50  ;;  %694 = vst.msk [vmem:[#allocation2 + $0xa1] sm:$0x1] %vm669_vm3, %v8884_v50  ;;  %vm4355_vm11 = vcmask 195584   ;;  %vm4420_vm12 = vcmask 326656  }
 0x1b6   : > { %695 = vst.msk [vmem:[#allocation2 + $0xb9] sm:$0x1] %vm669_vm3, %v8884_v50  ;;  %696 = vst.msk [vmem:[#allocation2 + $0xd1] sm:$0x1] %vm669_vm3, %v8884_v50  ;;  %vm4485_vm13 = vcmask 457728   ;;  %vm4609_vm14 = vcmask 588800  }
 0x1b7   : > { %697 = vst.msk [vmem:[#allocation2 + $0xe9] sm:$0x1] %vm669_vm3, %v8884_v50  ;;  %698 = vst.msk [vmem:[#allocation2 + $0x101] sm:$0x1] %vm669_vm3, %v8884_v50  ;;  %2630 = vmatpush1.bf16.msra.mxu1 %v8326_v7  ;;  %v8332_v7 = vld [vmem:[#allocation9 + $0x40] sm:$0xff]   ;;  %p11738_p10 = scmp.ne.s32.totalorder %s11697_s30, 0 }
 0x1b8   : > { %699 = vst.msk [vmem:[#allocation2 + $0x119] sm:$0x1] %vm669_vm3, %v8884_v50  ;;  %700 = vst.msk [vmem:[#allocation2 + $0x131] sm:$0x1] %vm669_vm3, %v8884_v50  ;;  %2631 = vmatprep.subr.bf16.mxu1 %v8887_v58 }
 0x1b9   : > { %6656 = vmatmul.mubr.msk.bf16.gmra.mrb[8].mxu1 %vm777_vm0, %v743_v21  ;;  %701 = vst.msk [vmem:[#allocation2 + $0x149] sm:$0x1] %vm669_vm3, %v8884_v50  ;;  %702 = vst.msk [vmem:[#allocation2 + $0x161] sm:$0x1] %vm669_vm3, %v8884_v50 }
 0x1ba   : > { %6659 = vmatprep.mubr.msk.bf16.mxu1 %vm777_vm0, %v744_v22  ;;  %703 = vst.msk [vmem:[#allocation2 + $0x179] sm:$0x1] %vm669_vm3, %v8884_v50  ;;  %704 = vst.msk [vmem:[#allocation2 + $0x191] sm:$0x1] %vm669_vm3, %v8884_v50 }
 0x1bb   : > { %705 = vst.msk [vmem:[#allocation2 + $0x1a9] sm:$0x1] %vm669_vm3, %v8884_v50  ;;  %2632 = vmatpush1.bf16.msra.mxu1 %v8327_v13 }
 0x1bc   : > { %2633 = vmatprep.subr.bf16.mxu1 %v8887_v58 }
 0x1bf   : > { %2634 = vmatpush1.bf16.msra.mxu1 %v8328_v23 }
 0x1c0   : > { %2635 = vmatprep.subr.bf16.mxu1 %v8887_v58 }
 0x1c1   : > { %6660 = vmatmul.mubr.msk.bf16.gmra.mrb[12].mxu1 %vm777_vm0, %v745_v27 }
 0x1c2   : > { %6663 = vmatprep.mubr.msk.bf16.mxu1 %vm777_vm0, %v746_v28 }
 0x1c3   : > { %2636 = vmatpush1.bf16.msra.mxu1 %v8329_v38 }
 0x1c4   : > { %2637 = vmatprep.subr.bf16.mxu1 %v8887_v58 }
 0x1c7   : > { %2638 = vmatpush1.bf16.msra.mxu1 %v8330_v48 }
 0x1c8   : > { %2639 = vmatprep.subr.bf16.mxu1 %v8887_v58 }
 0x1c9   : > { %6664 = vmatmul.mubr.msk.bf16.gmra.mrb[16].mxu1 %vm777_vm0, %v747_v33 }
 0x1ca   : > { %6667 = vmatprep.mubr.msk.bf16.mxu1 %vm777_vm0, %v748_v34 }
 0x1cb   : > { %2640 = vmatpush1.bf16.msra.mxu1 %v8331_v55 }
 0x1cc   : > { %2641 = vmatprep.subr.bf16.mxu1 %v8887_v58 }
 0x1cf   : > { %2642 = vmatpush1.bf16.msra.mxu1 %v8332_v7 }
 0x1d1   : > { %6668 = vmatmul.mubr.msk.bf16.gmra.mrb[20].mxu1 %vm777_vm0, %v749_v39 }
 0x1d2   : > { %6671 = vmatprep.mubr.msk.bf16.mxu1 %vm777_vm0, %v750_v40 }
 0x1d9   : > { %6672 = vmatmul.mubr.msk.bf16.gmra.mrb[24].mxu1 %vm777_vm0, %v751_v45 }
 0x1da   : > { %6675 = vmatprep.mubr.msk.bf16.mxu1 %vm777_vm0, %v752_v46 }
 0x1e1   : > { %6676 = vmatmul.mubr.msk.bf16.gmra.mrb[28].mxu1 %vm777_vm0, %v753_v49 }
 0x27c   : > { %v6649_v61 = vpop.f32.mrb[0].mxu1 }
 0x27d   : > { %v869_v62 = vadd.f32 %v6649_v61, %v9497_v59  ;;  %v860_v63 = vpop.f32.mrb[1].mxu1 }
 0x27e   : > { %v861_v0 = vadd.f32 %v9497_v59, %v860_v63  ;;  %v6650_v1 = vpop.f32.mrb[2].mxu1 }
 0x27f   : > { %v989_v2 = vmax.f32 %v869_v62, 0.0  ;;  %v872_v3 = vadd.f32 %v6650_v1, %v9497_v59  ;;  %v863_v4 = vpop.f32.mrb[3].mxu1 }
 0x280   : > { %v987_v5 = vmax.f32 %v861_v0, 0.0  ;;  %v864_v6 = vadd.f32 %v9497_v59, %v863_v4 }
 0x281   : > { %1022 = vst.msk [vmem:[#allocation2 + $0x31] sm:$0xff] %vm660_vm1, %v989_v2  ;;  %v990_v8 = vmax.f32 %v872_v3, 0.0 }
 0x282   : > { %1020 = vst.msk [vmem:[#allocation2 + $0x19] sm:$0xff] %vm660_vm1, %v987_v5  ;;  %v988_v9 = vmax.f32 %v864_v6, 0.0 }
 0x283   : > { %1023 = vst.msk [vmem:[#allocation2 + $0x39] sm:$0xff] %vm660_vm1, %v990_v8  ;;  %v9507_v10 = vpack.c.bf16 %v990_v8, %v989_v2 }
 0x284   : > { %1021 = vst.msk [vmem:[#allocation2 + $0x21] sm:$0xff] %vm660_vm1, %v988_v9  ;;  %v9511_v11 = vpack.c.bf16 %v988_v9, %v987_v5  ;;  %v6653_v12 = vpop.f32.mrb[4].mxu1 }
 0x285   : > { %v885_v14 = vadd.f32 %v6653_v12, %v9497_v59  ;;  %v876_v15 = vpop.f32.mrb[5].mxu1 }
 0x286   : > { %v877_v16 = vadd.f32 %v9497_v59, %v876_v15  ;;  %v6654_v17 = vpop.f32.mrb[6].mxu1 }
 0x287   : > { %v993_v18 = vmax.f32 %v885_v14, 0.0  ;;  %v888_v19 = vadd.f32 %v6654_v17, %v9497_v59  ;;  %v879_v20 = vpop.f32.mrb[7].mxu1 }
 0x288   : > { %v991_v21 = vmax.f32 %v877_v16, 0.0  ;;  %v880_v22 = vadd.f32 %v9497_v59, %v879_v20  ;;  %v9518_v24 = vld [vmem:[#allocation2 + $0x30] sm:$0xff] }
 0x289   : > { %1026 = vst.msk [vmem:[#allocation2 + $0x61] sm:$0xff] %vm660_vm1, %v993_v18  ;;  %v994_v25 = vmax.f32 %v888_v19, 0.0  ;;  %v1277_v32 = vld [vmem:[#allocation2 + $0x31] sm:$0xff] }
 0x28a   : > { %v1309_v26 = vld [vmem:[#allocation2 + $0x32] sm:$0xff]  ;;  %v1310_v27 = vld [vmem:[#allocation2 + $0x3a] sm:$0xff]  ;;  %1024 = vst.msk [vmem:[#allocation2 + $0x49] sm:$0xff] %vm660_vm1, %v991_v21  ;;  %v992_v29 = vmax.f32 %v880_v22, 0.0 }
 0x28b   : > { %v9521_v28 = vld [vmem:[#allocation2 + $0x38] sm:$0xff]  ;;  %v2467_v30 = vpack.c.bf16 %v1310_v27, %v1309_v26  ;;  %1027 = vst.msk [vmem:[#allocation2 + $0x69] sm:$0xff] %vm660_vm1, %v994_v25  ;;  %v9527_v34 = vpack.c.bf16 %v994_v25, %v993_v18  ;;  %v7152_v51 = vpack.i.bf16 %v1310_v27, %v1309_v26  ;;  %v1213_v57 = vld [vmem:[#allocation2 + $0x22] sm:$0xff] }
 0x28c   : > { %v7132_v31 = vpack.i.bf16 %v9521_v28, %v9518_v24  ;;  %v1278_v33 = vld [vmem:[#allocation2 + $0x39] sm:$0xff]  ;;  %1025 = vst.msk [vmem:[#allocation2 + $0x51] sm:$0xff] %vm660_vm1, %v992_v29  ;;  %v9531_v36 = vpack.c.bf16 %v992_v29, %v991_v21  ;;  %v6657_v37 = vpop.f32.mrb[8].mxu1  ;;  %v1181_v16 = vld [vmem:[#allocation2 + $0x21] sm:$0xff] }
 0x28d   : > { %v7137_v35 = vpack.i.bf16 %v1278_v33, %v1277_v32  ;;  %6421 = vmatprep.mubr.msk.bf16.mxu1 %vm660_vm1, %v2467_v30  ;;  %v901_v39 = vadd.f32 %v6657_v37, %v9497_v59  ;;  %v892_v40 = vpop.f32.mrb[9].mxu1  ;;  %v1212_v56 = vld [vmem:[#allocation2 + $0x1a] sm:$0xff] }
 0x28e   : > { %7133 = vrot.lane.b32.xlu1 %v7132_v31, %s8888_s0  ;;  %v893_v41 = vadd.f32 %v9497_v59, %v892_v40  ;;  %v6658_v42 = vpop.f32.mrb[10].mxu1  ;;  %v7177_v3 = vpack.i.bf16 %v1213_v57, %v1212_v56  ;;  %v9558_v4 = vld [vmem:[#allocation2 + $0x20] sm:$0xff]  ;;  %v9564_v9 = vld [vmem:[#allocation2 + $0x18] sm:$0xff] }
 0x28f   : > { %7138 = vrot.lane.b32.xlu0 %v7137_v35, %s8889_s28  ;;  %v997_v43 = vmax.f32 %v901_v39, 0.0  ;;  %v904_v44 = vadd.f32 %v6658_v42, %v9497_v59  ;;  %v895_v45 = vpop.f32.mrb[11].mxu1  ;;  %v7167_v58 = vpack.i.bf16 %v9558_v4, %v9564_v9  ;;  %v1180_v21 = vld [vmem:[#allocation2 + $0x19] sm:$0xff] }
 0x290   : > { %v995_v46 = vmax.f32 %v893_v41, 0.0  ;;  %v896_v47 = vadd.f32 %v9497_v59, %v895_v45  ;;  %v1281_v13 = vld [vmem:[#allocation2 + $0x61] sm:$0xff]  ;;  %v7172_v26 = vpack.i.bf16 %v1181_v16, %v1180_v21 }
 0x291   : > { %1030 = vst.msk [vmem:[#allocation2 + $0x91] sm:$0xff] %vm660_vm1, %v997_v43  ;;  %v998_v49 = vmax.f32 %v904_v44, 0.0  ;;  %v9588_v38 = vld [vmem:[#allocation2 + $0x60] sm:$0xff] }
 0x292   : > { %7143 = vrot.lane.b32.xlu1 %v7132_v31, %s8890_s18  ;;  %1028 = vst.msk [vmem:[#allocation2 + $0x79] sm:$0xff] %vm660_vm1, %v995_v46  ;;  %v996_v50 = vmax.f32 %v896_v47, 0.0  ;;  %v1282_v14 = vld [vmem:[#allocation2 + $0x69] sm:$0xff] }
 0x293   : > { %7148 = vrot.lane.b32.xlu0 %v7137_v35, %s8891_s29  ;;  %1031 = vst.msk [vmem:[#allocation2 + $0x99] sm:$0xff] %vm660_vm1, %v998_v49  ;;  %v9546_v52 = vpack.c.bf16 %v998_v49, %v997_v43  ;;  %v7197_v22 = vpack.i.bf16 %v1282_v14, %v1281_v13  ;;  %v9590_v39 = vld [vmem:[#allocation2 + $0x68] sm:$0xff]  ;;  %v1248_v55 = vld [vmem:[#allocation2 + $0x50] sm:$0xff] }
 0x294   : > { %1029 = vst.msk [vmem:[#allocation2 + $0x81] sm:$0xff] %vm660_vm1, %v996_v50  ;;  %v9550_v53 = vpack.c.bf16 %v996_v50, %v995_v46  ;;  %v6661_v54 = vpop.f32.mrb[12].mxu1  ;;  %v7192_v46 = vpack.i.bf16 %v9590_v39, %v9588_v38  ;;  %v9620_v16 = vld [vmem:[#allocation2 + $0x4a] sm:$0xff] }
 0x295   : > { %v917_v60 = vadd.f32 %v6661_v54, %v9497_v59  ;;  %v908_v61 = vpop.f32.mrb[13].mxu1  ;;  %v1247_v54 = vld [vmem:[#allocation2 + $0x48] sm:$0xff] }
 0x296   : > { %7153 = vrot.lane.b32.xlu1 %v7152_v51, %s8892_s26  ;;  %v909_v62 = vadd.f32 %v9497_v59, %v908_v61  ;;  %v6662_v63 = vpop.f32.mrb[14].mxu1  ;;  %v7227_v61 = vpack.i.bf16 %v1248_v55, %v1247_v54 }
 0x297   : > { %7158 = vrot.lane.b32.xlu0 %v7137_v35, %s8885_s2  ;;  %v1001_v0 = vmax.f32 %v917_v60, 0.0  ;;  %v920_v1 = vadd.f32 %v6662_v63, %v9497_v59  ;;  %v911_v2 = vpop.f32.mrb[15].mxu1  ;;  %v1219_v63 = vld [vmem:[#allocation2 + $0x6a] sm:$0xff] }
 0x298   : > { %v999_v5 = vmax.f32 %v909_v62, 0.0  ;;  %v912_v6 = vadd.f32 %v9497_v59, %v911_v2  ;;  %v1218_v62 = vld [vmem:[#allocation2 + $0x62] sm:$0xff] }
 0x299   : > { %1034 = vst.msk [vmem:[#allocation2 + $0xc1] sm:$0xff] %vm660_vm1, %v1001_v0  ;;  %v1002_v8 = vmax.f32 %v920_v1, 0.0  ;;  %v7212_v7 = vpack.i.bf16 %v1219_v63, %v1218_v62 }
 0x29a   : > { %7163 = vrot.lane.b32.xlu1 %v7152_v51, %s8886_s19  ;;  %1032 = vst.msk [vmem:[#allocation2 + $0xa9] sm:$0xff] %vm660_vm1, %v999_v5  ;;  %v1000_v12 = vmax.f32 %v912_v6, 0.0  ;;  %v1222_v62 = vld [vmem:[#allocation2 + $0x92] sm:$0xff]  ;;  %v1223_v63 = vld [vmem:[#allocation2 + $0x9a] sm:$0xff] }
 0x29b   : > { %7178 = vrot.lane.b32.xlu0 %v7177_v3, %s8892_s26  ;;  %1035 = vst.msk [vmem:[#allocation2 + $0xc9] sm:$0xff] %vm660_vm1, %v1002_v8  ;;  %v9570_v15 = vpack.c.bf16 %v1002_v8, %v1001_v0 }
 0x29c   : > { %1033 = vst.msk [vmem:[#allocation2 + $0xb1] sm:$0xff] %vm660_vm1, %v1000_v12  ;;  %v9573_v17 = vpack.c.bf16 %v1000_v12, %v999_v5  ;;  %v6665_v18 = vpop.f32.mrb[16].mxu1 }
 0x29d   : > { %v933_v19 = vadd.f32 %v6665_v18, %v9497_v59  ;;  %v924_v20 = vpop.f32.mrb[17].mxu1  ;;  %v9622_v18 = vld [vmem:[#allocation2 + $0x52] sm:$0xff] }
 0x29e   : > { %7168 = vrot.lane.b32.xlu1 %v7167_v58, %s8890_s18  ;;  %v925_v23 = vadd.f32 %v9497_v59, %v924_v20  ;;  %v6666_v25 = vpop.f32.mrb[18].mxu1 }
 0x29f   : > { %7188 = vrot.lane.b32.xlu0 %v7177_v3, %s8886_s19  ;;  %v1005_v27 = vmax.f32 %v933_v19, 0.0  ;;  %v936_v29 = vadd.f32 %v6666_v25, %v9497_v59  ;;  %v927_v30 = vpop.f32.mrb[19].mxu1  ;;  %v1280_v25 = vld [vmem:[#allocation2 + $0x51] sm:$0xff] }
 0x2a0   : > { %v1003_v31 = vmax.f32 %v925_v23, 0.0  ;;  %v928_v32 = vadd.f32 %v9497_v59, %v927_v30  ;;  %v1279_v23 = vld [vmem:[#allocation2 + $0x49] sm:$0xff]  ;;  %v1286_v30 = vld [vmem:[#allocation2 + $0x99] sm:$0xff] }
 0x2a1   : > { %1038 = vst.msk [vmem:[#allocation2 + $0xf1] sm:$0xff] %vm660_vm1, %v1005_v27  ;;  %v1006_v33 = vmax.f32 %v936_v29, 0.0  ;;  %v1285_v29 = vld [vmem:[#allocation2 + $0x91] sm:$0xff] }
 0x2a2   : > { %7173 = vrot.lane.b32.xlu1 %v7172_v26, %s8891_s29  ;;  %1036 = vst.msk [vmem:[#allocation2 + $0xd9] sm:$0xff] %vm660_vm1, %v1003_v31  ;;  %v1004_v35 = vmax.f32 %v928_v32, 0.0  ;;  %v7267_v32 = vpack.i.bf16 %v1286_v30, %v1285_v29  ;;  %v1227_v29 = vld [vmem:[#allocation2 + $0xca] sm:$0xff] }
 0x2a3   : > { %7198 = vrot.lane.b32.xlu0 %v7197_v22, %s8889_s28  ;;  %1039 = vst.msk [vmem:[#allocation2 + $0xf9] sm:$0xff] %vm660_vm1, %v1006_v33  ;;  %v9586_v37 = vpack.c.bf16 %v1006_v33, %v1005_v27  ;;  %v7232_v27 = vpack.i.bf16 %v1280_v25, %v1279_v23  ;;  %v1256_v23 = vld [vmem:[#allocation2 + $0xb0] sm:$0xff] }
 0x2a4   : > { %1037 = vst.msk [vmem:[#allocation2 + $0xe1] sm:$0xff] %vm660_vm1, %v1004_v35  ;;  %v9593_v40 = vpack.c.bf16 %v1004_v35, %v1003_v31  ;;  %v6669_v41 = vpop.f32.mrb[20].mxu1 }
 0x2a5   : > { %v949_v42 = vadd.f32 %v6669_v41, %v9497_v59  ;;  %v940_v43 = vpop.f32.mrb[21].mxu1 }
 0x2a6   : > { %7183 = vrot.lane.b32.xlu1 %v7172_v26, %s8885_s2  ;;  %v941_v44 = vadd.f32 %v9497_v59, %v940_v43  ;;  %v6670_v45 = vpop.f32.mrb[22].mxu1 }
 0x2a7   : > { %7208 = vrot.lane.b32.xlu0 %v7197_v22, %s8891_s29  ;;  %v1009_v47 = vmax.f32 %v949_v42, 0.0  ;;  %v952_v48 = vadd.f32 %v6670_v45, %v9497_v59  ;;  %v943_v49 = vpop.f32.mrb[23].mxu1 }
 0x2a8   : > { %v1007_v50 = vmax.f32 %v941_v44, 0.0  ;;  %v944_v51 = vadd.f32 %v9497_v59, %v943_v49  ;;  %v1253_v49 = vld [vmem:[#allocation2 + $0x90] sm:$0xff] }
 0x2a9   : > { %1042 = vst.msk [vmem:[#allocation2 + $0x121] sm:$0xff] %vm660_vm1, %v1009_v47  ;;  %v1010_v56 = vmax.f32 %v952_v48, 0.0 }
 0x2aa   : > { %7193 = vrot.lane.b32.xlu1 %v7192_v46, %s8888_s0  ;;  %1040 = vst.msk [vmem:[#allocation2 + $0x109] sm:$0xff] %vm660_vm1, %v1007_v50  ;;  %v1008_v57 = vmax.f32 %v944_v51, 0.0 }
 0x2ab   : > { %7218 = vrot.lane.b32.xlu0 %v7197_v22, %s8885_s2  ;;  %1043 = vst.msk [vmem:[#allocation2 + $0x129] sm:$0xff] %vm660_vm1, %v1010_v56  ;;  %v9608_v60 = vpack.c.bf16 %v1010_v56, %v1009_v47  ;;  %v7247_v22 = vpack.i.bf16 %v9622_v18, %v9620_v16 }
 0x2ac   : > { %1041 = vst.msk [vmem:[#allocation2 + $0x111] sm:$0xff] %vm660_vm1, %v1008_v57  ;;  %v9611_v0 = vpack.c.bf16 %v1008_v57, %v1007_v50  ;;  %v6673_v1 = vpop.f32.mrb[24].mxu1  ;;  %v1254_v50 = vld [vmem:[#allocation2 + $0x98] sm:$0xff] }
 0x2ad   : > { %v965_v2 = vadd.f32 %v6673_v1, %v9497_v59  ;;  %v956_v3 = vpop.f32.mrb[25].mxu1  ;;  %v7262_v55 = vpack.i.bf16 %v1254_v50, %v1253_v49  ;;  %v1251_v57 = vld [vmem:[#allocation2 + $0x78] sm:$0xff]  ;;  %v7282_v1 = vpack.i.bf16 %v1223_v63, %v1222_v62 }
 0x2ae   : > { %7203 = vrot.lane.b32.xlu1 %v7192_v46, %s8890_s18  ;;  %v957_v5 = vadd.f32 %v9497_v59, %v956_v3  ;;  %v6674_v6 = vpop.f32.mrb[26].mxu1  ;;  %v9662_v3 = vld [vmem:[#allocation2 + $0x82] sm:$0xff]  ;;  %v1230_v62 = vld [vmem:[#allocation2 + $0xf2] sm:$0xff]  ;;  %v1231_v63 = vld [vmem:[#allocation2 + $0xfa] sm:$0xff] }
 0x2af   : > { %7228 = vrot.lane.b32.xlu0 %v7227_v61, %s8888_s0  ;;  %v1013_v8 = vmax.f32 %v965_v2, 0.0  ;;  %v968_v12 = vadd.f32 %v6674_v6, %v9497_v59  ;;  %v959_v58 = vpop.f32.mrb[27].mxu1  ;;  %v9660_v2 = vld [vmem:[#allocation2 + $0x7a] sm:$0xff] }
 0x2b0   : > { %v1011_v13 = vmax.f32 %v957_v5, 0.0  ;;  %v960_v14 = vadd.f32 %v9497_v59, %v959_v58  ;;  %v7317_v5 = vpack.i.bf16 %v9662_v3, %v9660_v2  ;;  %v1283_v6 = vld [vmem:[#allocation2 + $0x79] sm:$0xff]  ;;  %v1290_v58 = vld [vmem:[#allocation2 + $0xc9] sm:$0xff] }
 0x2b1   : > { %1046 = vst.msk [vmem:[#allocation2 + $0x151] sm:$0xff] %vm660_vm1, %v1013_v8  ;;  %v1014_v19 = vmax.f32 %v968_v12, 0.0  ;;  %v1289_v12 = vld [vmem:[#allocation2 + $0xc1] sm:$0xff] }
 0x2b2   : > { %7213 = vrot.lane.b32.xlu1 %v7212_v7, %s8892_s26  ;;  %1044 = vst.msk [vmem:[#allocation2 + $0x139] sm:$0xff] %vm660_vm1, %v1011_v13  ;;  %v1012_v20 = vmax.f32 %v960_v14, 0.0  ;;  %v1257_v14 = vld [vmem:[#allocation2 + $0xc0] sm:$0xff] }
 0x2b3   : > { %7238 = vrot.lane.b32.xlu0 %v7227_v61, %s8890_s18  ;;  %1047 = vst.msk [vmem:[#allocation2 + $0x159] sm:$0xff] %vm660_vm1, %v1014_v19  ;;  %v9628_v21 = vpack.c.bf16 %v1014_v19, %v1013_v8  ;;  %v1258_v19 = vld [vmem:[#allocation2 + $0xc8] sm:$0xff] }
 0x2b4   : > { %1045 = vst.msk [vmem:[#allocation2 + $0x141] sm:$0xff] %vm660_vm1, %v1012_v20  ;;  %v9633_v26 = vpack.c.bf16 %v1012_v20, %v1011_v13  ;;  %v6677_v31 = vpop.f32.mrb[28].mxu1  ;;  %v7337_v13 = vpack.i.bf16 %v1290_v58, %v1289_v12  ;;  %v7332_v20 = vpack.i.bf16 %v1258_v19, %v1257_v14  ;;  %v1291_v14 = vld [vmem:[#allocation2 + $0xd9] sm:$0xff]  ;;  %v1292_v19 = vld [vmem:[#allocation2 + $0xe1] sm:$0xff] }
 0x2b5   : > { %11719 = vst [vmem:[#allocation40_spill] sm:$0xff] %v9628_v21  ;;  %v972_v33 = vpop.f32.mrb[29].mxu1  ;;  %v981_v35 = vadd.f32 %v6677_v31, %v9497_v59  ;;  %v1224_v31 = vld [vmem:[#allocation2 + $0xaa] sm:$0xff] }
 0x2b6   : > { %7223 = vrot.lane.b32.xlu1 %v7212_v7, %s8886_s19  ;;  %v973_v41 = vadd.f32 %v9497_v59, %v972_v33  ;;  %v6678_v42 = vpop.f32.mrb[30].mxu1  ;;  %v1284_v7 = vld [vmem:[#allocation2 + $0x81] sm:$0xff] }
 0x2b7   : > { %7248 = vrot.lane.b32.xlu0 %v7247_v22, %s8892_s26  ;;  %v984_v43 = vadd.f32 %v6678_v42, %v9497_v59  ;;  %v1017_v44 = vmax.f32 %v981_v35, 0.0  ;;  %v975_v47 = vpop.f32.mrb[31].mxu1  ;;  %v7302_v8 = vpack.i.bf16 %v1284_v7, %v1283_v6  ;;  %v1287_v35 = vld [vmem:[#allocation2 + $0xa9] sm:$0xff]  ;;  %v1228_v7 = vld [vmem:[#allocation2 + $0xda] sm:$0xff] }
 0x2b8   : > { %v1015_v45 = vmax.f32 %v973_v41, 0.0  ;;  %v976_v48 = vadd.f32 %v9497_v59, %v975_v47  ;;  %v1252_v59 = vld [vmem:[#allocation2 + $0x80] sm:$0xff]  ;;  %v1288_v41 = vld [vmem:[#allocation2 + $0xb1] sm:$0xff] }
 0x2b9   : > { %v1018_v46 = vmax.f32 %v984_v43, 0.0  ;;  %1050 = vst.msk [vmem:[#allocation2 + $0x181] sm:$0xff] %vm660_vm1, %v1017_v44  ;;  %v7297_v61 = vpack.i.bf16 %v1252_v59, %v1251_v57  ;;  %v7372_v42 = vpack.i.bf16 %v1288_v41, %v1287_v35  ;;  %v1293_v43 = vld [vmem:[#allocation2 + $0xf1] sm:$0xff] }
 0x2ba   : > { %7233 = vrot.lane.b32.xlu1 %v7232_v27, %s8889_s28  ;;  %1048 = vst.msk [vmem:[#allocation2 + $0x169] sm:$0xff] %vm660_vm1, %v1015_v45  ;;  %v1016_v54 = vmax.f32 %v976_v48, 0.0  ;;  %v1261_v47 = vld [vmem:[#allocation2 + $0xf0] sm:$0xff]  ;;  %v1262_v48 = vld [vmem:[#allocation2 + $0xf8] sm:$0xff] }
 0x2bb   : > { %7258 = vrot.lane.b32.xlu0 %v7247_v22, %s8886_s19  ;;  %1051 = vst.msk [vmem:[#allocation2 + $0x189] sm:$0xff] %vm660_vm1, %v1018_v46  ;;  %v9648_v51 = vpack.c.bf16 %v1018_v46, %v1017_v44  ;;  %v1255_v22 = vld [vmem:[#allocation2 + $0xa8] sm:$0xff]  ;;  %v1294_v44 = vld [vmem:[#allocation2 + $0xf9] sm:$0xff]  ;;  %v7124_v46 = vpop.permute.xlu0 %7123  ;;  %v7402_v50 = vpack.i.bf16 %v1262_v48, %v1261_v47 }
 0x2bc   : > { %1049 = vst.msk [vmem:[#allocation2 + $0x171] sm:$0xff] %vm660_vm1, %v1016_v54  ;;  %v9653_v56 = vpack.c.bf16 %v1016_v54, %v1015_v45  ;;  %v7367_v25 = vpack.i.bf16 %v1256_v23, %v1255_v22  ;;  %v7407_v45 = vpack.i.bf16 %v1294_v44, %v1293_v43  ;;  %v1259_v54 = vld [vmem:[#allocation2 + $0xd8] sm:$0xff]  ;;  %v7442_v23 = vpack.i.bf16 %v1292_v19, %v1291_v14 }
 0x2bd   : > { %11720 = vst [vmem:[#allocation41_spill] sm:$0xff] %v9648_v51 }
 0x2be   : > { %7243 = vrot.lane.b32.xlu1 %v7232_v27, %s8891_s29  ;;  %11721 = vst [vmem:[#allocation42_spill] sm:$0xff] %v9653_v56 }
 0x2bf   : > { %7268 = vrot.lane.b32.xlu0 %v7267_v32, %s8889_s28  ;;  %v7129_v49 = vpop.permute.xlu0 %7128 }
 0x2c2   : > { %7253 = vrot.lane.b32.xlu1 %v7232_v27, %s8885_s2  ;;  %v1226_v27 = vld [vmem:[#allocation2 + $0xc2] sm:$0xff] }
 0x2c3   : > { %7278 = vrot.lane.b32.xlu0 %v7267_v32, %s8891_s29  ;;  %v7352_v30 = vpack.i.bf16 %v1227_v29, %v1226_v27  ;;  %v1298_v27 = vld [vmem:[#allocation2 + $0x129] sm:$0xff]  ;;  %v7126_v29 = vunpack.i.h.bf16 %v7124_v46 }
 0x2c6   : > { %7263 = vrot.lane.b32.xlu1 %v7262_v55, %s8888_s0 }
 0x2c7   : > { %7288 = vrot.lane.b32.xlu0 %v7267_v32, %s8885_s2  ;;  %v1225_v32 = vld [vmem:[#allocation2 + $0xb2] sm:$0xff] }
 0x2c8   : > { %v7387_v33 = vpack.i.bf16 %v1225_v32, %v1224_v31  ;;  %v1053_v32 = vld [vmem:[#allocation2 + $0x8] sm:$0xff] }
 0x2c9   : > { %v2238_v44 = vsel %vm660_vm1, %v1053_v32, %v7126_v29 }
 0x2ca   : > { %7273 = vrot.lane.b32.xlu1 %v7262_v55, %s8890_s18  ;;  %v1260_v55 = vld [vmem:[#allocation2 + $0xe0] sm:$0xff] }
 0x2cb   : > { %7298 = vrot.lane.b32.xlu0 %v7297_v61, %s8888_s0 }
 0x2ce   : > { %7283 = vrot.lane.b32.xlu1 %v7282_v1, %s8892_s26 }
 0x2cf   : > { %7308 = vrot.lane.b32.xlu0 %v7297_v61, %s8890_s18  ;;  %v7437_v61 = vpack.i.bf16 %v1260_v55, %v1259_v54 }
 0x2d2   : > { %7293 = vrot.lane.b32.xlu1 %v7282_v1, %s8886_s19 }
 0x2d3   : > { %7318 = vrot.lane.b32.xlu0 %v7317_v5, %s8892_s26 }
 0x2d6   : > { %7303 = vrot.lane.b32.xlu1 %v7302_v8, %s8889_s28 }
 0x2d7   : > { %7328 = vrot.lane.b32.xlu0 %v7317_v5, %s8886_s19  ;;  %v7422_v5 = vpack.i.bf16 %v1231_v63, %v1230_v62 }
 0x2da   : > { %7313 = vrot.lane.b32.xlu1 %v7302_v8, %s8891_s29 }
 0x2db   : > { %7338 = vrot.lane.b32.xlu0 %v7337_v13, %s8889_s28 }
 0x2de   : > { %7323 = vrot.lane.b32.xlu1 %v7302_v8, %s8885_s2  ;;  %v1229_v8 = vld [vmem:[#allocation2 + $0xe2] sm:$0xff] }
 0x2df   : > { %7348 = vrot.lane.b32.xlu0 %v7337_v13, %s8891_s29 }
 0x2e2   : > { %7333 = vrot.lane.b32.xlu1 %v7332_v20, %s8888_s0 }
 0x2e3   : > { %7358 = vrot.lane.b32.xlu0 %v7337_v13, %s8885_s2  ;;  %v7457_v13 = vpack.i.bf16 %v1229_v8, %v1228_v7 }
 0x2e6   : > { %7343 = vrot.lane.b32.xlu1 %v7332_v20, %s8890_s18  ;;  %v7125_v20 = vunpack.i.l.bf16 %v7124_v46  ;;  %v1265_v46 = vld [vmem:[#allocation2 + $0x120] sm:$0xff] }
 0x2e7   : > { %7368 = vrot.lane.b32.xlu0 %v7367_v25, %s8888_s0 }
 0x2ea   : > { %7353 = vrot.lane.b32.xlu1 %v7352_v30, %s8892_s26 }
 0x2eb   : > { %7378 = vrot.lane.b32.xlu0 %v7367_v25, %s8890_s18  ;;  %v1297_v25 = vld [vmem:[#allocation2 + $0x121] sm:$0xff] }
 0x2ec   : > { %v7477_v35 = vpack.i.bf16 %v1298_v27, %v1297_v25 }
 0x2ee   : > { %7363 = vrot.lane.b32.xlu1 %v7352_v30, %s8886_s19  ;;  %v1052_v30 = vld [vmem:[#allocation2] sm:$0xff] }
 0x2ef   : > { %7388 = vrot.lane.b32.xlu0 %v7387_v33, %s8892_s26  ;;  %v2237_v41 = vsel %vm660_vm1, %v1052_v30, %v7125_v20 }
 0x2f2   : > { %7373 = vrot.lane.b32.xlu1 %v7372_v42, %s8889_s28 }
 0x2f3   : > { %7398 = vrot.lane.b32.xlu0 %v7387_v33, %s8886_s19  ;;  %v7130_v33 = vunpack.i.l.bf16 %v7129_v49 }
 0x2f5   : > { %v2269_v54 = vsel %vm777_vm0, %v2237_v41, %v7130_v33 }
 0x2f6   : > { %7383 = vrot.lane.b32.xlu1 %v7372_v42, %s8891_s29 }
 0x2f7   : > { %7408 = vrot.lane.b32.xlu0 %v7407_v45, %s8889_s28 }
 0x2fa   : > { %7393 = vrot.lane.b32.xlu1 %v7372_v42, %s8885_s2  ;;  %v7131_v42 = vunpack.i.h.bf16 %v7129_v49 }
 0x2fb   : > { %7418 = vrot.lane.b32.xlu0 %v7407_v45, %s8891_s29 }
 0x2fc   : > { %v2270_v55 = vsel %vm777_vm0, %v2238_v44, %v7131_v42  ;;  %v1263_v44 = vld [vmem:[#allocation2 + $0x108] sm:$0xff] }
 0x2fe   : > { %7403 = vrot.lane.b32.xlu1 %v7402_v50, %s8888_s0 }
 0x2ff   : > { %7428 = vrot.lane.b32.xlu0 %v7407_v45, %s8885_s2 }
 0x300   : > { %v9691_v57 = vpop.permute.xlu1 %7133 }
 0x301   : > { %v9693_v59 = vpop.permute.xlu0 %7138  ;;  %v7136_v19 = vunpack.i.h.bf16 %v9691_v57  ;;  %v7135_v20 = vunpack.i.l.bf16 %v9691_v57 }
 0x302   : > { %7413 = vrot.lane.b32.xlu1 %v7402_v50, %s8890_s18  ;;  %v1266_v50 = vld [vmem:[#allocation2 + $0x128] sm:$0xff]  ;;  %v7141_v29 = vunpack.i.h.bf16 %v9693_v59  ;;  %v7140_v30 = vunpack.i.l.bf16 %v9693_v59 }
 0x303   : > { %7438 = vrot.lane.b32.xlu0 %v7437_v61, %s8888_s0 }
 0x304   : > { %v9697_v1 = vpop.permute.xlu1 %7143 }
 0x305   : > { %v9699_v6 = vpop.permute.xlu0 %7148 }
 0x306   : > { %7423 = vrot.lane.b32.xlu1 %v7422_v5, %s8892_s26 }
 0x307   : > { %7448 = vrot.lane.b32.xlu0 %v7437_v61, %s8890_s18 }
 0x308   : > { %v9703_v12 = vpop.permute.xlu1 %7153 }
 0x309   : > { %v9705_v58 = vpop.permute.xlu0 %7158 }
 0x30a   : > { %7433 = vrot.lane.b32.xlu1 %v7422_v5, %s8886_s19  ;;  %v7472_v5 = vpack.i.bf16 %v1266_v50, %v1265_v46  ;;  %v2469_v46 = vpack.c.bf16 %v9622_v18, %v9620_v16 }
 0x30b   : > { %7458 = vrot.lane.b32.xlu0 %v7457_v13, %s8892_s26 }
 0x30c   : > { %v9709_v22 = vpop.permute.xlu1 %7163 }
 0x30d   : > { %v7179_v31 = vpop.permute.xlu0 %7178 }
 0x30e   : > { %7443 = vrot.lane.b32.xlu1 %v7442_v23, %s8889_s28  ;;  %v7181_v7 = vunpack.i.h.bf16 %v7179_v31  ;;  %v7180_v8 = vunpack.i.l.bf16 %v7179_v31 }
 0x30f   : > { %7468 = vrot.lane.b32.xlu0 %v7457_v13, %s8886_s19 }
 0x310   : > { %v7169_v43 = vpop.permute.xlu1 %7168 }
 0x311   : > { %v9715_v45 = vpop.permute.xlu0 %7188  ;;  %v7171_v47 = vunpack.i.h.bf16 %v7169_v43  ;;  %v7170_v48 = vunpack.i.l.bf16 %v7169_v43 }
 0x312   : > { %7453 = vrot.lane.b32.xlu1 %v7442_v23, %s8891_s29 }
 0x313   : > { %7478 = vrot.lane.b32.xlu0 %v7477_v35, %s8889_s28  ;;  %v2302_v13 = vsel %vm2301_vm4, %v2269_v54, %v7170_v48  ;;  %v2303_v14 = vsel %vm2301_vm4, %v2270_v55, %v7171_v47  ;;  %v1264_v47 = vld [vmem:[#allocation2 + $0x110] sm:$0xff] }
 0x314   : > { %v7174_v49 = vpop.permute.xlu1 %7173 }
 0x315   : > { %v7176_v61 = vunpack.i.h.bf16 %v7174_v49  ;;  %v7175_v62 = vunpack.i.l.bf16 %v7174_v49  ;;  %v9721_v63 = vpop.permute.xlu0 %7198  ;;  %v7507_v49 = vpack.i.bf16 %v1264_v47, %v1263_v44  ;;  %v1302_v44 = vld [vmem:[#allocation2 + $0x159] sm:$0xff] }
 0x316   : > { %7463 = vrot.lane.b32.xlu1 %v7442_v23, %s8885_s2 }
 0x317   : > { %v2335_v25 = vsel %vm2334_vm5, %v2302_v13, %v7175_v62  ;;  %v2336_v27 = vsel %vm2334_vm5, %v2303_v14, %v7176_v61  ;;  %7488 = vrot.lane.b32.xlu0 %v7477_v35, %s8891_s29  ;;  %v1234_v61 = vld [vmem:[#allocation2 + $0x122] sm:$0xff]  ;;  %v1235_v62 = vld [vmem:[#allocation2 + $0x12a] sm:$0xff]  ;;  %v7191_v13 = vunpack.i.h.bf16 %v9715_v45  ;;  %v7190_v14 = vunpack.i.l.bf16 %v9715_v45 }
 0x318   : > { %v2368_v31 = vsel %vm2367_vm6, %v2335_v25, %v7180_v8  ;;  %v2369_v32 = vsel %vm2367_vm6, %v2336_v27, %v7181_v7  ;;  %v7184_v33 = vpop.permute.xlu1 %7183  ;;  %v7492_v7 = vpack.i.bf16 %v1235_v62, %v1234_v61  ;;  %v7145_v27 = vunpack.i.l.bf16 %v9697_v1 }
 0x319   : > { %v2401_v23 = vsel %vm2400_vm7, %v2368_v31, %v7135_v20  ;;  %v2402_v41 = vsel %vm2400_vm7, %v2369_v32, %v7136_v19  ;;  %v9737_v57 = vpop.permute.xlu0 %7208  ;;  %v7186_v50 = vunpack.i.h.bf16 %v7184_v33  ;;  %v7185_v54 = vunpack.i.l.bf16 %v7184_v33  ;;  %v9763_v19 = vld [vmem:[#allocation2 + $0x112] sm:$0xff] }
 0x31a   : > { %7473 = vrot.lane.b32.xlu1 %v7472_v5, %s8888_s0  ;;  %v2434_v42 = vsel %vm2433_vm8, %v2401_v23, %v7140_v30  ;;  %v2435_v43 = vsel %vm2433_vm8, %v2402_v41, %v7141_v29  ;;  %v1295_v30 = vld [vmem:[#allocation2 + $0x109] sm:$0xff]  ;;  %v1296_v31 = vld [vmem:[#allocation2 + $0x111] sm:$0xff]  ;;  %v7151_v23 = vunpack.i.h.bf16 %v9699_v6  ;;  %v7150_v41 = vunpack.i.l.bf16 %v9699_v6 }
 0x31b   : > { %7498 = vrot.lane.b32.xlu0 %v7477_v35, %s8885_s2  ;;  %v2466_v59 = vpack.c.bf16 %v2435_v43, %v2434_v42  ;;  %v2240_v16 = vsel %vm660_vm1, %v9558_v4, %v7186_v50  ;;  %v2239_v18 = vsel %vm660_vm1, %v9564_v9, %v7185_v54  ;;  %v7146_v9 = vunpack.i.h.bf16 %v9697_v1  ;;  %v1301_v43 = vld [vmem:[#allocation2 + $0x151] sm:$0xff] }
 0x31c   : > { %v9743_v48 = vpop.permute.xlu1 %7193  ;;  %v2271_v20 = vsel %vm777_vm0, %v2239_v18, %v7190_v14  ;;  %v2272_v4 = vsel %vm777_vm0, %v2240_v16, %v7191_v13  ;;  %v7512_v1 = vpack.i.bf16 %v1296_v31, %v1295_v30  ;;  %v7155_v61 = vunpack.i.l.bf16 %v9703_v12  ;;  %v1313_v13 = vld [vmem:[#allocation2 + $0x62] sm:$0xff]  ;;  %v1314_v14 = vld [vmem:[#allocation2 + $0x6a] sm:$0xff]  ;;  %v1270_v30 = vld [vmem:[#allocation2 + $0x158] sm:$0xff] }
 0x31d   : > { %v9747_v55 = vpop.permute.xlu0 %7218  ;;  %2658 = vmatmul.mubr.bf16.vlgmr.msra.gmra.mrb[32].mxu1 %v2466_v59  ;;  %v2304_v32 = vsel %vm2301_vm4, %v2271_v20, %v7145_v27  ;;  %v2305_v33 = vsel %vm2301_vm4, %v2272_v4, %v7146_v9  ;;  %v7547_v6 = vpack.i.bf16 %v1302_v44, %v1301_v43  ;;  %v7161_v62 = vunpack.i.h.bf16 %v9705_v58 }
 0x31e   : > { %7483 = vrot.lane.b32.xlu1 %v7472_v5, %s8890_s18  ;;  %6422 = vmatprep.mubr.msk.bf16.mxu1 %vm660_vm1, %v2469_v46  ;;  %v9761_v5 = vld [vmem:[#allocation2 + $0x10a] sm:$0xff]  ;;  %v2337_v50 = vsel %vm2334_vm5, %v2304_v32, %v7150_v41  ;;  %v2338_v54 = vsel %vm2334_vm5, %v2305_v33, %v7151_v23  ;;  %v7166_v16 = vunpack.i.h.bf16 %v9709_v22  ;;  %v7165_v18 = vunpack.i.l.bf16 %v9709_v22 }
 0x31f   : > { %7508 = vrot.lane.b32.xlu0 %v7507_v49, %s8888_s0  ;;  %v7527_v45 = vpack.i.bf16 %v9763_v19, %v9761_v5  ;;  %v2471_v41 = vpack.c.bf16 %v1314_v14, %v1313_v13  ;;  %v2242_v43 = vsel %vm660_vm1, %v9521_v28, %v7161_v62  ;;  %v7195_v62 = vunpack.i.l.bf16 %v9743_v48 }
 0x320   : > { %v9752_v35 = vpop.permute.xlu1 %7203 }
 0x321   : > { %v7229_v8 = vpop.permute.xlu0 %7228 }
 0x322   : > { %7493 = vrot.lane.b32.xlu1 %v7492_v7, %s8892_s26  ;;  %v7231_v59 = vunpack.i.h.bf16 %v7229_v8  ;;  %v7230_v46 = vunpack.i.l.bf16 %v7229_v8 }
 0x323   : > { %7518 = vrot.lane.b32.xlu0 %v7507_v49, %s8890_s18  ;;  %v7156_v49 = vunpack.i.h.bf16 %v9703_v12  ;;  %v2370_v12 = vsel %vm2367_vm6, %v2337_v50, %v7155_v61 }
 0x324   : > { %v9768_v25 = vpop.permute.xlu1 %7213 }
 0x325   : > { %v7239_v29 = vpop.permute.xlu0 %7238  ;;  %v2371_v27 = vsel %vm2367_vm6, %v2338_v54, %v7156_v49 }
 0x326   : > { %7503 = vrot.lane.b32.xlu1 %v7492_v7, %s8886_s19  ;;  %v7160_v7 = vunpack.i.l.bf16 %v9705_v58  ;;  %v7241_v31 = vunpack.i.h.bf16 %v7239_v29  ;;  %v7240_v32 = vunpack.i.l.bf16 %v7239_v29  ;;  %v2403_v58 = vsel %vm2400_vm7, %v2370_v12, %v7230_v46 }
 0x327   : > { %7528 = vrot.lane.b32.xlu0 %v7527_v45, %s8892_s26  ;;  %v2404_v22 = vsel %vm2400_vm7, %v2371_v27, %v7231_v59  ;;  %v2274_v59 = vsel %vm777_vm0, %v2242_v43, %v7166_v16 }
 0x328   : > { %v9780_v42 = vpop.permute.xlu1 %7223  ;;  %v2241_v44 = vsel %vm660_vm1, %v9518_v24, %v7160_v7  ;;  %v2307_v13 = vsel %vm2301_vm4, %v2274_v59, %v7241_v31  ;;  %v7196_v24 = vunpack.i.h.bf16 %v9743_v48  ;;  %v9830_v31 = vld [vmem:[#allocation2 + $0x140] sm:$0xff] }
 0x329   : > { %v7249_v47 = vpop.permute.xlu0 %7248  ;;  %v2273_v46 = vsel %vm777_vm0, %v2241_v44, %v7165_v18  ;;  %v7201_v18 = vunpack.i.h.bf16 %v9721_v63  ;;  %v2473_v44 = vpack.c.bf16 %v9662_v3, %v9660_v2 }
 0x32a   : > { %7513 = vrot.lane.b32.xlu1 %v7512_v1, %s8889_s28  ;;  %v7251_v14 = vunpack.i.h.bf16 %v7249_v47  ;;  %v7250_v28 = vunpack.i.l.bf16 %v7249_v47 }
 0x32b   : > { %7538 = vrot.lane.b32.xlu0 %v7527_v45, %s8886_s19  ;;  %v1269_v45 = vld [vmem:[#allocation2 + $0x150] sm:$0xff] }
 0x32c   : > { %v7234_v8 = vpop.permute.xlu1 %7233  ;;  %v7542_v54 = vpack.i.bf16 %v1270_v30, %v1269_v45  ;;  %v9828_v30 = vld [vmem:[#allocation2 + $0x138] sm:$0xff] }
 0x32d   : > { %v7236_v20 = vunpack.i.h.bf16 %v7234_v8  ;;  %v7235_v4 = vunpack.i.l.bf16 %v7234_v8  ;;  %v9792_v9 = vpop.permute.xlu0 %7258  ;;  %v7577_v43 = vpack.i.bf16 %v9830_v31, %v9828_v30 }
 0x32e   : > { %7523 = vrot.lane.b32.xlu1 %v7512_v1, %s8891_s29 }
 0x32f   : > { %7548 = vrot.lane.b32.xlu0 %v7547_v6, %s8889_s28  ;;  %v2436_v33 = vsel %vm2433_vm8, %v2403_v58, %v7235_v4  ;;  %v2437_v23 = vsel %vm2433_vm8, %v2404_v22, %v7236_v20  ;;  %v2306_v20 = vsel %vm2301_vm4, %v2273_v46, %v7240_v32  ;;  %v7200_v4 = vunpack.i.l.bf16 %v9721_v63  ;;  %v1059_v46 = vld [vmem:[#allocation2 + $0x50] sm:$0xff] }
 0x330   : > { %v7244_v29 = vpop.permute.xlu1 %7243  ;;  %v2468_v50 = vpack.c.bf16 %v2437_v23, %v2436_v33 }
 0x331   : > { %v7246_v49 = vunpack.i.h.bf16 %v7244_v29  ;;  %v7245_v61 = vunpack.i.l.bf16 %v7244_v29  ;;  %v9808_v8 = vpop.permute.xlu0 %7268  ;;  %v9843_v29 = vld [vmem:[#allocation2 + $0x152] sm:$0xff] }
 0x332   : > { %7533 = vrot.lane.b32.xlu1 %v7512_v1, %s8885_s2  ;;  %2666 = vmatmul.mubr.bf16.gmra.mrb[36].mxu1 %v2468_v50  ;;  %v9845_v50 = vld [vmem:[#allocation2 + $0x15a] sm:$0xff] }
 0x333   : > { %v2339_v7 = vsel %vm2334_vm5, %v2306_v20, %v7245_v61  ;;  %v2340_v16 = vsel %vm2334_vm5, %v2307_v13, %v7246_v49  ;;  %7558 = vrot.lane.b32.xlu0 %v7547_v6, %s8891_s29  ;;  %6423 = vmatprep.mubr.msk.bf16.mxu1 %vm660_vm1, %v2471_v41  ;;  %v7562_v49 = vpack.i.bf16 %v9845_v50, %v9843_v29  ;;  %v7261_v20 = vunpack.i.h.bf16 %v9792_v9  ;;  %v9859_v13 = vld [vmem:[#allocation2 + $0x13a] sm:$0xff] }
 0x334   : > { %v7254_v47 = vpop.permute.xlu1 %7253  ;;  %v2372_v1 = vsel %vm2367_vm6, %v2339_v7, %v7250_v28  ;;  %v2373_v12 = vsel %vm2367_vm6, %v2340_v16, %v7251_v14  ;;  %v9861_v14 = vld [vmem:[#allocation2 + $0x142] sm:$0xff]  ;;  %v7206_v7 = vunpack.i.h.bf16 %v9752_v35  ;;  %v7205_v16 = vunpack.i.l.bf16 %v9752_v35 }
 0x335   : > { %v9823_v27 = vpop.permute.xlu0 %7278  ;;  %v2405_v48 = vsel %vm2400_vm7, %v2372_v1, %v7195_v62  ;;  %v2406_v45 = vsel %vm2400_vm7, %v2373_v12, %v7196_v24  ;;  %v7256_v33 = vunpack.i.h.bf16 %v7254_v47  ;;  %v7255_v23 = vunpack.i.l.bf16 %v7254_v47  ;;  %v1300_v47 = vld [vmem:[#allocation2 + $0x141] sm:$0xff] }
 0x336   : > { %7543 = vrot.lane.b32.xlu1 %v7542_v54, %s8888_s0  ;;  %v2438_v32 = vsel %vm2433_vm8, %v2405_v48, %v7200_v4  ;;  %v2439_v63 = vsel %vm2433_vm8, %v2406_v45, %v7201_v18  ;;  %v1299_v4 = vld [vmem:[#allocation2 + $0x139] sm:$0xff]  ;;  %v7211_v48 = vunpack.i.h.bf16 %v9737_v57  ;;  %v7210_v45 = vunpack.i.l.bf16 %v9737_v57 }
 0x337   : > { %7568 = vrot.lane.b32.xlu0 %v7547_v6, %s8885_s2  ;;  %v2470_v58 = vpack.c.bf16 %v2439_v63, %v2438_v32  ;;  %v1058_v6 = vld [vmem:[#allocation2 + $0x48] sm:$0xff]  ;;  %v2244_v2 = vsel %vm660_vm1, %v1059_v46, %v7256_v33  ;;  %v7582_v32 = vpack.i.bf16 %v1300_v47, %v1299_v4  ;;  %v7216_v46 = vunpack.i.h.bf16 %v9768_v25 }
 0x338   : > { %v9835_v22 = vpop.permute.xlu1 %7263  ;;  %v2243_v3 = vsel %vm660_vm1, %v1058_v6, %v7255_v23  ;;  %v2276_v24 = vsel %vm777_vm0, %v2244_v2, %v7261_v20  ;;  %v1305_v63 = vld [vmem:[#allocation2 + $0x181] sm:$0xff]  ;;  %v1317_v2 = vld [vmem:[#allocation2 + $0x92] sm:$0xff]  ;;  %v7220_v20 = vunpack.i.l.bf16 %v9747_v55 }
 0x339   : > { %v9837_v41 = vpop.permute.xlu0 %7288  ;;  %v2309_v12 = vsel %vm2301_vm4, %v2276_v24, %v7206_v7  ;;  %v1271_v24 = vld [vmem:[#allocation2 + $0x168] sm:$0xff]  ;;  %v9896_v7 = vld [vmem:[#allocation2 + $0x170] sm:$0xff] }
 0x33a   : > { %7553 = vrot.lane.b32.xlu1 %v7542_v54, %s8890_s18  ;;  %2674 = vmatmul.mubr.bf16.gmra.mrb[40].mxu1 %v2470_v58  ;;  %v7260_v54 = vunpack.i.l.bf16 %v9792_v9  ;;  %v7597_v9 = vpack.i.bf16 %v9861_v14, %v9859_v13  ;;  %v1306_v58 = vld [vmem:[#allocation2 + $0x189] sm:$0xff]  ;;  %v2342_v6 = vsel %vm2334_vm5, %v2309_v12, %v7211_v48  ;;  %v1273_v12 = vld [vmem:[#allocation2 + $0x180] sm:$0xff] }
 0x33b   : > { %7578 = vrot.lane.b32.xlu0 %v7577_v43, %s8888_s0  ;;  %6424 = vmatprep.mubr.msk.bf16.mxu1 %vm660_vm1, %v2473_v44  ;;  %v9890_v57 = vpack.i.bf16 %v1306_v58, %v1305_v63  ;;  %v1274_v48 = vld [vmem:[#allocation2 + $0x188] sm:$0xff]  ;;  %v7627_v58 = vpack.i.bf16 %v9896_v7, %v1271_v24 }
 0x33c   : > { %v9850_v59 = vpop.permute.xlu1 %7273  ;;  %v2275_v28 = vsel %vm777_vm0, %v2243_v3, %v7260_v54  ;;  %v7221_v3 = vunpack.i.h.bf16 %v9747_v55  ;;  %v7225_v54 = vunpack.i.l.bf16 %v9780_v42 }
 0x33d   : > { %v7299_v61 = vpop.permute.xlu0 %7298  ;;  %v2308_v1 = vsel %vm2301_vm4, %v2275_v28, %v7205_v16  ;;  %v1318_v16 = vld [vmem:[#allocation2 + $0x9a] sm:$0xff] }
 0x33e   : > { %7563 = vrot.lane.b32.xlu1 %v7562_v49, %s8892_s26  ;;  %v7301_v23 = vunpack.i.h.bf16 %v7299_v61  ;;  %v2341_v44 = vsel %vm2334_vm5, %v2308_v1, %v7210_v45  ;;  %v2375_v1 = vsel %vm2367_vm6, %v2342_v6, %v7216_v46  ;;  %v2475_v46 = vpack.c.bf16 %v1318_v16, %v1317_v2 }
 0x33f   : > { %7588 = vrot.lane.b32.xlu0 %v7577_v43, %s8890_s18  ;;  %v7300_v43 = vunpack.i.l.bf16 %v7299_v61  ;;  %v7226_v61 = vunpack.i.h.bf16 %v9780_v42  ;;  %v7271_v16 = vunpack.i.h.bf16 %v9808_v8 }
 0x340   : > { %v9866_v62 = vpop.permute.xlu1 %7283  ;;  %v2408_v63 = vsel %vm2400_vm7, %v2375_v1, %v7301_v23 }
 0x341   : > { %v9870_v18 = vpop.permute.xlu0 %7308 }
 0x342   : > { %7573 = vrot.lane.b32.xlu1 %v7562_v49, %s8886_s19  ;;  %v7215_v49 = vunpack.i.l.bf16 %v9768_v25  ;;  %v7311_v55 = vunpack.i.h.bf16 %v9870_v18  ;;  %v7310_v45 = vunpack.i.l.bf16 %v9870_v18  ;;  %v2245_v18 = vsel %vm660_vm1, %v9588_v38, %v7220_v20 }
 0x343   : > { %7598 = vrot.lane.b32.xlu0 %v7597_v9, %s8892_s26  ;;  %v2277_v23 = vsel %vm777_vm0, %v2245_v18, %v7225_v54  ;;  %v7266_v38 = vunpack.i.h.bf16 %v9835_v22  ;;  %v7265_v20 = vunpack.i.l.bf16 %v9835_v22 }
 0x344   : > { %v9880_v35 = vpop.permute.xlu1 %7293 }
 0x345   : > { %v9882_v33 = vpop.permute.xlu0 %7318 }
 0x346   : > { %7583 = vrot.lane.b32.xlu1 %v7582_v32, %s8889_s28 }
 0x347   : > { %7608 = vrot.lane.b32.xlu0 %v7597_v9, %s8886_s19  ;;  %v2374_v9 = vsel %vm2367_vm6, %v2341_v44, %v7215_v49  ;;  %v2246_v49 = vsel %vm660_vm1, %v9590_v39, %v7221_v3  ;;  %v7321_v39 = vunpack.i.h.bf16 %v9882_v33  ;;  %v7320_v3 = vunpack.i.l.bf16 %v9882_v33 }
 0x348   : > { %v7304_v28 = vpop.permute.xlu1 %7303  ;;  %v2407_v42 = vsel %vm2400_vm7, %v2374_v9, %v7300_v43  ;;  %v7612_v9 = vpack.i.bf16 %v1274_v48, %v1273_v12  ;;  %v2278_v1 = vsel %vm777_vm0, %v2246_v49, %v7226_v61 }
 0x349   : > { %v7306_v4 = vunpack.i.h.bf16 %v7304_v28  ;;  %v7305_v25 = vunpack.i.l.bf16 %v7304_v28  ;;  %v9898_v47 = vpop.permute.xlu0 %7328  ;;  %v2311_v2 = vsel %vm2301_vm4, %v2278_v1, %v7311_v55  ;;  %v1303_v1 = vld [vmem:[#allocation2 + $0x169] sm:$0xff] }
 0x34a   : > { %7593 = vrot.lane.b32.xlu1 %v7582_v32, %s8891_s29 }
 0x34b   : > { %7618 = vrot.lane.b32.xlu0 %v9890_v57, %s8889_s28  ;;  %v2440_v44 = vsel %vm2433_vm8, %v2407_v42, %v7305_v25  ;;  %v2441_v6 = vsel %vm2433_vm8, %v2408_v63, %v7306_v4  ;;  %v2310_v4 = vsel %vm2301_vm4, %v2277_v23, %v7310_v45  ;;  %v7270_v25 = vunpack.i.l.bf16 %v9808_v8  ;;  %v9940_v45 = vld [vmem:[#allocation2 + $0x16a] sm:$0xff]  ;;  %v9942_v42 = vld [vmem:[#allocation2 + $0x172] sm:$0xff] }
 0x34c   : > { %v7314_v28 = vpop.permute.xlu1 %7313  ;;  %v2472_v43 = vpack.c.bf16 %v2441_v6, %v2440_v44  ;;  %v1320_v44 = vld [vmem:[#allocation2 + $0xb2] sm:$0xff] }
 0x34d   : > { %v7316_v51 = vunpack.i.h.bf16 %v7314_v28  ;;  %v7315_v24 = vunpack.i.l.bf16 %v7314_v28  ;;  %v9918_v56 = vpop.permute.xlu0 %7338 }
 0x34e   : > { %7603 = vrot.lane.b32.xlu1 %v7582_v32, %s8885_s2  ;;  %2682 = vmatmul.mubr.bf16.gmra.mrb[44].mxu1 %v2472_v43  ;;  %v7647_v43 = vpack.i.bf16 %v9942_v42, %v9940_v45 }
 0x34f   : > { %v2343_v61 = vsel %vm2334_vm5, %v2310_v4, %v7315_v24  ;;  %v2344_v54 = vsel %vm2334_vm5, %v2311_v2, %v7316_v51  ;;  %7628 = vrot.lane.b32.xlu0 %v7627_v58, %s8888_s0  ;;  %6425 = vmatprep.mubr.msk.bf16.mxu1 %vm660_vm1, %v2475_v46  ;;  %v1319_v51 = vld [vmem:[#allocation2 + $0xaa] sm:$0xff]  ;;  %v1063_v4 = vld [vmem:[#allocation2 + $0x80] sm:$0xff] }
 0x350   : > { %v7324_v33 = vpop.permute.xlu1 %7323  ;;  %v2376_v32 = vsel %vm2367_vm6, %v2343_v61, %v7320_v3  ;;  %v2377_v12 = vsel %vm2367_vm6, %v2344_v54, %v7321_v39  ;;  %v2477_v23 = vpack.c.bf16 %v1320_v44, %v1319_v51  ;;  %v1304_v24 = vld [vmem:[#allocation2 + $0x171] sm:$0xff]  ;;  %v7331_v61 = vunpack.i.h.bf16 %v9898_v47 }
 0x351   : > { %v9935_v48 = vpop.permute.xlu0 %7348  ;;  %v2409_v22 = vsel %vm2400_vm7, %v2376_v32, %v7265_v20  ;;  %v2410_v55 = vsel %vm2400_vm7, %v2377_v12, %v7266_v38  ;;  %v7326_v49 = vunpack.i.h.bf16 %v7324_v33  ;;  %v7325_v18 = vunpack.i.l.bf16 %v7324_v33  ;;  %v1275_v33 = vld [vmem:[#allocation2 + $0x198] sm:$0xff]  ;;  %v1276_v32 = vld [vmem:[#allocation2 + $0x1a0] sm:$0xff]  ;;  %v9976_v51 = vld [vmem:[#allocation2 + $0x18a] sm:$0xff] }
 0x352   : > { %7613 = vrot.lane.b32.xlu1 %v7612_v9, %s8888_s0  ;;  %v2442_v8 = vsel %vm2433_vm8, %v2409_v22, %v7270_v25  ;;  %v2443_v63 = vsel %vm2433_vm8, %v2410_v55, %v7271_v16  ;;  %v7632_v39 = vpack.i.bf16 %v1304_v24, %v1303_v1  ;;  %v7330_v54 = vunpack.i.l.bf16 %v9898_v47  ;;  %v9974_v47 = vld [vmem:[#allocation2 + $0x182] sm:$0xff] }
 0x353   : > { %7638 = vrot.lane.b32.xlu0 %v7627_v58, %s8890_s18  ;;  %v2474_v6 = vpack.c.bf16 %v2443_v63, %v2442_v8  ;;  %v1062_v58 = vld [vmem:[#allocation2 + $0x78] sm:$0xff]  ;;  %v2248_v3 = vsel %vm660_vm1, %v1063_v4, %v7326_v49  ;;  %v7276_v12 = vunpack.i.h.bf16 %v9850_v59  ;;  %v7275_v22 = vunpack.i.l.bf16 %v9850_v59 }
 0x354   : > { %v9947_v46 = vpop.permute.xlu1 %7333  ;;  %v2247_v38 = vsel %vm660_vm1, %v1062_v58, %v7325_v18  ;;  %v2280_v16 = vsel %vm777_vm0, %v2248_v3, %v7331_v61  ;;  %v9981_v63 = vpack.i.bf16 %v1276_v32, %v1275_v33  ;;  %v7281_v44 = vunpack.i.h.bf16 %v9823_v27  ;;  %v1307_v49 = vld [vmem:[#allocation2 + $0x199] sm:$0xff]  ;;  %v1308_v18 = vld [vmem:[#allocation2 + $0x1a1] sm:$0xff] }
 0x355   : > { %v9949_v28 = vpop.permute.xlu0 %7358  ;;  %v2313_v8 = vsel %vm2301_vm4, %v2280_v16, %v7276_v12  ;;  %v7280_v59 = vunpack.i.l.bf16 %v9823_v27  ;;  %v7662_v1 = vpack.i.bf16 %v9976_v51, %v9974_v47  ;;  %v3011_v3 = vld [vmem:[#allocation2 + $0x1] sm:$0xff]  ;;  %v7286_v27 = vunpack.i.h.bf16 %v9866_v62 }
 0x356   : > { %7623 = vrot.lane.b32.xlu1 %v7612_v9, %s8890_s18  ;;  %2690 = vmatmul.mubr.bf16.gmra.mrb[48].mxu1 %v2474_v6  ;;  %v2279_v9 = vsel %vm777_vm0, %v2247_v38, %v7330_v54  ;;  %v2346_v4 = vsel %vm2334_vm5, %v2313_v8, %v7281_v44  ;;  %v3012_v38 = vld [vmem:[#allocation2 + $0x9] sm:$0xff]  ;;  %v7285_v61 = vunpack.i.l.bf16 %v9866_v62  ;;  %v9998_v54 = vpack.i.bf16 %v1308_v18, %v1307_v49 }
 0x357   : > { %7648 = vrot.lane.b32.xlu0 %v7647_v43, %s8892_s26  ;;  %6426 = vmatprep.mubr.msk.bf16.mxu1 %vm660_vm1, %v2477_v23  ;;  %v7296_v16 = vunpack.i.h.bf16 %v9880_v35  ;;  %v7295_v33 = vunpack.i.l.bf16 %v9880_v35  ;;  %v2379_v8 = vsel %vm2367_vm6, %v2346_v4, %v7286_v27  ;;  %v1321_v44 = vld [vmem:[#allocation2 + $0xc2] sm:$0xff] }
 0x358   : > { %v9956_v2 = vpop.permute.xlu1 %7343 }
 0x359   : > { %v7369_v20 = vpop.permute.xlu0 %7368 }
 0x35a   : > { %7633 = vrot.lane.b32.xlu1 %v7632_v39, %s8889_s28  ;;  %v7371_v24 = vunpack.i.h.bf16 %v7369_v20  ;;  %v7370_v58 = vunpack.i.l.bf16 %v7369_v20  ;;  %v7291_v20 = vunpack.i.h.bf16 %v9837_v41 }
 0x35b   : > { %7653 = vrot.lane.b32.xlu0 %v9890_v57, %s8891_s29  ;;  %v2312_v57 = vsel %vm2301_vm4, %v2279_v9, %v7275_v22  ;;  %v7682_v9 = vpack.i.bf16 %v3012_v38, %v3011_v3  ;;  %v1064_v3 = vld [vmem:[#allocation2 + $0x90] sm:$0xff]  ;;  %v1065_v38 = vld [vmem:[#allocation2 + $0x98] sm:$0xff] }
 0x35c   : > { %v9967_v25 = vpop.permute.xlu1 %7353  ;;  %v2412_v35 = vsel %vm2400_vm7, %v2379_v8, %v7371_v24  ;;  %v2250_v4 = vsel %vm660_vm1, %v1065_v38, %v7291_v20 }
 0x35d   : > { %v9971_v55 = vpop.permute.xlu0 %7378  ;;  %v2282_v24 = vsel %vm777_vm0, %v2250_v4, %v7296_v16  ;;  %v7335_v16 = vunpack.i.l.bf16 %v9947_v46  ;;  %v1324_v4 = vld [vmem:[#allocation2 + $0xe2] sm:$0xff] }
 0x35e   : > { %7643 = vrot.lane.b32.xlu1 %v7632_v39, %s8891_s29  ;;  %v7381_v49 = vunpack.i.h.bf16 %v9971_v55  ;;  %v7380_v18 = vunpack.i.l.bf16 %v9971_v55 }
 0x35f   : > { %7668 = vrot.lane.b32.xlu0 %v7647_v43, %s8886_s19  ;;  %v2345_v43 = vsel %vm2334_vm5, %v2312_v57, %v7280_v59  ;;  %v1322_v59 = vld [vmem:[#allocation2 + $0xca] sm:$0xff] }
 0x360   : > { %v9985_v6 = vpop.permute.xlu1 %7363  ;;  %v2378_v62 = vsel %vm2367_vm6, %v2345_v43, %v7285_v61 }
 0x361   : > { %v9987_v23 = vpop.permute.xlu0 %7388 }
 0x362   : > { %7658 = vrot.lane.b32.xlu1 %v7632_v39, %s8885_s2  ;;  %v7290_v39 = vunpack.i.l.bf16 %v9837_v41  ;;  %v2411_v41 = vsel %vm2400_vm7, %v2378_v62, %v7370_v58  ;;  %v7390_v20 = vunpack.i.l.bf16 %v9987_v23 }
 0x363   : > { %7673 = vrot.lane.b32.xlu0 %v9981_v63, %s8888_s0  ;;  %s8895_s0 = smov 120  }
 0x364   : > { %v7374_v32 = vpop.permute.xlu1 %7373  ;;  %v2249_v27 = vsel %vm660_vm1, %v1064_v3, %v7290_v39  ;;  %v7336_v39 = vunpack.i.h.bf16 %v9947_v46 }
 0x365   : > { %v7376_v12 = vunpack.i.h.bf16 %v7374_v32  ;;  %v7375_v22 = vunpack.i.l.bf16 %v7374_v32  ;;  %v10004_v57 = vpop.permute.xlu0 %7398  ;;  %v2281_v58 = vsel %vm777_vm0, %v2249_v27, %v7295_v33  ;;  %v3043_v27 = vld [vmem:[#allocation2 + $0x2] sm:$0xff] }
 0x366   : > { %7663 = vrot.lane.b32.xlu1 %v7662_v1, %s8892_s26  ;;  %v2479_v1 = vpack.c.bf16 %v1322_v59, %v1321_v44  ;;  %v7341_v59 = vunpack.i.h.bf16 %v9918_v56  ;;  %s8896_s26 = smov 24  }
 0x367   : > { %v2444_v32 = vsel %vm2433_vm8, %v2411_v41, %v7375_v22  ;;  %v2445_v43 = vsel %vm2433_vm8, %v2412_v35, %v7376_v12  ;;  %7683 = vrot.lane.b32.xlu0 %v7682_v9, %s8893_s21  ;;  %v2314_v12 = vsel %vm2301_vm4, %v2281_v58, %v7380_v18  ;;  %v2315_v22 = vsel %vm2301_vm4, %v2282_v24, %v7381_v49 }
 0x368   : > { %v7384_v55 = vpop.permute.xlu1 %7383  ;;  %v2476_v61 = vpack.c.bf16 %v2445_v43, %v2444_v32  ;;  %v7391_v9 = vunpack.i.h.bf16 %v9987_v23  ;;  %v7340_v49 = vunpack.i.l.bf16 %v9918_v56  ;;  %v1323_v43 = vld [vmem:[#allocation2 + $0xda] sm:$0xff] }
 0x369   : > { %v7386_v62 = vunpack.i.h.bf16 %v7384_v55  ;;  %v7385_v8 = vunpack.i.l.bf16 %v7384_v55  ;;  %v10020_v21 = vpop.permute.xlu0 %7408  ;;  %v3044_v55 = vld [vmem:[#allocation2 + $0xa] sm:$0xff] }
 0x36a   : > { %7678 = vrot.lane.b32.xlu1 %v9998_v54, %s8889_s28  ;;  %2698 = vmatmul.mubr.bf16.gmra.mrb[52].mxu1 %v2476_v61 }
 0x36b   : > { %v2347_v33 = vsel %vm2334_vm5, %v2314_v12, %v7385_v8  ;;  %v2348_v44 = vsel %vm2334_vm5, %v2315_v22, %v7386_v62  ;;  %6427 = vmatprep.mubr.msk.bf16.mxu1 %vm660_vm1, %v2479_v1  ;;  %v7687_v1 = vpack.i.bf16 %v3044_v55, %v3043_v27  ;;  %v2481_v8 = vpack.c.bf16 %v1324_v4, %v1323_v43  ;;  %v1066_v12 = vld [vmem:[#allocation2 + $0xa8] sm:$0xff]  ;;  %v1067_v22 = vld [vmem:[#allocation2 + $0xb0] sm:$0xff] }
 0x36c   : > { %v7394_v18 = vpop.permute.xlu1 %7393  ;;  %v2380_v23 = vsel %vm2367_vm6, %v2347_v33, %v7390_v20  ;;  %v2381_v41 = vsel %vm2367_vm6, %v2348_v44, %v7391_v9  ;;  %v7400_v33 = vunpack.i.l.bf16 %v10004_v57  ;;  %v7355_v55 = vunpack.i.l.bf16 %v9967_v25 }
 0x36d   : > { %v10037_v35 = vpop.permute.xlu0 %7418  ;;  %v2413_v3 = vsel %vm2400_vm7, %v2380_v23, %v7335_v16  ;;  %v2414_v46 = vsel %vm2400_vm7, %v2381_v41, %v7336_v39  ;;  %v7396_v58 = vunpack.i.h.bf16 %v7394_v18  ;;  %v7395_v24 = vunpack.i.l.bf16 %v7394_v18  ;;  %7688 = vrot.lane.b32.xlu0 %v7687_v1, %s8885_s2 }
 0x36e   : > { %v2446_v38 = vsel %vm2433_vm8, %v2413_v3, %v7340_v49  ;;  %v2447_v32 = vsel %vm2433_vm8, %v2414_v46, %v7341_v59  ;;  %7693 = vrot.lane.b32.xlu1 %v9981_v63, %s8890_s18  ;;  %v7401_v16 = vunpack.i.h.bf16 %v10004_v57  ;;  %v7346_v18 = vunpack.i.h.bf16 %v9956_v2 }
 0x36f   : > { %v2478_v56 = vpack.c.bf16 %v2447_v32, %v2446_v38  ;;  %v2252_v63 = vsel %vm660_vm1, %v1067_v22, %v7396_v58  ;;  %v2251_v20 = vsel %vm660_vm1, %v1066_v12, %v7395_v24  ;;  %v7345_v23 = vunpack.i.l.bf16 %v9956_v2 }
 0x370   : > { %v10045_v61 = vpop.permute.xlu1 %7403  ;;  %v2283_v44 = vsel %vm777_vm0, %v2251_v20, %v7400_v33  ;;  %v2284_v59 = vsel %vm777_vm0, %v2252_v63, %v7401_v16  ;;  %v7351_v46 = vunpack.i.h.bf16 %v9935_v48  ;;  %v7350_v38 = vunpack.i.l.bf16 %v9935_v48  ;;  %v1325_v16 = vld [vmem:[#allocation2 + $0xf2] sm:$0xff]  ;;  %v1326_v33 = vld [vmem:[#allocation2 + $0xfa] sm:$0xff] }
 0x371   : > { %v10047_v62 = vpop.permute.xlu0 %7428  ;;  %v2316_v41 = vsel %vm2301_vm4, %v2283_v44, %v7345_v23  ;;  %v2317_v3 = vsel %vm2301_vm4, %v2284_v59, %v7346_v18  ;;  %v7356_v2 = vunpack.i.h.bf16 %v9967_v25  ;;  %v7361_v1 = vunpack.i.h.bf16 %v9949_v28  ;;  %v1068_v18 = vld [vmem:[#allocation2 + $0xc0] sm:$0xff]  ;;  %v1069_v23 = vld [vmem:[#allocation2 + $0xc8] sm:$0xff] }
 0x372   : > { %2706 = vmatmul.mubr.bf16.gmra.mrb[56].mxu1 %v2478_v56  ;;  %7698 = vrot.lane.b32.xlu1 %v9998_v54, %s8894_s17  ;;  %v2349_v56 = vsel %vm2334_vm5, %v2316_v41, %v7350_v38  ;;  %v2350_v27 = vsel %vm2334_vm5, %v2317_v3, %v7351_v46  ;;  %v7360_v58 = vunpack.i.l.bf16 %v9949_v28  ;;  %v7366_v24 = vunpack.i.h.bf16 %v9985_v6 }
 0x373   : > { %6428 = vmatprep.mubr.msk.bf16.mxu1 %vm660_vm1, %v2481_v8  ;;  %v7365_v48 = vunpack.i.l.bf16 %v9985_v6  ;;  %v2382_v20 = vsel %vm2367_vm6, %v2349_v56, %v7355_v55  ;;  %v2254_v3 = vsel %vm660_vm1, %v1069_v23, %v7361_v1  ;;  %v7406_v1 = vunpack.i.h.bf16 %v10045_v61 }
 0x374   : > { %v10051_v9 = vpop.permute.xlu1 %7413  ;;  %v2253_v46 = vsel %vm660_vm1, %v1068_v18, %v7360_v58  ;;  %v7405_v58 = vunpack.i.l.bf16 %v10045_v61 }
 0x375   : > { %v7439_v39 = vpop.permute.xlu0 %7438 }
 0x376   : > { %v7441_v43 = vunpack.i.h.bf16 %v7439_v39  ;;  %v7440_v4 = vunpack.i.l.bf16 %v7439_v39  ;;  %v2383_v39 = vsel %vm2367_vm6, %v2350_v27, %v7356_v2  ;;  %v2483_v27 = vpack.c.bf16 %v1326_v33, %v1325_v16 }
 0x377   : > { %v2285_v2 = vsel %vm777_vm0, %v2253_v46, %v7365_v48  ;;  %v7410_v16 = vunpack.i.l.bf16 %v10020_v21  ;;  %v2485_v46 = vpack.c.bf16 %v9763_v19, %v9761_v5  ;;  %v7416_v5 = vunpack.i.h.bf16 %v10051_v9 }
 0x378   : > { %v10061_v49 = vpop.permute.xlu1 %7423  ;;  %v2415_v59 = vsel %vm2400_vm7, %v2382_v20, %v7440_v4  ;;  %v2416_v28 = vsel %vm2400_vm7, %v2383_v39, %v7441_v43  ;;  %v7415_v19 = vunpack.i.l.bf16 %v10051_v9 }
 0x379   : > { %v7449_v54 = vpop.permute.xlu0 %7448  ;;  %v7426_v9 = vunpack.i.h.bf16 %v10061_v49 }
 0x37a   : > { %v7451_v44 = vunpack.i.h.bf16 %v7449_v54  ;;  %v7450_v25 = vunpack.i.l.bf16 %v7449_v54  ;;  %v2286_v54 = vsel %vm777_vm0, %v2254_v3, %v7366_v24  ;;  %v7411_v24 = vunpack.i.h.bf16 %v10020_v21 }
 0x37c   : > { %v10069_v57 = vpop.permute.xlu1 %7433 }
 0x37d   : > { %v7459_v32 = vpop.permute.xlu0 %7458 }
 0x37e   : > { %v7460_v20 = vunpack.i.l.bf16 %v7459_v32 }
 0x380   : > { %v7444_v8 = vpop.permute.xlu1 %7443 }
 0x381   : > { %v7446_v12 = vunpack.i.h.bf16 %v7444_v8  ;;  %v7445_v22 = vunpack.i.l.bf16 %v7444_v8  ;;  %v7469_v63 = vpop.permute.xlu0 %7468  ;;  %v2318_v8 = vsel %vm2301_vm4, %v2285_v2, %v7450_v25 }
 0x383   : > { %v2448_v6 = vsel %vm2433_vm8, %v2415_v59, %v7445_v22  ;;  %v2449_v41 = vsel %vm2433_vm8, %v2416_v28, %v7446_v12  ;;  %v2319_v22 = vsel %vm2301_vm4, %v2286_v54, %v7451_v44  ;;  %v7461_v12 = vunpack.i.h.bf16 %v7459_v32 }
 0x384   : > { %v7454_v38 = vpop.permute.xlu1 %7453  ;;  %v2480_v56 = vpack.c.bf16 %v2449_v41, %v2448_v6 }
 0x385   : > { %v7456_v4 = vunpack.i.h.bf16 %v7454_v38  ;;  %v7455_v55 = vunpack.i.l.bf16 %v7454_v38  ;;  %v10089_v43 = vpop.permute.xlu0 %7478  ;;  %v1070_v38 = vld [vmem:[#allocation2 + $0xd8] sm:$0xff] }
 0x386   : > { %2714 = vmatmul.mubr.bf16.gmra.mrb[60].mxu1 %v2480_v56  ;;  %v1071_v56 = vld [vmem:[#allocation2 + $0xe0] sm:$0xff] }
 0x387   : > { %v2351_v39 = vsel %vm2334_vm5, %v2318_v8, %v7455_v55  ;;  %v2352_v48 = vsel %vm2334_vm5, %v2319_v22, %v7456_v4  ;;  %6429 = vmatprep.mubr.msk.bf16.mxu1 %vm660_vm1, %v2483_v27  ;;  %v7471_v55 = vunpack.i.h.bf16 %v7469_v63  ;;  %v7470_v8 = vunpack.i.l.bf16 %v7469_v63 }
 0x388   : > { %v7464_v33 = vpop.permute.xlu1 %7463  ;;  %v2384_v44 = vsel %vm2367_vm6, %v2351_v39, %v7460_v20  ;;  %v2385_v32 = vsel %vm2367_vm6, %v2352_v48, %v7461_v12  ;;  %v7421_v48 = vunpack.i.h.bf16 %v10037_v35 }
 0x389   : > { %v10102_v25 = vpop.permute.xlu0 %7488  ;;  %v2417_v59 = vsel %vm2400_vm7, %v2384_v44, %v7405_v58  ;;  %v2418_v61 = vsel %vm2400_vm7, %v2385_v32, %v7406_v1  ;;  %v7466_v41 = vunpack.i.h.bf16 %v7464_v33  ;;  %v7465_v21 = vunpack.i.l.bf16 %v7464_v33 }
 0x38a   : > { %v2450_v28 = vsel %vm2433_vm8, %v2417_v59, %v7410_v16  ;;  %v2451_v18 = vsel %vm2433_vm8, %v2418_v61, %v7411_v24  ;;  %v7420_v24 = vunpack.i.l.bf16 %v10037_v35  ;;  %v7425_v61 = vunpack.i.l.bf16 %v10061_v49 }
 0x38b   : > { %v2482_v23 = vpack.c.bf16 %v2451_v18, %v2450_v28  ;;  %v2256_v2 = vsel %vm660_vm1, %v1071_v56, %v7466_v41  ;;  %v2255_v54 = vsel %vm660_vm1, %v1070_v38, %v7465_v21  ;;  %v7431_v28 = vunpack.i.h.bf16 %v10047_v62 }
 0x38c   : > { %v10108_v6 = vpop.permute.xlu1 %7473  ;;  %v2287_v22 = vsel %vm777_vm0, %v2255_v54, %v7470_v8  ;;  %v2288_v12 = vsel %vm777_vm0, %v2256_v2, %v7471_v55  ;;  %v7430_v18 = vunpack.i.l.bf16 %v10047_v62  ;;  %v7435_v35 = vunpack.i.l.bf16 %v10069_v57  ;;  %v1329_v54 = vld [vmem:[#allocation2 + $0x122] sm:$0xff] }
 0x38d   : > { %v10110_v3 = vpop.permute.xlu0 %7498  ;;  %v2320_v58 = vsel %vm2301_vm4, %v2287_v22, %v7415_v19  ;;  %v2321_v39 = vsel %vm2301_vm4, %v2288_v12, %v7416_v5  ;;  %v1072_v22 = vld [vmem:[#allocation2 + $0xf0] sm:$0xff]  ;;  %v1073_v12 = vld [vmem:[#allocation2 + $0xf8] sm:$0xff] }
 0x38e   : > { %2722 = vmatmul.mubr.bf16.gmra.mrb[64].mxu1 %v2482_v23  ;;  %v2353_v32 = vsel %vm2334_vm5, %v2320_v58, %v7420_v24  ;;  %v2354_v59 = vsel %vm2334_vm5, %v2321_v39, %v7421_v48  ;;  %v7436_v23 = vunpack.i.h.bf16 %v10069_v57  ;;  %v2258_v19 = vsel %vm660_vm1, %v1073_v12, %v7431_v28 }
 0x38f   : > { %6430 = vmatprep.mubr.msk.bf16.mxu1 %vm660_vm1, %v2485_v46  ;;  %v2386_v56 = vsel %vm2367_vm6, %v2353_v32, %v7425_v61  ;;  %v2387_v2 = vsel %vm2367_vm6, %v2354_v59, %v7426_v9  ;;  %v2257_v58 = vsel %vm660_vm1, %v1072_v22, %v7430_v18  ;;  %v7476_v28 = vunpack.i.h.bf16 %v10108_v6 }
 0x390   : > { %v10115_v27 = vpop.permute.xlu1 %7483  ;;  %v2289_v32 = vsel %vm777_vm0, %v2257_v58, %v7435_v35  ;;  %v7475_v18 = vunpack.i.l.bf16 %v10108_v6  ;;  %v1075_v58 = vld [vmem:[#allocation2 + $0x110] sm:$0xff] }
 0x391   : > { %v7509_v4 = vpop.permute.xlu0 %7508 }
 0x392   : > { %v7511_v33 = vunpack.i.h.bf16 %v7509_v4  ;;  %v7510_v44 = vunpack.i.l.bf16 %v7509_v4  ;;  %v1330_v4 = vld [vmem:[#allocation2 + $0x12a] sm:$0xff] }
 0x393   : > { %v2487_v24 = vpack.c.bf16 %v1330_v4, %v1329_v54 }
 0x394   : > { %v10121_v20 = vpop.permute.xlu1 %7493  ;;  %v2419_v8 = vsel %vm2400_vm7, %v2386_v56, %v7510_v44  ;;  %v2420_v62 = vsel %vm2400_vm7, %v2387_v2, %v7511_v33  ;;  %v7480_v56 = vunpack.i.l.bf16 %v10089_v43 }
 0x395   : > { %v7519_v1 = vpop.permute.xlu0 %7518 }
 0x396   : > { %v7521_v55 = vunpack.i.h.bf16 %v7519_v1  ;;  %v7520_v49 = vunpack.i.l.bf16 %v7519_v1  ;;  %v2290_v1 = vsel %vm777_vm0, %v2258_v19, %v7436_v23  ;;  %v7481_v23 = vunpack.i.h.bf16 %v10089_v43  ;;  %v1074_v19 = vld [vmem:[#allocation2 + $0x108] sm:$0xff] }
 0x398   : > { %v10129_v63 = vpop.permute.xlu1 %7503  ;;  %v2322_v9 = vsel %vm2301_vm4, %v2289_v32, %v7520_v49  ;;  %v2323_v61 = vsel %vm2301_vm4, %v2290_v1, %v7521_v55 }
 0x399   : > { %v7529_v16 = vpop.permute.xlu0 %7528 }
 0x39c   : > { %v7514_v41 = vpop.permute.xlu1 %7513 }
 0x39d   : > { %v7516_v21 = vunpack.i.h.bf16 %v7514_v41  ;;  %v7515_v46 = vunpack.i.l.bf16 %v7514_v41  ;;  %v7539_v38 = vpop.permute.xlu0 %7538  ;;  %v7531_v41 = vunpack.i.h.bf16 %v7529_v16 }
 0x39e   : > { %v7541_v1 = vunpack.i.h.bf16 %v7539_v38 }
 0x39f   : > { %v2452_v57 = vsel %vm2433_vm8, %v2419_v8, %v7515_v46  ;;  %v2453_v5 = vsel %vm2433_vm8, %v2420_v62, %v7516_v21  ;;  %v7530_v21 = vunpack.i.l.bf16 %v7529_v16 }
 0x3a0   : > { %v7524_v39 = vpop.permute.xlu1 %7523  ;;  %v2484_v48 = vpack.c.bf16 %v2453_v5, %v2452_v57  ;;  %v2489_v5 = vpack.c.bf16 %v9861_v14, %v9859_v13  ;;  %v7486_v13 = vunpack.i.h.bf16 %v10115_v27  ;;  %v7485_v14 = vunpack.i.l.bf16 %v10115_v27 }
 0x3a1   : > { %v7526_v44 = vunpack.i.h.bf16 %v7524_v39  ;;  %v7525_v59 = vunpack.i.l.bf16 %v7524_v39  ;;  %v10149_v33 = vpop.permute.xlu0 %7548  ;;  %v7500_v27 = vunpack.i.l.bf16 %v10110_v3 }
 0x3a2   : > { %2730 = vmatmul.mubr.bf16.gmra.mrb[68].mxu1 %v2484_v48 }
 0x3a3   : > { %v2355_v46 = vsel %vm2334_vm5, %v2322_v9, %v7525_v59  ;;  %v2356_v35 = vsel %vm2334_vm5, %v2323_v61, %v7526_v44  ;;  %6431 = vmatprep.mubr.msk.bf16.mxu1 %vm660_vm1, %v2487_v24  ;;  %v7540_v44 = vunpack.i.l.bf16 %v7539_v38 }
 0x3a4   : > { %v7534_v2 = vpop.permute.xlu1 %7533  ;;  %v2388_v54 = vsel %vm2367_vm6, %v2355_v46, %v7530_v21  ;;  %v2389_v16 = vsel %vm2367_vm6, %v2356_v35, %v7531_v41  ;;  %v7490_v46 = vunpack.i.l.bf16 %v10102_v25 }
 0x3a5   : > { %v10162_v4 = vpop.permute.xlu0 %7558  ;;  %v2421_v55 = vsel %vm2400_vm7, %v2388_v54, %v7475_v18  ;;  %v2422_v6 = vsel %vm2400_vm7, %v2389_v16, %v7476_v28  ;;  %v7536_v12 = vunpack.i.h.bf16 %v7534_v2  ;;  %v7535_v43 = vunpack.i.l.bf16 %v7534_v2 }
 0x3a6   : > { %v2454_v49 = vsel %vm2433_vm8, %v2421_v55, %v7480_v56  ;;  %v2455_v8 = vsel %vm2433_vm8, %v2422_v6, %v7481_v23  ;;  %v7491_v18 = vunpack.i.h.bf16 %v10102_v25  ;;  %v7496_v16 = vunpack.i.h.bf16 %v10121_v20 }
 0x3a7   : > { %v2486_v62 = vpack.c.bf16 %v2455_v8, %v2454_v49  ;;  %v2260_v48 = vsel %vm660_vm1, %v1075_v58, %v7536_v12  ;;  %v2259_v24 = vsel %vm660_vm1, %v1074_v19, %v7535_v43  ;;  %v7495_v55 = vunpack.i.l.bf16 %v10121_v20  ;;  %v1076_v58 = vld [vmem:[#allocation2 + $0x120] sm:$0xff] }
 0x3a8   : > { %v10168_v22 = vpop.permute.xlu1 %7543  ;;  %v2291_v59 = vsel %vm777_vm0, %v2259_v24, %v7540_v44  ;;  %v2292_v9 = vsel %vm777_vm0, %v2260_v48, %v7541_v1  ;;  %v7501_v6 = vunpack.i.h.bf16 %v10110_v3  ;;  %v7506_v49 = vunpack.i.h.bf16 %v10129_v63  ;;  %v1077_v3 = vld [vmem:[#allocation2 + $0x128] sm:$0xff] }
 0x3a9   : > { %v10170_v57 = vpop.permute.xlu0 %7568  ;;  %v2324_v21 = vsel %vm2301_vm4, %v2291_v59, %v7485_v14  ;;  %v2325_v28 = vsel %vm2301_vm4, %v2292_v9, %v7486_v13  ;;  %v7505_v25 = vunpack.i.l.bf16 %v10129_v63  ;;  %v2261_v1 = vsel %vm660_vm1, %v1076_v58, %v7500_v27 }
 0x3aa   : > { %2738 = vmatmul.mubr.bf16.gmra.mrb[72].mxu1 %v2486_v62  ;;  %v2357_v2 = vsel %vm2334_vm5, %v2324_v21, %v7490_v46  ;;  %v2358_v54 = vsel %vm2334_vm5, %v2325_v28, %v7491_v18  ;;  %v2262_v59 = vsel %vm660_vm1, %v1077_v3, %v7501_v6  ;;  %v7551_v28 = vunpack.i.h.bf16 %v10149_v33 }
 0x3ab   : > { %6432 = vmatprep.mubr.msk.bf16.mxu1 %vm660_vm1, %v2489_v5  ;;  %v2390_v5 = vsel %vm2367_vm6, %v2357_v2, %v7495_v55  ;;  %v2391_v19 = vsel %vm2367_vm6, %v2358_v54, %v7496_v16  ;;  %v2293_v9 = vsel %vm777_vm0, %v2261_v1, %v7505_v25  ;;  %v2294_v21 = vsel %vm777_vm0, %v2262_v59, %v7506_v49 }
 0x3ac   : > { %v10175_v39 = vpop.permute.xlu1 %7553  ;;  %v7546_v16 = vunpack.i.h.bf16 %v10168_v22  ;;  %v7545_v55 = vunpack.i.l.bf16 %v10168_v22  ;;  %v7550_v6 = vunpack.i.l.bf16 %v10149_v33 }
 0x3ad   : > { %v7579_v32 = vpop.permute.xlu0 %7578  ;;  %v7556_v49 = vunpack.i.h.bf16 %v10175_v39 }
 0x3ae   : > { %v7581_v23 = vunpack.i.h.bf16 %v7579_v32  ;;  %v7580_v56 = vunpack.i.l.bf16 %v7579_v32 }
 0x3b0   : > { %v10181_v61 = vpop.permute.xlu1 %7563  ;;  %v2423_v32 = vsel %vm2400_vm7, %v2390_v5, %v7580_v56  ;;  %v2424_v20 = vsel %vm2400_vm7, %v2391_v19, %v7581_v23 }
 0x3b1   : > { %v7589_v41 = vpop.permute.xlu0 %7588 }
 0x3b2   : > { %v7591_v48 = vunpack.i.h.bf16 %v7589_v41  ;;  %v7590_v24 = vunpack.i.l.bf16 %v7589_v41  ;;  %v2491_v41 = vpack.c.bf16 %v9845_v50, %v9843_v29 }
 0x3b4   : > { %v10189_v38 = vpop.permute.xlu1 %7573  ;;  %v2326_v56 = vsel %vm2301_vm4, %v2293_v9, %v7590_v24  ;;  %v2327_v2 = vsel %vm2301_vm4, %v2294_v21, %v7591_v48 }
 0x3b5   : > { %v7599_v35 = vpop.permute.xlu0 %7598 }
 0x3b6   : > { %v7601_v54 = vunpack.i.h.bf16 %v7599_v35  ;;  %v7600_v27 = vunpack.i.l.bf16 %v7599_v35 }
 0x3b8   : > { %v7584_v8 = vpop.permute.xlu1 %7583 }
 0x3b9   : > { %v7586_v62 = vunpack.i.h.bf16 %v7584_v8  ;;  %v7585_v12 = vunpack.i.l.bf16 %v7584_v8  ;;  %v7609_v43 = vpop.permute.xlu0 %7608 }
 0x3ba   : > { %v7611_v58 = vunpack.i.h.bf16 %v7609_v43  ;;  %v7610_v48 = vunpack.i.l.bf16 %v7609_v43 }
 0x3bb   : > { %v2456_v63 = vsel %vm2433_vm8, %v2423_v32, %v7585_v12  ;;  %v2457_v44 = vsel %vm2433_vm8, %v2424_v20, %v7586_v62  ;;  %v7555_v32 = vunpack.i.l.bf16 %v10175_v39  ;;  %v2493_v39 = vpack.c.bf16 %v9942_v42, %v9940_v45 }
 0x3bc   : > { %v7594_v13 = vpop.permute.xlu1 %7593  ;;  %v2488_v14 = vpack.c.bf16 %v2457_v44, %v2456_v63  ;;  %v7570_v45 = vunpack.i.l.bf16 %v10170_v57 }
 0x3bd   : > { %v7596_v18 = vunpack.i.h.bf16 %v7594_v13  ;;  %v7595_v46 = vunpack.i.l.bf16 %v7594_v13  ;;  %v10212_v23 = vpop.permute.xlu0 %7618 }
 0x3be   : > { %2746 = vmatmul.mubr.bf16.gmra.mrb[76].mxu1 %v2488_v14  ;;  %v7560_v14 = vunpack.i.l.bf16 %v10162_v4 }
 0x3bf   : > { %v2359_v29 = vsel %vm2334_vm5, %v2326_v56, %v7595_v46  ;;  %v2360_v50 = vsel %vm2334_vm5, %v2327_v2, %v7596_v18  ;;  %6433 = vmatprep.mubr.msk.bf16.mxu1 %vm660_vm1, %v2491_v41  ;;  %v7565_v18 = vunpack.i.l.bf16 %v10181_v61  ;;  %v7571_v56 = vunpack.i.h.bf16 %v10170_v57 }
 0x3c0   : > { %v7604_v25 = vpop.permute.xlu1 %7603  ;;  %v2392_v8 = vsel %vm2367_vm6, %v2359_v29, %v7600_v27  ;;  %v2393_v35 = vsel %vm2367_vm6, %v2360_v50, %v7601_v54  ;;  %v7575_v2 = vunpack.i.l.bf16 %v10189_v38 }
 0x3c1   : > { %v7606_v62 = vunpack.i.h.bf16 %v7604_v25  ;;  %v7605_v12 = vunpack.i.l.bf16 %v7604_v25  ;;  %v7629_v5 = vpop.permute.xlu0 %7628  ;;  %v2425_v22 = vsel %vm2400_vm7, %v2392_v8, %v7545_v55  ;;  %v2426_v19 = vsel %vm2400_vm7, %v2393_v35, %v7546_v16 }
 0x3c2   : > { %v2458_v24 = vsel %vm2433_vm8, %v2425_v22, %v7550_v6  ;;  %v2459_v33 = vsel %vm2433_vm8, %v2426_v19, %v7551_v28  ;;  %v7566_v28 = vunpack.i.h.bf16 %v10181_v61  ;;  %v7631_v54 = vunpack.i.h.bf16 %v7629_v5  ;;  %v10259_v61 = vld [vmem:[#allocation2 + $0x19a] sm:$0xff] }
 0x3c3   : > { %v2264_v20 = vsel %vm660_vm1, %v9830_v31, %v7606_v62  ;;  %v2263_v3 = vsel %vm660_vm1, %v9828_v30, %v7605_v12  ;;  %v2490_v1 = vpack.c.bf16 %v2459_v33, %v2458_v24  ;;  %v7561_v31 = vunpack.i.h.bf16 %v10162_v4  ;;  %v8341_v62 = vld [vmem:[#allocation2 + $0x150] sm:$0xff]  ;;  %v8342_v19 = vld [vmem:[#allocation2 + $0x158] sm:$0xff] }
 0x3c4   : > { %v2295_v63 = vsel %vm777_vm0, %v2263_v3, %v7610_v48  ;;  %v2296_v44 = vsel %vm777_vm0, %v2264_v20, %v7611_v58  ;;  %v10236_v59 = vpop.permute.xlu1 %7613  ;;  %v7630_v27 = vunpack.i.l.bf16 %v7629_v5  ;;  %v7576_v55 = vunpack.i.h.bf16 %v10189_v38 }
 0x3c5   : > { %v2328_v43 = vsel %vm2301_vm4, %v2295_v63, %v7555_v32  ;;  %v2329_v9 = vsel %vm2301_vm4, %v2296_v44, %v7556_v49  ;;  %v7639_v13 = vpop.permute.xlu0 %7638  ;;  %v10261_v49 = vld [vmem:[#allocation2 + $0x1a2] sm:$0xff]  ;;  %v2265_v12 = vsel %vm660_vm1, %v8341_v62, %v7570_v45  ;;  %v2495_v22 = vpack.c.bf16 %v9976_v51, %v9974_v47 }
 0x3c6   : > { %2754 = vmatmul.mubr.bf16.gmra.mrb[80].mxu1 %v2490_v1  ;;  %v2361_v41 = vsel %vm2334_vm5, %v2328_v43, %v7560_v14  ;;  %v2362_v21 = vsel %vm2334_vm5, %v2329_v9, %v7561_v31  ;;  %v7641_v25 = vunpack.i.h.bf16 %v7639_v13  ;;  %v7640_v8 = vunpack.i.l.bf16 %v7639_v13 }
 0x3c7   : > { %6434 = vmatprep.mubr.msk.bf16.mxu1 %vm660_vm1, %v2493_v39  ;;  %v2394_v42 = vsel %vm2367_vm6, %v2361_v41, %v7565_v18  ;;  %v2395_v4 = vsel %vm2367_vm6, %v2362_v21, %v7566_v28  ;;  %v2266_v58 = vsel %vm660_vm1, %v8342_v19, %v7571_v56  ;;  %v2297_v48 = vsel %vm777_vm0, %v2265_v12, %v7575_v2 }
 0x3c8   : > { %v10245_v30 = vpop.permute.xlu1 %7623  ;;  %v2427_v35 = vsel %vm2400_vm7, %v2394_v42, %v7630_v27  ;;  %v2428_v57 = vsel %vm2400_vm7, %v2395_v4, %v7631_v54  ;;  %v2497_v32 = vpack.c.bf16 %v10261_v49, %v10259_v61  ;;  %v2298_v20 = vsel %vm777_vm0, %v2266_v58, %v7576_v55  ;;  %v8343_v55 = vld [vmem:[#allocation2 + $0x168] sm:$0xff] }
 0x3c9   : > { %v7649_v46 = vpop.permute.xlu0 %7648  ;;  %v7621_v3 = vunpack.i.h.bf16 %v10212_v23  ;;  %v2330_v44 = vsel %vm2301_vm4, %v2297_v48, %v7640_v8  ;;  %v2331_v47 = vsel %vm2301_vm4, %v2298_v20, %v7641_v25  ;;  %v7616_v9 = vunpack.i.h.bf16 %v10236_v59 }
 0x3ca   : > { %v7651_v51 = vunpack.i.h.bf16 %v7649_v46  ;;  %v7650_v43 = vunpack.i.l.bf16 %v7649_v46  ;;  %v7615_v13 = vunpack.i.l.bf16 %v10236_v59  ;;  %v7620_v41 = vunpack.i.l.bf16 %v10212_v23 }
 0x3cb   : > { %v7626_v21 = vunpack.i.h.bf16 %v10245_v30  ;;  %v7625_v23 = vunpack.i.l.bf16 %v10245_v30 }
 0x3cc   : > { %v7634_v16 = vpop.permute.xlu1 %7633 }
 0x3cd   : > { %v7636_v29 = vunpack.i.h.bf16 %v7634_v16  ;;  %v7635_v50 = vunpack.i.l.bf16 %v7634_v16  ;;  %v10257_v6 = vpop.permute.xlu0 %7653 }
 0x3ce   : > { %v7656_v49 = vunpack.i.h.bf16 %v10257_v6  ;;  %v7655_v25 = vunpack.i.l.bf16 %v10257_v6 }
 0x3cf   : > { %v2460_v5 = vsel %vm2433_vm8, %v2427_v35, %v7635_v50  ;;  %v2461_v38 = vsel %vm2433_vm8, %v2428_v57, %v7636_v29 }
 0x3d0   : > { %v7644_v24 = vpop.permute.xlu1 %7643  ;;  %v2492_v33 = vpack.c.bf16 %v2461_v38, %v2460_v5 }
 0x3d1   : > { %v7646_v1 = vunpack.i.h.bf16 %v7644_v24  ;;  %v7645_v63 = vunpack.i.l.bf16 %v7644_v24  ;;  %v7669_v14 = vpop.permute.xlu0 %7668 }
 0x3d2   : > { %2762 = vmatmul.mubr.bf16.gmra.mrb[84].mxu1 %v2492_v33  ;;  %v7671_v56 = vunpack.i.h.bf16 %v7669_v14  ;;  %v7670_v2 = vunpack.i.l.bf16 %v7669_v14 }
 0x3d3   : > { %v2363_v39 = vsel %vm2334_vm5, %v2330_v44, %v7645_v63  ;;  %v2364_v31 = vsel %vm2334_vm5, %v2331_v47, %v7646_v1  ;;  %6435 = vmatprep.mubr.msk.bf16.mxu1 %vm660_vm1, %v2495_v22  ;;  %v10310_v47 = vld [vmem:[#allocation11] ss:$0 sm:$0xff] }
 0x3d4   : > { %v7659_v28 = vpop.permute.xlu1 %7658  ;;  %v2396_v18 = vsel %vm2367_vm6, %v2363_v39, %v7650_v43  ;;  %v2397_v46 = vsel %vm2367_vm6, %v2364_v31, %v7651_v51 }
 0x3d5   : > { %v7661_v45 = vunpack.i.h.bf16 %v7659_v28  ;;  %v7660_v42 = vunpack.i.l.bf16 %v7659_v28  ;;  %v2429_v59 = vsel %vm2400_vm7, %v2396_v18, %v7615_v13  ;;  %v2430_v4 = vsel %vm2400_vm7, %v2397_v46, %v7616_v9  ;;  %v7674_v50 = vpop.permute.xlu0 %7673 }
 0x3d6   : > { %v2462_v54 = vsel %vm2433_vm8, %v2429_v59, %v7620_v41  ;;  %v2463_v27 = vsel %vm2433_vm8, %v2430_v4, %v7621_v3  ;;  %v7676_v22 = vunpack.i.h.bf16 %v7674_v50  ;;  %v7675_v19 = vunpack.i.l.bf16 %v7674_v50 }
 0x3d7   : > { %v2268_v16 = vsel %vm660_vm1, %v9896_v7, %v7661_v45  ;;  %v2267_v29 = vsel %vm660_vm1, %v8343_v55, %v7660_v42  ;;  %v2494_v61 = vpack.c.bf16 %v2463_v27, %v2462_v54 }
 0x3d8   : > { %v2299_v8 = vsel %vm777_vm0, %v2267_v29, %v7670_v2  ;;  %v2300_v35 = vsel %vm777_vm0, %v2268_v16, %v7671_v56  ;;  %v7664_v57 = vpop.permute.xlu1 %7663 }
 0x3d9   : > { %v7666_v62 = vunpack.i.h.bf16 %v7664_v57  ;;  %v7665_v12 = vunpack.i.l.bf16 %v7664_v57  ;;  %v2332_v30 = vsel %vm2301_vm4, %v2299_v8, %v7625_v23  ;;  %v2333_v7 = vsel %vm2301_vm4, %v2300_v35, %v7626_v21 }
 0x3da   : > { %v2365_v5 = vsel %vm2334_vm5, %v2332_v30, %v7655_v25  ;;  %v2366_v38 = vsel %vm2334_vm5, %v2333_v7, %v7656_v49  ;;  %2770 = vmatmul.mubr.bf16.gmra.mrb[88].mxu1 %v2494_v61 }
 0x3db   : > { %v2398_v6 = vsel %vm2367_vm6, %v2365_v5, %v7665_v12  ;;  %v2399_v58 = vsel %vm2367_vm6, %v2366_v38, %v7666_v62  ;;  %6436 = vmatprep.mubr.msk.bf16.mxu1 %vm660_vm1, %v2497_v32 }
 0x3dc   : > { %v7679_v48 = vpop.permute.xlu1 %7678  ;;  %v2431_v20 = vsel %vm2400_vm7, %v2398_v6, %v7675_v19  ;;  %v2432_v3 = vsel %vm2400_vm7, %v2399_v58, %v7676_v22 }
 0x3dd   : > { %v7681_v24 = vunpack.i.h.bf16 %v7679_v48  ;;  %v7680_v33 = vunpack.i.l.bf16 %v7679_v48 }
 0x3df   : > { %v2464_v1 = vsel %vm2433_vm8, %v2431_v20, %v7680_v33  ;;  %v2465_v63 = vsel %vm2433_vm8, %v2432_v3, %v7681_v24 }
 0x3e0   : > { %v2496_v44 = vpack.c.bf16 %v2465_v63, %v2464_v1 }
 0x3e2   : > { %2778 = vmatmul.mubr.bf16.gmra.mrb[92].mxu1 %v2496_v44 }
 0x3f0   : > { %v2659_v51 = vpop.f32.mrb[32].mxu1 }
 0x3f1   : > { %v2660_v43 = vadd.f32 %v10310_v47, %v2659_v51  ;;  %v2661_v9 = vpop.f32.mrb[33].mxu1 }
 0x3f2   : > { %v2662_v32 = vpop.f32.mrb[34].mxu1 }
 0x3f3   : > { %v2786_v13 = vmax.f32 %v2660_v43, 0.0  ;;  %v2663_v39 = vadd.f32 %v10310_v47, %v2662_v32  ;;  %v2664_v31 = vpop.f32.mrb[35].mxu1 }
 0x3f5   : > { %v2787_v14 = vmax.f32 %v2663_v39, 0.0  ;;  %2850 = vrot.lane.b32.xlu0 %v2786_v13, %s8895_s0 }
 0x3f7   : > { %v10315_v41 = vpack.c.bf16 %v2787_v14, %v2786_v13  ;;  %2852 = vrot.lane.b32.xlu1 %v2787_v14, %s8895_s0 }
 0x405   : > { %v2667_v21 = vpop.f32.mrb[36].mxu1 }
 0x406   : > { %v2668_v28 = vadd.f32 %v10310_v47, %v2667_v21  ;;  %v2669_v18 = vpop.f32.mrb[37].mxu1 }
 0x407   : > { %v2670_v46 = vpop.f32.mrb[38].mxu1 }
 0x408   : > { %v2788_v45 = vmax.f32 %v2668_v28, 0.0  ;;  %v2671_v42 = vadd.f32 %v10310_v47, %v2670_v46  ;;  %v2672_v59 = vpop.f32.mrb[39].mxu1 }
 0x40a   : > { %v2789_v4 = vmax.f32 %v2671_v42, 0.0  ;;  %2854 = vrot.lane.b32.xlu0 %v2788_v45, %s8895_s0 }
 0x40c   : > { %v10321_v56 = vpack.c.bf16 %v2789_v4, %v2788_v45  ;;  %2856 = vrot.lane.b32.xlu1 %v2789_v4, %s8895_s0 }
 0x40d   : > { %v2675_v2 = vpop.f32.mrb[40].mxu1 }
 0x40e   : > { %v2676_v54 = vadd.f32 %v10310_v47, %v2675_v2  ;;  %v2677_v27 = vpop.f32.mrb[41].mxu1 }
 0x40f   : > { %v2678_v23 = vpop.f32.mrb[42].mxu1 }
 0x410   : > { %v2790_v16 = vmax.f32 %v2676_v54, 0.0  ;;  %v2679_v55 = vadd.f32 %v10310_v47, %v2678_v23  ;;  %v2680_v29 = vpop.f32.mrb[43].mxu1  ;;  %v10355_v54 = vpop.permute.xlu0 %7683 }
 0x412   : > { %v2791_v50 = vmax.f32 %v2679_v55, 0.0  ;;  %2858 = vrot.lane.b32.xlu0 %v2790_v16, %s8895_s0  ;;  %v10358_v55 = vpop.permute.xlu1 %7693 }
 0x414   : > { %v10327_v61 = vpack.c.bf16 %v2791_v50, %v2790_v16  ;;  %2860 = vrot.lane.b32.xlu1 %v2791_v50, %s8895_s0 }
 0x421   : > { %v2683_v49 = vpop.f32.mrb[44].mxu1 }
 0x422   : > { %v2684_v25 = vadd.f32 %v10310_v47, %v2683_v49  ;;  %v2685_v8 = vpop.f32.mrb[45].mxu1 }
 0x423   : > { %v2686_v35 = vpop.f32.mrb[46].mxu1 }
 0x424   : > { %v2792_v57 = vmax.f32 %v2684_v25, 0.0  ;;  %v2687_v62 = vadd.f32 %v10310_v47, %v2686_v35  ;;  %v2688_v12 = vpop.f32.mrb[47].mxu1  ;;  %v10364_v25 = vpop.permute.xlu0 %7688 }
 0x426   : > { %v2793_v30 = vmax.f32 %v2687_v62, 0.0  ;;  %2862 = vrot.lane.b32.xlu0 %v2792_v57, %s8895_s0  ;;  %v10367_v62 = vpop.permute.xlu1 %7698 }
 0x428   : > { %v10333_v7 = vpack.c.bf16 %v2793_v30, %v2792_v57  ;;  %2864 = vrot.lane.b32.xlu1 %v2793_v30, %s8895_s0 }
 0x429   : > { %v2691_v5 = vpop.f32.mrb[48].mxu1 }
 0x42a   : > { %v2692_v38 = vadd.f32 %v10310_v47, %v2691_v5  ;;  %v2693_v22 = vpop.f32.mrb[49].mxu1 }
 0x42b   : > { %v2694_v19 = vpop.f32.mrb[50].mxu1 }
 0x42c   : > { %v2794_v6 = vmax.f32 %v2692_v38, 0.0  ;;  %v2695_v58 = vadd.f32 %v10310_v47, %v2694_v19  ;;  %v2696_v48 = vpop.f32.mrb[51].mxu1 }
 0x42e   : > { %v2795_v24 = vmax.f32 %v2695_v58, 0.0  ;;  %2866 = vrot.lane.b32.xlu0 %v2794_v6, %s8895_s0 }
 0x430   : > { %v10339_v33 = vpack.c.bf16 %v2795_v24, %v2794_v6  ;;  %2868 = vrot.lane.b32.xlu1 %v2795_v24, %s8895_s0 }
 0x43d   : > { %v2699_v20 = vpop.f32.mrb[52].mxu1 }
 0x43e   : > { %v2700_v3 = vadd.f32 %v10310_v47, %v2699_v20  ;;  %v2701_v1 = vpop.f32.mrb[53].mxu1 }
 0x43f   : > { %v2702_v63 = vpop.f32.mrb[54].mxu1 }
 0x440   : > { %v2796_v44 = vmax.f32 %v2700_v3, 0.0  ;;  %v2703_v51 = vadd.f32 %v10310_v47, %v2702_v63  ;;  %v2704_v43 = vpop.f32.mrb[55].mxu1 }
 0x442   : > { %v2797_v9 = vmax.f32 %v2703_v51, 0.0  ;;  %2870 = vrot.lane.b32.xlu0 %v2796_v44, %s8895_s0 }
 0x444   : > { %v10345_v32 = vpack.c.bf16 %v2797_v9, %v2796_v44  ;;  %2872 = vrot.lane.b32.xlu1 %v2797_v9, %s8895_s0 }
 0x445   : > { %v2707_v13 = vpop.f32.mrb[56].mxu1 }
 0x446   : > { %v2708_v39 = vadd.f32 %v10310_v47, %v2707_v13  ;;  %v2709_v31 = vpop.f32.mrb[57].mxu1 }
 0x447   : > { %v2710_v14 = vpop.f32.mrb[58].mxu1 }
 0x448   : > { %v2798_v21 = vmax.f32 %v2708_v39, 0.0  ;;  %v2711_v28 = vadd.f32 %v10310_v47, %v2710_v14  ;;  %v2712_v18 = vpop.f32.mrb[59].mxu1 }
 0x44a   : > { %v2799_v46 = vmax.f32 %v2711_v28, 0.0  ;;  %2874 = vrot.lane.b32.xlu0 %v2798_v21, %s8895_s0 }
 0x44c   : > { %v10351_v45 = vpack.c.bf16 %v2799_v46, %v2798_v21  ;;  %2876 = vrot.lane.b32.xlu1 %v2799_v46, %s8895_s0 }
 0x459   : > { %v2715_v42 = vpop.f32.mrb[60].mxu1 }
 0x45a   : > { %v2716_v59 = vadd.f32 %v10310_v47, %v2715_v42  ;;  %v2717_v4 = vpop.f32.mrb[61].mxu1 }
 0x45b   : > { %v2718_v2 = vpop.f32.mrb[62].mxu1 }
 0x45c   : > { %v2800_v27 = vmax.f32 %v2716_v59, 0.0  ;;  %v2719_v23 = vadd.f32 %v10310_v47, %v2718_v2  ;;  %v2720_v16 = vpop.f32.mrb[63].mxu1 }
 0x45e   : > { %v2801_v29 = vmax.f32 %v2719_v23, 0.0  ;;  %2878 = vrot.lane.b32.xlu0 %v2800_v27, %s8895_s0 }
 0x460   : > { %v10361_v50 = vpack.c.bf16 %v2801_v29, %v2800_v27  ;;  %2880 = vrot.lane.b32.xlu1 %v2801_v29, %s8895_s0 }
 0x461   : > { %v2723_v49 = vpop.f32.mrb[64].mxu1 }
 0x462   : > { %v2724_v8 = vadd.f32 %v10310_v47, %v2723_v49  ;;  %v2725_v35 = vpop.f32.mrb[65].mxu1 }
 0x463   : > { %v2726_v57 = vpop.f32.mrb[66].mxu1 }
 0x464   : > { %v2802_v12 = vmax.f32 %v2724_v8, 0.0  ;;  %v2727_v30 = vadd.f32 %v10310_v47, %v2726_v57  ;;  %v2728_v5 = vpop.f32.mrb[67].mxu1 }
 0x466   : > { %v2803_v38 = vmax.f32 %v2727_v30, 0.0  ;;  %2882 = vrot.lane.b32.xlu0 %v2802_v12, %s8895_s0 }
 0x467   : > { %v2851_v22 = vpop.permute.xlu0 %2850 }
 0x468   : > { %v10371_v19 = vpack.c.bf16 %v2803_v38, %v2802_v12  ;;  %2947 = vst.msk [vmem:[#allocation2 + $0x19] sm:$0xff] %vm2946_vm9, %v2851_v22  ;;  %2884 = vrot.lane.b32.xlu1 %v2803_v38, %s8895_s0 }
 0x469   : > { %v2853_v6 = vpop.permute.xlu1 %2852 }
 0x46a   : > { %2948 = vst.msk [vmem:[#allocation2 + $0x21] sm:$0xff] %vm2946_vm9, %v2853_v6 }
 0x475   : > { %v2731_v58 = vpop.f32.mrb[68].mxu1 }
 0x476   : > { %v2732_v48 = vadd.f32 %v10310_v47, %v2731_v58  ;;  %v2733_v24 = vpop.f32.mrb[69].mxu1 }
 0x477   : > { %v2734_v20 = vpop.f32.mrb[70].mxu1 }
 0x478   : > { %v2804_v3 = vmax.f32 %v2732_v48, 0.0  ;;  %v2735_v1 = vadd.f32 %v10310_v47, %v2734_v20  ;;  %v2736_v63 = vpop.f32.mrb[71].mxu1 }
 0x47a   : > { %v2805_v44 = vmax.f32 %v2735_v1, 0.0  ;;  %2886 = vrot.lane.b32.xlu0 %v2804_v3, %s8895_s0 }
 0x47c   : > { %v10379_v51 = vpack.c.bf16 %v2805_v44, %v2804_v3  ;;  %2888 = vrot.lane.b32.xlu1 %v2805_v44, %s8895_s0  ;;  %v2855_v43 = vpop.permute.xlu0 %2854 }
 0x47d   : > { %2949 = vst.msk [vmem:[#allocation2 + $0x31] sm:$0xff] %vm2946_vm9, %v2855_v43  ;;  %v2739_v9 = vpop.f32.mrb[72].mxu1 }
 0x47e   : > { %v2740_v13 = vadd.f32 %v10310_v47, %v2739_v9  ;;  %v2741_v39 = vpop.f32.mrb[73].mxu1  ;;  %v2857_v31 = vpop.permute.xlu1 %2856 }
 0x47f   : > { %2950 = vst.msk [vmem:[#allocation2 + $0x39] sm:$0xff] %vm2946_vm9, %v2857_v31  ;;  %v2742_v14 = vpop.f32.mrb[74].mxu1 }
 0x480   : > { %v2806_v21 = vmax.f32 %v2740_v13, 0.0  ;;  %v2743_v28 = vadd.f32 %v10310_v47, %v2742_v14  ;;  %v2744_v18 = vpop.f32.mrb[75].mxu1 }
 0x482   : > { %v2807_v46 = vmax.f32 %v2743_v28, 0.0  ;;  %2890 = vrot.lane.b32.xlu0 %v2806_v21, %s8895_s0 }
 0x484   : > { %v10387_v42 = vpack.c.bf16 %v2807_v46, %v2806_v21  ;;  %2892 = vrot.lane.b32.xlu1 %v2807_v46, %s8895_s0  ;;  %v2859_v59 = vpop.permute.xlu0 %2858 }
 0x485   : > { %2951 = vst.msk [vmem:[#allocation2 + $0x49] sm:$0xff] %vm2946_vm9, %v2859_v59 }
 0x486   : > { %11722 = vst [vmem:[#allocation43_spill] sm:$0xff] %v10387_v42  ;;  %v2861_v4 = vpop.permute.xlu1 %2860 }
 0x487   : > { %2952 = vst.msk [vmem:[#allocation2 + $0x51] sm:$0xff] %vm2946_vm9, %v2861_v4 }
 0x491   : > { %v2747_v2 = vpop.f32.mrb[76].mxu1 }
 0x492   : > { %v2748_v27 = vadd.f32 %v10310_v47, %v2747_v2  ;;  %v2749_v23 = vpop.f32.mrb[77].mxu1 }
 0x493   : > { %v2750_v16 = vpop.f32.mrb[78].mxu1 }
 0x494   : > { %v2808_v29 = vmax.f32 %v2748_v27, 0.0  ;;  %v2751_v49 = vadd.f32 %v10310_v47, %v2750_v16  ;;  %v2752_v8 = vpop.f32.mrb[79].mxu1 }
 0x496   : > { %v2809_v35 = vmax.f32 %v2751_v49, 0.0  ;;  %2894 = vrot.lane.b32.xlu0 %v2808_v29, %s8895_s0 }
 0x498   : > { %v10395_v57 = vpack.c.bf16 %v2809_v35, %v2808_v29  ;;  %2896 = vrot.lane.b32.xlu1 %v2809_v35, %s8895_s0  ;;  %v2863_v12 = vpop.permute.xlu0 %2862 }
 0x499   : > { %2953 = vst.msk [vmem:[#allocation2 + $0x61] sm:$0xff] %vm2946_vm9, %v2863_v12  ;;  %v2755_v30 = vpop.f32.mrb[80].mxu1 }
 0x49a   : > { %11723 = vst [vmem:[#allocation44_spill] sm:$0xff] %v10395_v57  ;;  %v2756_v5 = vadd.f32 %v10310_v47, %v2755_v30  ;;  %v2757_v38 = vpop.f32.mrb[81].mxu1  ;;  %v2865_v22 = vpop.permute.xlu1 %2864 }
 0x49b   : > { %2954 = vst.msk [vmem:[#allocation2 + $0x69] sm:$0xff] %vm2946_vm9, %v2865_v22  ;;  %v2758_v6 = vpop.f32.mrb[82].mxu1 }
 0x49c   : > { %v2810_v58 = vmax.f32 %v2756_v5, 0.0  ;;  %v2759_v48 = vadd.f32 %v10310_v47, %v2758_v6  ;;  %v2760_v24 = vpop.f32.mrb[83].mxu1 }
 0x49d   : > { %v10427_v24 = vld [vmem:[#allocation2 + $0x18] sm:$0xff] }
 0x49e   : > { %v2811_v20 = vmax.f32 %v2759_v48, 0.0  ;;  %2898 = vrot.lane.b32.xlu0 %v2810_v58, %s8895_s0 }
 0x4a0   : > { %v10403_v3 = vpack.c.bf16 %v2811_v20, %v2810_v58  ;;  %2900 = vrot.lane.b32.xlu1 %v2811_v20, %s8895_s0  ;;  %v2867_v1 = vpop.permute.xlu0 %2866  ;;  %v10424_v58 = vld [vmem:[#allocation2 + $0x20] sm:$0xff] }
 0x4a1   : > { %2955 = vst.msk [vmem:[#allocation2 + $0x79] sm:$0xff] %vm2946_vm9, %v2867_v1  ;;  %v3014_v20 = vld [vmem:[#allocation2 + $0x21] sm:$0xff] }
 0x4a2   : > { %11724 = vst [vmem:[#allocation45_spill] sm:$0xff] %v10403_v3  ;;  %v2869_v63 = vpop.permute.xlu1 %2868 }
 0x4a3   : > { %2956 = vst.msk [vmem:[#allocation2 + $0x81] sm:$0xff] %vm2946_vm9, %v2869_v63 }
 0x4a5   : > { %v2763_v44 = vpop.f32.mrb[84].mxu1 }
 0x4a6   : > { %v2764_v43 = vadd.f32 %v10310_v47, %v2763_v44  ;;  %v2765_v9 = vpop.f32.mrb[85].mxu1  ;;  %v7712_v44 = vpack.i.bf16 %v10424_v58, %v10427_v24 }
 0x4a7   : > { %v2766_v13 = vpop.f32.mrb[86].mxu1 }
 0x4a8   : > { %v2812_v39 = vmax.f32 %v2764_v43, 0.0  ;;  %v2767_v31 = vadd.f32 %v10310_v47, %v2766_v13  ;;  %v2768_v14 = vpop.f32.mrb[87].mxu1  ;;  %v3045_v13 = vld [vmem:[#allocation2 + $0x1a] sm:$0xff] }
 0x4aa   : > { %v2813_v21 = vmax.f32 %v2767_v31, 0.0  ;;  %2902 = vrot.lane.b32.xlu0 %v2812_v39, %s8895_s0  ;;  %v8333_v31 = vld [vmem:[#allocation12] sm:$0xff]  }
 0x4ab   : > { %6679 = vmatprep.subr.bf16.mxu0 %v8333_v31 }
 0x4ac   : > { %v10411_v28 = vpack.c.bf16 %v2813_v21, %v2812_v39  ;;  %2904 = vrot.lane.b32.xlu1 %v2813_v21, %s8895_s0  ;;  %v3046_v39 = vld [vmem:[#allocation2 + $0x22] sm:$0xff]  ;;  %v10439_v21 = vld [vmem:[#allocation2 + $0x38] sm:$0xff]  ;;  %6680 = vmatpush3.bf16.msra.mxu0 %v8333_v31 }
 0x4ad   : > { %v2771_v18 = vpop.f32.mrb[88].mxu1  ;;  %v7707_v14 = vpack.i.bf16 %v3046_v39, %v3045_v13  ;;  %v10473_v31 = vld [vmem:[#allocation2 + $0x68] sm:$0xff] }
 0x4ae   : > { %11725 = vst [vmem:[#allocation46_spill] sm:$0xff] %v10411_v28  ;;  %v2772_v46 = vadd.f32 %v10310_v47, %v2771_v18  ;;  %v2773_v59 = vpop.f32.mrb[89].mxu1  ;;  %v8334_v18 = vld [vmem:[#allocation12 + $0x8] sm:$0xff]  }
 0x4af   : > { %v2774_v4 = vpop.f32.mrb[90].mxu1  ;;  %6681 = vmatprep.subr.bf16.mxu0 %v8334_v18 }
 0x4b0   : > { %v2814_v2 = vmax.f32 %v2772_v46, 0.0  ;;  %v2775_v27 = vadd.f32 %v10310_v47, %v2774_v4  ;;  %v2776_v23 = vpop.f32.mrb[91].mxu1  ;;  %v10442_v46 = vld [vmem:[#allocation2 + $0x30] sm:$0xff]  ;;  %v3110_v4 = vld [vmem:[#allocation2 + $0x39] sm:$0xff]  ;;  %6682 = vmatpush3.bf16.msra.mxu0 %v8334_v18 }
 0x4b1   : > { %v7727_v59 = vpack.i.bf16 %v10439_v21, %v10442_v46 }
 0x4b2   : > { %v2815_v16 = vmax.f32 %v2775_v27, 0.0  ;;  %2906 = vrot.lane.b32.xlu0 %v2814_v2, %s8895_s0  ;;  %v3109_v27 = vld [vmem:[#allocation2 + $0x31] sm:$0xff] }
 0x4b3   : > { %v7732_v23 = vpack.i.bf16 %v3110_v4, %v3109_v27  ;;  %v3113_v4 = vld [vmem:[#allocation2 + $0x61] sm:$0xff] }
 0x4b4   : > { %v10417_v29 = vpack.c.bf16 %v2815_v16, %v2814_v2  ;;  %2908 = vrot.lane.b32.xlu1 %v2815_v16, %s8895_s0  ;;  %v2871_v49 = vpop.permute.xlu0 %2870  ;;  %v8335_v2 = vld [vmem:[#allocation12 + $0x10] sm:$0xff]   ;;  %v3141_v16 = vld [vmem:[#allocation2 + $0x32] sm:$0xff] }
 0x4b5   : > { %2957 = vst.msk [vmem:[#allocation2 + $0x91] sm:$0xff] %vm2946_vm9, %v2871_v49  ;;  %v2779_v8 = vpop.f32.mrb[92].mxu1  ;;  %6683 = vmatprep.subr.bf16.mxu0 %v8335_v2  ;;  %v3142_v49 = vld [vmem:[#allocation2 + $0x3a] sm:$0xff]  ;;  %v3145_v27 = vld [vmem:[#allocation2 + $0x62] sm:$0xff] }
 0x4b6   : > { %11726 = vst [vmem:[#allocation47_spill] sm:$0xff] %v10417_v29  ;;  %v2780_v35 = vadd.f32 %v10310_v47, %v2779_v8  ;;  %v2781_v12 = vpop.f32.mrb[93].mxu1  ;;  %v2873_v30 = vpop.permute.xlu1 %2872  ;;  %6684 = vmatpush3.bf16.msra.mxu0 %v8335_v2  ;;  %v8336_v8 = vld [vmem:[#allocation12 + $0x18] sm:$0xff]  }
 0x4b7   : > { %2958 = vst.msk [vmem:[#allocation2 + $0x99] sm:$0xff] %vm2946_vm9, %v2873_v30  ;;  %v2782_v5 = vpop.f32.mrb[94].mxu1  ;;  %6685 = vmatprep.subr.bf16.mxu0 %v8336_v8  ;;  %v8337_v30 = vld [vmem:[#allocation12 + $0x20] ss:$0 sps:$4 sm:$0xff]  }
 0x4b8   : > { %v2816_v38 = vmax.f32 %v2780_v35, 0.0  ;;  %v2783_v22 = vadd.f32 %v10310_v47, %v2782_v5  ;;  %v2784_v6 = vpop.f32.mrb[95].mxu1  ;;  %v3013_v47 = vld [vmem:[#allocation2 + $0x19] sm:$0xff]  ;;  %v7737_v35 = vpack.i.bf16 %v3142_v49, %v3141_v16 }
 0x4b9   : > { %v7702_v9 = vpack.i.bf16 %v3014_v20, %v3013_v47  ;;  %v10460_v6 = vld [vmem:[#allocation2 + $0x48] sm:$0xff]  ;;  %v3238_v20 = vld [vmem:[#allocation2 + $0x52] sm:$0xff] }
 0x4ba   : > { %v2817_v48 = vmax.f32 %v2783_v22, 0.0  ;;  %2910 = vrot.lane.b32.xlu0 %v2816_v38, %s8895_s0  ;;  %6686 = vmatpush3.bf16.msra.mxu0 %v8336_v8  ;;  %v10457_v22 = vld [vmem:[#allocation2 + $0x50] sm:$0xff] }
 0x4bb   : > { %6923 = vmatprep.subr.msk.bf16.mxu0 %vm4658_vm10, %v8337_v30 }
 0x4bc   : > { %v10429_v1 = vpack.c.bf16 %v2817_v48, %v2816_v38  ;;  %2912 = vrot.lane.b32.xlu1 %v2817_v48, %s8895_s0  ;;  %v2875_v63 = vpop.permute.xlu0 %2874  ;;  %s8897_s0 = smov 40   ;;  %v4660_v38 = vsel %vm4658_vm10, %v8337_v30, 0  ;;  %v3237_v48 = vld [vmem:[#allocation2 + $0x4a] sm:$0xff]  ;;  %v10493_v30 = vld [vmem:[#allocation2 + $0x78] sm:$0xff] }
 0x4bd   : > { %2959 = vst.msk [vmem:[#allocation2 + $0xa9] sm:$0xff] %vm2946_vm9, %v2875_v63  ;;  %v7767_v63 = vpack.i.bf16 %v10457_v22, %v10460_v6 }
 0x4be   : > { %11727 = vst [vmem:[#allocation48_spill] sm:$0xff] %v10429_v1  ;;  %v2877_v43 = vpop.permute.xlu1 %2876  ;;  %7713 = vrot.lane.b32.xlu0 %v7712_v44, %s8896_s26  ;;  %6688 = vmatpush3.bf16.msra.mxu0 %v4660_v38  ;;  %v3206_v44 = vld [vmem:[#allocation2 + $0x51] sm:$0xff]  ;;  %v3242_v38 = vld [vmem:[#allocation2 + $0x82] sm:$0xff] }
 0x4bf   : > { %2960 = vst.msk [vmem:[#allocation2 + $0xb1] sm:$0xff] %vm2946_vm9, %v2877_v43  ;;  %v7777_v43 = vpack.i.bf16 %v3238_v20, %v3237_v48 }
 0x4c0   : > { %7703 = vrot.lane.b32.xlu1 %v7702_v9, %s8893_s21 }
 0x4c2   : > { %7718 = vrot.lane.b32.xlu0 %v7702_v9, %s8886_s19  ;;  %v3205_v9 = vld [vmem:[#allocation2 + $0x49] sm:$0xff] }
 0x4c3   : > { %v7772_v39 = vpack.i.bf16 %v3206_v44, %v3205_v9  ;;  %v3086_v9 = vld [vmem:[#allocation2 + $0x98] sm:$0xff] }
 0x4c4   : > { %7708 = vrot.lane.b32.xlu1 %v7707_v14, %s8885_s2 }
 0x4c6   : > { %7723 = vrot.lane.b32.xlu0 %v7707_v14, %s8897_s0  ;;  %v10476_v14 = vld [vmem:[#allocation2 + $0x60] sm:$0xff] }
 0x4c7   : > { %v7807_v18 = vpack.i.bf16 %v10473_v31, %v10476_v14 }
 0x4c8   : > { %7728 = vrot.lane.b32.xlu1 %v7727_v59, %s8896_s26 }
 0x4ca   : > { %7743 = vrot.lane.b32.xlu0 %v7727_v59, %s8890_s18  ;;  %v3114_v59 = vld [vmem:[#allocation2 + $0x69] sm:$0xff] }
 0x4cb   : > { %v7812_v2 = vpack.i.bf16 %v3114_v59, %v3113_v4  ;;  %v3117_v4 = vld [vmem:[#allocation2 + $0x91] sm:$0xff] }
 0x4cc   : > { %7733 = vrot.lane.b32.xlu1 %v7732_v23, %s8886_s19 }
 0x4ce   : > { %7748 = vrot.lane.b32.xlu0 %v7732_v23, %s8894_s17 }
 0x4d0   : > { %7738 = vrot.lane.b32.xlu1 %v7737_v35, %s8897_s0  ;;  %v2879_v12 = vpop.permute.xlu0 %2878 }
 0x4d1   : > { %2961 = vst.msk [vmem:[#allocation2 + $0xc1] sm:$0xff] %vm2946_vm9, %v2879_v12 }
 0x4d2   : > { %v2881_v5 = vpop.permute.xlu1 %2880  ;;  %7753 = vrot.lane.b32.xlu0 %v7737_v35, %s8891_s29 }
 0x4d3   : > { %2962 = vst.msk [vmem:[#allocation2 + $0xc9] sm:$0xff] %vm2946_vm9, %v2881_v5  ;;  %v3241_v5 = vld [vmem:[#allocation2 + $0x7a] sm:$0xff] }
 0x4d4   : > { %7758 = vrot.lane.b32.xlu1 %v7732_v23, %s8893_s21  ;;  %v3146_v23 = vld [vmem:[#allocation2 + $0x6a] sm:$0xff]  ;;  %v7857_v44 = vpack.i.bf16 %v3242_v38, %v3241_v5 }
 0x4d5   : > { %v7817_v8 = vpack.i.bf16 %v3146_v23, %v3145_v27  ;;  %v3149_v23 = vld [vmem:[#allocation2 + $0x92] sm:$0xff]  ;;  %v3181_v38 = vld [vmem:[#allocation2 + $0xa8] sm:$0xff] }
 0x4d6   : > { %7763 = vrot.lane.b32.xlu0 %v7737_v35, %s8885_s2  ;;  %v10489_v35 = vld [vmem:[#allocation2 + $0x80] sm:$0xff]  ;;  %v3182_v5 = vld [vmem:[#allocation2 + $0xb0] sm:$0xff] }
 0x4d7   : > { %v7847_v20 = vpack.i.bf16 %v10489_v35, %v10493_v30 }
 0x4d8   : > { %7768 = vrot.lane.b32.xlu1 %v7767_v63, %s8890_s18  ;;  %v2883_v47 = vpop.permute.xlu0 %2882 }
 0x4d9   : > { %2963 = vst.msk [vmem:[#allocation2 + $0xd9] sm:$0xff] %vm2946_vm9, %v2883_v47  ;;  %v3209_v47 = vld [vmem:[#allocation2 + $0x79] sm:$0xff] }
 0x4da   : > { %v2885_v13 = vpop.permute.xlu1 %2884  ;;  %7778 = vrot.lane.b32.xlu0 %v7777_v43, %s8891_s29 }
 0x4db   : > { %2964 = vst.msk [vmem:[#allocation2 + $0xe1] sm:$0xff] %vm2946_vm9, %v2885_v13  ;;  %v3085_v13 = vld [vmem:[#allocation2 + $0x90] sm:$0xff] }
 0x4dc   : > { %7773 = vrot.lane.b32.xlu1 %v7772_v39, %s8894_s17 }
 0x4de   : > { %7793 = vrot.lane.b32.xlu0 %v7767_v63, %s8896_s26  ;;  %v3210_v63 = vld [vmem:[#allocation2 + $0x81] sm:$0xff] }
 0x4e0   : > { %7783 = vrot.lane.b32.xlu1 %v7772_v39, %s8893_s21 }
 0x4e2   : > { %7798 = vrot.lane.b32.xlu0 %v7772_v39, %s8886_s19  ;;  %v7887_v39 = vpack.i.bf16 %v3086_v9, %v3085_v13 }
 0x4e4   : > { %7788 = vrot.lane.b32.xlu1 %v7777_v43, %s8885_s2 }
 0x4e6   : > { %7803 = vrot.lane.b32.xlu0 %v7777_v43, %s8897_s0  ;;  %v7852_v43 = vpack.i.bf16 %v3210_v63, %v3209_v47  ;;  %v7927_v63 = vpack.i.bf16 %v3182_v5, %v3181_v38 }
 0x4e8   : > { %7808 = vrot.lane.b32.xlu1 %v7807_v18, %s8896_s26 }
 0x4ea   : > { %7823 = vrot.lane.b32.xlu0 %v7807_v18, %s8890_s18  ;;  %v3118_v18 = vld [vmem:[#allocation2 + $0x99] sm:$0xff] }
 0x4eb   : > { %v7892_v27 = vpack.i.bf16 %v3118_v18, %v3117_v4  ;;  %v3090_v18 = vld [vmem:[#allocation2 + $0xc8] sm:$0xff]  ;;  %v3089_v4 = vld [vmem:[#allocation2 + $0xc0] sm:$0xff] }
 0x4ec   : > { %7813 = vrot.lane.b32.xlu1 %v7812_v2, %s8886_s19  ;;  %v2887_v16 = vpop.permute.xlu0 %2886 }
 0x4ed   : > { %2965 = vst.msk [vmem:[#allocation2 + $0xf1] sm:$0xff] %vm2946_vm9, %v2887_v16  ;;  %v3150_v16 = vld [vmem:[#allocation2 + $0x9a] sm:$0xff] }
 0x4ee   : > { %v2889_v49 = vpop.permute.xlu1 %2888  ;;  %7828 = vrot.lane.b32.xlu0 %v7812_v2, %s8894_s17 }
 0x4ef   : > { %2966 = vst.msk [vmem:[#allocation2 + $0xf9] sm:$0xff] %vm2946_vm9, %v2889_v49  ;;  %v7897_v49 = vpack.i.bf16 %v3150_v16, %v3149_v23  ;;  %v3122_v23 = vld [vmem:[#allocation2 + $0xc9] sm:$0xff]  ;;  %v3121_v16 = vld [vmem:[#allocation2 + $0xc1] sm:$0xff] }
 0x4f0   : > { %7818 = vrot.lane.b32.xlu1 %v7817_v8, %s8897_s0 }
 0x4f2   : > { %7833 = vrot.lane.b32.xlu0 %v7817_v8, %s8891_s29 }
 0x4f4   : > { %7838 = vrot.lane.b32.xlu1 %v7812_v2, %s8893_s21  ;;  %v2891_v12 = vpop.permute.xlu0 %2890 }
 0x4f5   : > { %2967 = vst.msk [vmem:[#allocation2 + $0x109] sm:$0xff] %vm2946_vm9, %v2891_v12 }
 0x4f6   : > { %v2893_v48 = vpop.permute.xlu1 %2892  ;;  %7843 = vrot.lane.b32.xlu0 %v7817_v8, %s8885_s2 }
 0x4f7   : > { %2968 = vst.msk [vmem:[#allocation2 + $0x111] sm:$0xff] %vm2946_vm9, %v2893_v48  ;;  %v3245_v48 = vld [vmem:[#allocation2 + $0xaa] sm:$0xff] }
 0x4f8   : > { %7848 = vrot.lane.b32.xlu1 %v7847_v20, %s8890_s18 }
 0x4fa   : > { %7858 = vrot.lane.b32.xlu0 %v7857_v44, %s8891_s29 }
 0x4fc   : > { %7853 = vrot.lane.b32.xlu1 %v7852_v43, %s8894_s17 }
 0x4fe   : > { %7873 = vrot.lane.b32.xlu0 %v7847_v20, %s8896_s26  ;;  %v3246_v20 = vld [vmem:[#allocation2 + $0xb2] sm:$0xff] }
 0x4ff   : > { %v7937_v47 = vpack.i.bf16 %v3246_v20, %v3245_v48 }
 0x500   : > { %7863 = vrot.lane.b32.xlu1 %v7852_v43, %s8893_s21 }
 0x502   : > { %7878 = vrot.lane.b32.xlu0 %v7852_v43, %s8886_s19  ;;  %v3213_v43 = vld [vmem:[#allocation2 + $0xa9] sm:$0xff] }
 0x504   : > { %7868 = vrot.lane.b32.xlu1 %v7857_v44, %s8885_s2 }
 0x506   : > { %7883 = vrot.lane.b32.xlu0 %v7857_v44, %s8897_s0  ;;  %v3214_v44 = vld [vmem:[#allocation2 + $0xb1] sm:$0xff] }
 0x507   : > { %v7932_v9 = vpack.i.bf16 %v3214_v44, %v3213_v43  ;;  %v3186_v44 = vld [vmem:[#allocation2 + $0xe0] sm:$0xff]  ;;  %v3185_v43 = vld [vmem:[#allocation2 + $0xd8] sm:$0xff] }
 0x508   : > { %7888 = vrot.lane.b32.xlu1 %v7887_v39, %s8896_s26  ;;  %v2895_v59 = vpop.permute.xlu0 %2894 }
 0x509   : > { %2969 = vst.msk [vmem:[#allocation2 + $0x121] sm:$0xff] %vm2946_vm9, %v2895_v59 }
 0x50a   : > { %v2897_v2 = vpop.permute.xlu1 %2896  ;;  %7903 = vrot.lane.b32.xlu0 %v7887_v39, %s8890_s18 }
 0x50b   : > { %2970 = vst.msk [vmem:[#allocation2 + $0x129] sm:$0xff] %vm2946_vm9, %v2897_v2 }
 0x50c   : > { %7893 = vrot.lane.b32.xlu1 %v7892_v27, %s8886_s19 }
 0x50e   : > { %7908 = vrot.lane.b32.xlu0 %v7892_v27, %s8894_s17 }
 0x510   : > { %7898 = vrot.lane.b32.xlu1 %v7897_v49, %s8897_s0  ;;  %v2899_v8 = vpop.permute.xlu0 %2898 }
 0x511   : > { %2971 = vst.msk [vmem:[#allocation2 + $0x139] sm:$0xff] %vm2946_vm9, %v2899_v8  ;;  %v3153_v8 = vld [vmem:[#allocation2 + $0xc2] sm:$0xff] }
 0x512   : > { %v2901_v12 = vpop.permute.xlu1 %2900  ;;  %7913 = vrot.lane.b32.xlu0 %v7897_v49, %s8891_s29 }
 0x513   : > { %2972 = vst.msk [vmem:[#allocation2 + $0x141] sm:$0xff] %vm2946_vm9, %v2901_v12  ;;  %v3154_v12 = vld [vmem:[#allocation2 + $0xca] sm:$0xff] }
 0x514   : > { %7918 = vrot.lane.b32.xlu1 %v7892_v27, %s8893_s21  ;;  %v7967_v27 = vpack.i.bf16 %v3090_v18, %v3089_v4  ;;  %v7977_v48 = vpack.i.bf16 %v3154_v12, %v3153_v8  ;;  %v8007_v18 = vpack.i.bf16 %v3186_v44, %v3185_v43  ;;  %v7691_v43 = vunpack.i.h.bf16 %v10364_v25 }
 0x516   : > { %7923 = vrot.lane.b32.xlu0 %v7897_v49, %s8885_s2  ;;  %v7972_v49 = vpack.i.bf16 %v3122_v23, %v3121_v16  ;;  %v3217_v23 = vld [vmem:[#allocation2 + $0xd9] sm:$0xff]  ;;  %v7686_v16 = vunpack.i.h.bf16 %v10355_v54 }
 0x518   : > { %7928 = vrot.lane.b32.xlu1 %v7927_v63, %s8890_s18 }
 0x51a   : > { %7938 = vrot.lane.b32.xlu0 %v7937_v47, %s8891_s29 }
 0x51c   : > { %7933 = vrot.lane.b32.xlu1 %v7932_v9, %s8894_s17  ;;  %v2903_v13 = vpop.permute.xlu0 %2902 }
 0x51d   : > { %2973 = vst.msk [vmem:[#allocation2 + $0x151] sm:$0xff] %vm2946_vm9, %v2903_v13  ;;  %v3250_v13 = vld [vmem:[#allocation2 + $0xe2] sm:$0xff] }
 0x51e   : > { %v2905_v39 = vpop.permute.xlu1 %2904  ;;  %7953 = vrot.lane.b32.xlu0 %v7927_v63, %s8896_s26 }
 0x51f   : > { %2974 = vst.msk [vmem:[#allocation2 + $0x159] sm:$0xff] %vm2946_vm9, %v2905_v39 }
 0x520   : > { %7943 = vrot.lane.b32.xlu1 %v7932_v9, %s8893_s21 }
 0x522   : > { %7958 = vrot.lane.b32.xlu0 %v7932_v9, %s8886_s19  ;;  %v3249_v9 = vld [vmem:[#allocation2 + $0xda] sm:$0xff] }
 0x524   : > { %7948 = vrot.lane.b32.xlu1 %v7937_v47, %s8885_s2  ;;  %v2907_v59 = vpop.permute.xlu0 %2906 }
 0x525   : > { %2975 = vst.msk [vmem:[#allocation2 + $0x169] sm:$0xff] %vm2946_vm9, %v2907_v59  ;;  %v3218_v59 = vld [vmem:[#allocation2 + $0xe1] sm:$0xff] }
 0x526   : > { %v2909_v2 = vpop.permute.xlu1 %2908  ;;  %7963 = vrot.lane.b32.xlu0 %v7937_v47, %s8897_s0  ;;  %v8012_v12 = vpack.i.bf16 %v3218_v59, %v3217_v23 }
 0x527   : > { %2976 = vst.msk [vmem:[#allocation2 + $0x171] sm:$0xff] %vm2946_vm9, %v2909_v2  ;;  %v8017_v2 = vpack.i.bf16 %v3250_v13, %v3249_v9 }
 0x528   : > { %7968 = vrot.lane.b32.xlu1 %v7967_v27, %s8896_s26 }
 0x52a   : > { %7983 = vrot.lane.b32.xlu0 %v7967_v27, %s8890_s18  ;;  %v7685_v27 = vunpack.i.l.bf16 %v10355_v54 }
 0x52c   : > { %7973 = vrot.lane.b32.xlu1 %v7972_v49, %s8886_s19  ;;  %v2911_v5 = vpop.permute.xlu0 %2910 }
 0x52d   : > { %2977 = vst.msk [vmem:[#allocation2 + $0x181] sm:$0xff] %vm2946_vm9, %v2911_v5  ;;  %v2980_v5 = vld [vmem:[#allocation2 + $0x8] sm:$0xff] }
 0x52e   : > { %v2913_v38 = vpop.permute.xlu1 %2912  ;;  %7988 = vrot.lane.b32.xlu0 %v7972_v49, %s8894_s17  ;;  %v4292_v9 = vsel %vm2946_vm9, %v2980_v5, %v7686_v16 }
 0x52f   : > { %2978 = vst.msk [vmem:[#allocation2 + $0x189] sm:$0xff] %vm2946_vm9, %v2913_v38  ;;  %v7690_v38 = vunpack.i.l.bf16 %v10364_v25  ;;  %v4324_v25 = vsel %vm660_vm1, %v4292_v9, %v7691_v43 }
 0x530   : > { %7978 = vrot.lane.b32.xlu1 %v7977_v48, %s8897_s0  ;;  %v7714_v20 = vpop.permute.xlu0 %7713 }
 0x531   : > { %v7716_v13 = vunpack.i.h.bf16 %v7714_v20  ;;  %v7715_v54 = vunpack.i.l.bf16 %v7714_v20 }
 0x532   : > { %v10538_v63 = vpop.permute.xlu1 %7703  ;;  %7993 = vrot.lane.b32.xlu0 %v7977_v48, %s8891_s29 }
 0x533   : > { %v4357_v20 = vsel %vm4355_vm11, %v4324_v25, %v7716_v13  ;;  %v3093_v13 = vld [vmem:[#allocation2 + $0xf0] sm:$0xff]  ;;  %v7705_v25 = vunpack.i.l.bf16 %v10538_v63 }
 0x534   : > { %7998 = vrot.lane.b32.xlu1 %v7972_v49, %s8893_s21  ;;  %v7719_v47 = vpop.permute.xlu0 %7718  ;;  %v2979_v49 = vld [vmem:[#allocation2] sm:$0xff] }
 0x535   : > { %v4291_v44 = vsel %vm2946_vm9, %v2979_v49, %v7685_v27  ;;  %v7721_v59 = vunpack.i.h.bf16 %v7719_v47  ;;  %v7720_v23 = vunpack.i.l.bf16 %v7719_v47 }
 0x536   : > { %v10542_v39 = vpop.permute.xlu1 %7708  ;;  %8003 = vrot.lane.b32.xlu0 %v7977_v48, %s8885_s2  ;;  %v4323_v29 = vsel %vm660_vm1, %v4291_v44, %v7690_v38  ;;  %v3094_v38 = vld [vmem:[#allocation2 + $0xf8] sm:$0xff] }
 0x537   : > { %v4356_v5 = vsel %vm4355_vm11, %v4323_v29, %v7715_v54 }
 0x538   : > { %8008 = vrot.lane.b32.xlu1 %v8007_v18, %s8890_s18  ;;  %v7724_v4 = vpop.permute.xlu0 %7723  ;;  %v4388_v47 = vsel %vm777_vm0, %v4356_v5, %v7720_v23  ;;  %v3126_v5 = vld [vmem:[#allocation2 + $0xf9] sm:$0xff] }
 0x539   : > { %v7726_v28 = vunpack.i.h.bf16 %v7724_v4  ;;  %v7725_v3 = vunpack.i.l.bf16 %v7724_v4  ;;  %v4389_v4 = vsel %vm777_vm0, %v4357_v20, %v7721_v59  ;;  %v8047_v59 = vpack.i.bf16 %v3094_v38, %v3093_v13  ;;  %v3125_v38 = vld [vmem:[#allocation2 + $0xf1] sm:$0xff] }
 0x53a   : > { %v10548_v8 = vpop.permute.xlu1 %7728  ;;  %8018 = vrot.lane.b32.xlu0 %v8017_v2, %s8891_s29 }
 0x53b   : > { %v4421_v44 = vsel %vm4420_vm12, %v4388_v47, %v7725_v3  ;;  %v4422_v43 = vsel %vm4420_vm12, %v4389_v4, %v7726_v28  ;;  %v7706_v28 = vunpack.i.h.bf16 %v10538_v63  ;;  %v7710_v47 = vunpack.i.l.bf16 %v10542_v39 }
 0x53c   : > { %8013 = vrot.lane.b32.xlu1 %v8012_v12, %s8894_s17  ;;  %v7744_v48 = vpop.permute.xlu0 %7743  ;;  %v7730_v4 = vunpack.i.l.bf16 %v10548_v8 }
 0x53d   : > { %v7746_v16 = vunpack.i.h.bf16 %v7744_v48  ;;  %v7745_v49 = vunpack.i.l.bf16 %v7744_v48 }
 0x53e   : > { %v10556_v1 = vpop.permute.xlu1 %7733  ;;  %8033 = vrot.lane.b32.xlu0 %v8007_v18, %s8896_s26 }
 0x53f   : > { %v4453_v54 = vsel %vm2301_vm4, %v4421_v44, %v7745_v49  ;;  %v7736_v63 = vunpack.i.h.bf16 %v10556_v1  ;;  %v7735_v44 = vunpack.i.l.bf16 %v10556_v1 }
 0x540   : > { %8023 = vrot.lane.b32.xlu1 %v8012_v12, %s8893_s21  ;;  %v7749_v27 = vpop.permute.xlu0 %7748 }
 0x541   : > { %v7751_v18 = vunpack.i.h.bf16 %v7749_v27  ;;  %v7750_v57 = vunpack.i.l.bf16 %v7749_v27 }
 0x542   : > { %v7739_v42 = vpop.permute.xlu1 %7738  ;;  %8038 = vrot.lane.b32.xlu0 %v8012_v12, %s8886_s19  ;;  %v4454_v12 = vsel %vm2301_vm4, %v4422_v43, %v7746_v16  ;;  %v7711_v16 = vunpack.i.h.bf16 %v10542_v39  ;;  %v8052_v39 = vpack.i.bf16 %v3126_v5, %v3125_v38 }
 0x543   : > { %v4486_v23 = vsel %vm4485_vm13, %v4453_v54, %v7750_v57  ;;  %v4487_v3 = vsel %vm4485_vm13, %v4454_v12, %v7751_v18  ;;  %v7731_v18 = vunpack.i.h.bf16 %v10548_v8  ;;  %v7740_v13 = vunpack.i.l.bf16 %v7739_v42  ;;  %v3157_v8 = vld [vmem:[#allocation2 + $0xf2] sm:$0xff]  ;;  %v3158_v54 = vld [vmem:[#allocation2 + $0xfa] sm:$0xff] }
 0x544   : > { %8028 = vrot.lane.b32.xlu1 %v8017_v2, %s8885_s2  ;;  %v7754_v48 = vpop.permute.xlu0 %7753 }
 0x545   : > { %v7756_v9 = vunpack.i.h.bf16 %v7754_v48  ;;  %v7755_v29 = vunpack.i.l.bf16 %v7754_v48  ;;  %v4293_v48 = vsel %vm2946_vm9, %v10427_v24, %v7705_v25 }
 0x546   : > { %v10572_v27 = vpop.permute.xlu1 %7758  ;;  %8043 = vrot.lane.b32.xlu0 %v8017_v2, %s8897_s0  ;;  %v4325_v12 = vsel %vm660_vm1, %v4293_v48, %v7710_v47 }
 0x547   : > { %v4518_v20 = vsel %vm2334_vm5, %v4486_v23, %v7755_v29  ;;  %v4519_v49 = vsel %vm2334_vm5, %v4487_v3, %v7756_v9  ;;  %v4294_v9 = vsel %vm2946_vm9, %v10424_v58, %v7706_v28  ;;  %v7741_v29 = vunpack.i.h.bf16 %v7739_v42 }
 0x548   : > { %8048 = vrot.lane.b32.xlu1 %v8047_v59, %s8896_s26  ;;  %v10584_v2 = vpop.permute.xlu0 %7763  ;;  %v4550_v57 = vpack.c.bf16 %v4519_v49, %v4518_v20  ;;  %v4326_v1 = vsel %vm660_vm1, %v4294_v9, %v7711_v16  ;;  %v4358_v24 = vsel %vm4355_vm11, %v4325_v12, %v7730_v4  ;;  %v8057_v28 = vpack.i.bf16 %v3158_v54, %v3157_v8  ;;  %v3189_v12 = vld [vmem:[#allocation2 + $0x108] sm:$0xff] }
 0x549   : > { %v4359_v20 = vsel %vm4355_vm11, %v4326_v1, %v7731_v18  ;;  %v4390_v25 = vsel %vm777_vm0, %v4358_v24, %v7735_v44  ;;  %v3253_v1 = vld [vmem:[#allocation2 + $0x10a] sm:$0xff] }
 0x54a   : > { %v7769_v43 = vpop.permute.xlu1 %7768  ;;  %8063 = vrot.lane.b32.xlu0 %v8047_v59, %s8890_s18  ;;  %6689 = vmatprep.mubr.msk.bf16.mxu0 %vm4609_vm14, %v4550_v57  ;;  %v4391_v58 = vsel %vm777_vm0, %v4359_v20, %v7736_v63  ;;  %v4423_v49 = vsel %vm4420_vm12, %v4390_v25, %v7740_v13  ;;  %v3190_v13 = vld [vmem:[#allocation2 + $0x110] sm:$0xff] }
 0x54b   : > { %v7771_v23 = vunpack.i.h.bf16 %v7769_v43  ;;  %v7770_v3 = vunpack.i.l.bf16 %v7769_v43  ;;  %v4424_v5 = vsel %vm4420_vm12, %v4391_v58, %v7741_v29  ;;  %v3222_v20 = vld [vmem:[#allocation2 + $0x111] sm:$0xff]  ;;  %v3221_v58 = vld [vmem:[#allocation2 + $0x109] sm:$0xff] }
 0x54c   : > { %8053 = vrot.lane.b32.xlu1 %v8052_v39, %s8886_s19  ;;  %v7779_v59 = vpop.permute.xlu0 %7778 }
 0x54d   : > { %v4456_v57 = vsel %vm2301_vm4, %v4424_v5, %v7771_v23  ;;  %v4455_v18 = vsel %vm2301_vm4, %v4423_v49, %v7770_v3  ;;  %v7781_v38 = vunpack.i.h.bf16 %v7779_v59  ;;  %v7780_v4 = vunpack.i.l.bf16 %v7779_v59  ;;  %v3254_v23 = vld [vmem:[#allocation2 + $0x112] sm:$0xff] }
 0x54e   : > { %v7774_v42 = vpop.permute.xlu1 %7773  ;;  %8068 = vrot.lane.b32.xlu0 %v8052_v39, %s8894_s17  ;;  %v8087_v59 = vpack.i.bf16 %v3190_v13, %v3189_v12  ;;  %v8097_v25 = vpack.i.bf16 %v3254_v23, %v3253_v1  ;;  %v8092_v5 = vpack.i.bf16 %v3222_v20, %v3221_v58 }
 0x54f   : > { %v7776_v16 = vunpack.i.h.bf16 %v7774_v42  ;;  %v7775_v47 = vunpack.i.l.bf16 %v7774_v42  ;;  %v7760_v42 = vunpack.i.l.bf16 %v10572_v27 }
 0x550   : > { %8058 = vrot.lane.b32.xlu1 %v8057_v28, %s8897_s0  ;;  %v7794_v44 = vpop.permute.xlu0 %7793 }
 0x551   : > { %v4488_v63 = vsel %vm4485_vm13, %v4455_v18, %v7775_v47  ;;  %v4489_v43 = vsel %vm4485_vm13, %v4456_v57, %v7776_v16  ;;  %v7765_v47 = vunpack.i.l.bf16 %v10584_v2  ;;  %v4295_v57 = vsel %vm2946_vm9, %v10442_v46, %v7760_v42 }
 0x552   : > { %v10611_v48 = vpop.permute.xlu1 %7783  ;;  %8073 = vrot.lane.b32.xlu0 %v8057_v28, %s8891_s29  ;;  %v4520_v9 = vsel %vm2334_vm5, %v4488_v63, %v7780_v4  ;;  %v4521_v29 = vsel %vm2334_vm5, %v4489_v43, %v7781_v38  ;;  %v7796_v38 = vunpack.i.h.bf16 %v7794_v44 }
 0x553   : > { %v4551_v54 = vpack.c.bf16 %v4521_v29, %v4520_v9  ;;  %v4327_v46 = vsel %vm660_vm1, %v4295_v57, %v7765_v47 }
 0x554   : > { %8078 = vrot.lane.b32.xlu1 %v8052_v39, %s8893_s21  ;;  %v7799_v8 = vpop.permute.xlu0 %7798  ;;  %v7761_v39 = vunpack.i.h.bf16 %v10572_v27  ;;  %v7795_v27 = vunpack.i.l.bf16 %v7794_v44 }
 0x555   : > { %6690 = vmatmul.mubr.msk.bf16.vlgmr.msra.gmra.mrb[0].mxu0 %vm4609_vm14, %v4551_v54  ;;  %v7801_v63 = vunpack.i.h.bf16 %v7799_v8  ;;  %v7800_v43 = vunpack.i.l.bf16 %v7799_v8 }
 0x556   : > { %v10618_v3 = vpop.permute.xlu1 %7788  ;;  %8083 = vrot.lane.b32.xlu0 %v8057_v28, %s8885_s2  ;;  %v7766_v28 = vunpack.i.h.bf16 %v10584_v2  ;;  %v4296_v18 = vsel %vm2946_vm9, %v10439_v21, %v7761_v39  ;;  %v4360_v21 = vsel %vm4355_vm11, %v4327_v46, %v7795_v27 }
 0x557   : > { %v4392_v8 = vsel %vm777_vm0, %v4360_v21, %v7800_v43  ;;  %v7786_v43 = vunpack.i.h.bf16 %v10611_v48  ;;  %v7791_v46 = vunpack.i.h.bf16 %v10618_v3 }
 0x558   : > { %8088 = vrot.lane.b32.xlu1 %v8087_v59, %s8890_s18  ;;  %v7804_v24 = vpop.permute.xlu0 %7803  ;;  %v4328_v2 = vsel %vm660_vm1, %v4296_v18, %v7766_v28  ;;  %v3097_v18 = vld [vmem:[#allocation2 + $0x120] sm:$0xff] }
 0x559   : > { %v7806_v9 = vunpack.i.h.bf16 %v7804_v24  ;;  %v7805_v29 = vunpack.i.l.bf16 %v7804_v24  ;;  %v4361_v44 = vsel %vm4355_vm11, %v4328_v2, %v7796_v38  ;;  %v3098_v24 = vld [vmem:[#allocation2 + $0x128] sm:$0xff] }
 0x55a   : > { %v10624_v49 = vpop.permute.xlu1 %7808  ;;  %8098 = vrot.lane.b32.xlu0 %v8097_v25, %s8891_s29  ;;  %v4393_v20 = vsel %vm777_vm0, %v4361_v44, %v7801_v63  ;;  %v8127_v63 = vpack.i.bf16 %v3098_v24, %v3097_v18  ;;  %v3130_v2 = vld [vmem:[#allocation2 + $0x129] sm:$0xff]  ;;  %v4298_v24 = vsel %vm2946_vm9, %v10457_v22, %v7786_v43 }
 0x55b   : > { %v4425_v58 = vsel %vm4420_vm12, %v4392_v8, %v7805_v29  ;;  %v4426_v39 = vsel %vm4420_vm12, %v4393_v20, %v7806_v9  ;;  %v7785_v9 = vunpack.i.l.bf16 %v10611_v48  ;;  %v7810_v44 = vunpack.i.l.bf16 %v10624_v49 }
 0x55c   : > { %8093 = vrot.lane.b32.xlu1 %v8092_v5, %s8894_s17  ;;  %v7824_v16 = vpop.permute.xlu0 %7823 }
 0x55d   : > { %v7826_v54 = vunpack.i.h.bf16 %v7824_v16  ;;  %v7825_v12 = vunpack.i.l.bf16 %v7824_v16  ;;  %v4297_v20 = vsel %vm2946_vm9, %v10460_v6, %v7785_v9 }
 0x55e   : > { %v10634_v4 = vpop.permute.xlu1 %7813  ;;  %8113 = vrot.lane.b32.xlu0 %v8087_v59, %s8896_s26 }
 0x55f   : > { %v4457_v16 = vsel %vm2301_vm4, %v4425_v58, %v7825_v12  ;;  %v4458_v28 = vsel %vm2301_vm4, %v4426_v39, %v7826_v54  ;;  %v7790_v54 = vunpack.i.l.bf16 %v10618_v3  ;;  %v7816_v48 = vunpack.i.h.bf16 %v10634_v4 }
 0x560   : > { %8103 = vrot.lane.b32.xlu1 %v8092_v5, %s8893_s21  ;;  %v7829_v13 = vpop.permute.xlu0 %7828 }
 0x561   : > { %v7831_v1 = vunpack.i.h.bf16 %v7829_v13  ;;  %v7830_v23 = vunpack.i.l.bf16 %v7829_v13 }
 0x562   : > { %v7819_v59 = vpop.permute.xlu1 %7818  ;;  %8118 = vrot.lane.b32.xlu0 %v8092_v5, %s8886_s19 }
 0x563   : > { %v4490_v5 = vsel %vm4485_vm13, %v4457_v16, %v7830_v23  ;;  %v4491_v38 = vsel %vm4485_vm13, %v4458_v28, %v7831_v1  ;;  %v3129_v1 = vld [vmem:[#allocation2 + $0x121] sm:$0xff]  ;;  %v7815_v23 = vunpack.i.l.bf16 %v10634_v4  ;;  %v7821_v58 = vunpack.i.h.bf16 %v7819_v59 }
 0x564   : > { %8108 = vrot.lane.b32.xlu1 %v8097_v25, %s8885_s2  ;;  %v7834_v42 = vpop.permute.xlu0 %7833  ;;  %v8132_v3 = vpack.i.bf16 %v3130_v2, %v3129_v1  ;;  %v7820_v39 = vunpack.i.l.bf16 %v7819_v59  ;;  %v4329_v16 = vsel %vm660_vm1, %v4297_v20, %v7790_v54  ;;  %v4330_v4 = vsel %vm660_vm1, %v4298_v24, %v7791_v46 }
 0x565   : > { %v7836_v47 = vunpack.i.h.bf16 %v7834_v42  ;;  %v7835_v57 = vunpack.i.l.bf16 %v7834_v42  ;;  %v3162_v42 = vld [vmem:[#allocation2 + $0x12a] sm:$0xff]  ;;  %v4362_v6 = vsel %vm4355_vm11, %v4329_v16, %v7810_v44 }
 0x566   : > { %v10652_v27 = vpop.permute.xlu1 %7838  ;;  %8123 = vrot.lane.b32.xlu0 %v8097_v25, %s8897_s0  ;;  %v7811_v25 = vunpack.i.h.bf16 %v10624_v49  ;;  %v3161_v49 = vld [vmem:[#allocation2 + $0x122] sm:$0xff] }
 0x567   : > { %v4522_v29 = vsel %vm2334_vm5, %v4490_v5, %v7835_v57  ;;  %v4523_v13 = vsel %vm2334_vm5, %v4491_v38, %v7836_v47  ;;  %v4394_v5 = vsel %vm777_vm0, %v4362_v6, %v7815_v23  ;;  %v8137_v38 = vpack.i.bf16 %v3162_v42, %v3161_v49  ;;  %v3258_v49 = vld [vmem:[#allocation2 + $0x142] sm:$0xff] }
 0x568   : > { %8128 = vrot.lane.b32.xlu1 %v8127_v63, %s8896_s26  ;;  %v10662_v12 = vpop.permute.xlu0 %7843  ;;  %v4552_v21 = vpack.c.bf16 %v4523_v13, %v4522_v29  ;;  %v4363_v18 = vsel %vm4355_vm11, %v4330_v4, %v7811_v25  ;;  %v3226_v4 = vld [vmem:[#allocation2 + $0x141] sm:$0xff] }
 0x569   : > { %v4395_v22 = vsel %vm777_vm0, %v4363_v18, %v7816_v48  ;;  %v7840_v18 = vunpack.i.l.bf16 %v10652_v27 }
 0x56a   : > { %v7849_v8 = vpop.permute.xlu1 %7848  ;;  %8143 = vrot.lane.b32.xlu0 %v8127_v63, %s8890_s18  ;;  %6693 = vmatprep.mubr.msk.bf16.mxu0 %vm4609_vm14, %v4552_v21  ;;  %v4427_v63 = vsel %vm4420_vm12, %v4394_v5, %v7820_v39  ;;  %v4428_v43 = vsel %vm4420_vm12, %v4395_v22, %v7821_v58  ;;  %v10697_v58 = vld [vmem:[#allocation2 + $0x138] sm:$0xff] }
 0x56b   : > { %v7851_v28 = vunpack.i.h.bf16 %v7849_v8  ;;  %v7850_v47 = vunpack.i.l.bf16 %v7849_v8  ;;  %v10694_v8 = vld [vmem:[#allocation2 + $0x140] sm:$0xff] }
 0x56c   : > { %8133 = vrot.lane.b32.xlu1 %v8132_v3, %s8886_s19  ;;  %v7859_v57 = vpop.permute.xlu0 %7858  ;;  %v3257_v39 = vld [vmem:[#allocation2 + $0x13a] sm:$0xff]  ;;  %v8167_v16 = vpack.i.bf16 %v10694_v8, %v10697_v58 }
 0x56d   : > { %v4460_v13 = vsel %vm2301_vm4, %v4428_v43, %v7851_v28  ;;  %v4459_v2 = vsel %vm2301_vm4, %v4427_v63, %v7850_v47  ;;  %v7861_v46 = vunpack.i.h.bf16 %v7859_v57  ;;  %v7860_v54 = vunpack.i.l.bf16 %v7859_v57  ;;  %v3225_v47 = vld [vmem:[#allocation2 + $0x139] sm:$0xff] }
 0x56e   : > { %v7854_v59 = vpop.permute.xlu1 %7853  ;;  %8148 = vrot.lane.b32.xlu0 %v8132_v3, %s8894_s17  ;;  %v7841_v57 = vunpack.i.h.bf16 %v10652_v27  ;;  %v8172_v5 = vpack.i.bf16 %v3226_v4, %v3225_v47  ;;  %v4299_v63 = vsel %vm2946_vm9, %v10476_v14, %v7840_v18 }
 0x56f   : > { %v7856_v9 = vunpack.i.h.bf16 %v7854_v59  ;;  %v7855_v29 = vunpack.i.l.bf16 %v7854_v59  ;;  %v7846_v59 = vunpack.i.h.bf16 %v10662_v12 }
 0x570   : > { %8138 = vrot.lane.b32.xlu1 %v8137_v38, %s8897_s0  ;;  %v7874_v21 = vpop.permute.xlu0 %7873  ;;  %v4300_v43 = vsel %vm2946_vm9, %v10473_v31, %v7841_v57 }
 0x571   : > { %v4492_v25 = vsel %vm4485_vm13, %v4459_v2, %v7855_v29  ;;  %v4493_v44 = vsel %vm4485_vm13, %v4460_v13, %v7856_v9  ;;  %v7876_v9 = vunpack.i.h.bf16 %v7874_v21  ;;  %v7875_v27 = vunpack.i.l.bf16 %v7874_v21 }
 0x572   : > { %v10689_v1 = vpop.permute.xlu1 %7863  ;;  %8153 = vrot.lane.b32.xlu0 %v8137_v38, %s8891_s29  ;;  %v4524_v48 = vsel %vm2334_vm5, %v4492_v25, %v7860_v54  ;;  %v4525_v23 = vsel %vm2334_vm5, %v4493_v44, %v7861_v46 }
 0x573   : > { %v4553_v24 = vpack.c.bf16 %v4525_v23, %v4524_v48 }
 0x574   : > { %8158 = vrot.lane.b32.xlu1 %v8132_v3, %s8893_s21  ;;  %v7879_v20 = vpop.permute.xlu0 %7878  ;;  %v8177_v3 = vpack.i.bf16 %v3258_v49, %v3257_v39 }
 0x575   : > { %6694 = vmatmul.mubr.msk.bf16.gmra.mrb[4].mxu0 %vm4609_vm14, %v4553_v24  ;;  %v7881_v13 = vunpack.i.h.bf16 %v7879_v20  ;;  %v7880_v2 = vunpack.i.l.bf16 %v7879_v20 }
 0x576   : > { %v10700_v42 = vpop.permute.xlu1 %7868  ;;  %8163 = vrot.lane.b32.xlu0 %v8137_v38, %s8885_s2  ;;  %v7845_v38 = vunpack.i.l.bf16 %v10662_v12  ;;  %v4332_v12 = vsel %vm660_vm1, %v4300_v43, %v7846_v59 }
 0x577   : > { %v4365_v21 = vsel %vm4355_vm11, %v4332_v12, %v7876_v9  ;;  %v7870_v12 = vunpack.i.l.bf16 %v10700_v42 }
 0x578   : > { %8168 = vrot.lane.b32.xlu1 %v8167_v16, %s8890_s18  ;;  %v7884_v28 = vpop.permute.xlu0 %7883  ;;  %v4331_v14 = vsel %vm660_vm1, %v4299_v63, %v7845_v38  ;;  %v4397_v49 = vsel %vm777_vm0, %v4365_v21, %v7881_v13  ;;  %v7865_v13 = vunpack.i.l.bf16 %v10689_v1 }
 0x579   : > { %v7886_v46 = vunpack.i.h.bf16 %v7884_v28  ;;  %v7885_v54 = vunpack.i.l.bf16 %v7884_v28  ;;  %v4364_v31 = vsel %vm4355_vm11, %v4331_v14, %v7875_v27  ;;  %v7866_v27 = vunpack.i.h.bf16 %v10689_v1 }
 0x57a   : > { %v10708_v6 = vpop.permute.xlu1 %7888  ;;  %8178 = vrot.lane.b32.xlu0 %v8177_v3, %s8891_s29  ;;  %v4396_v20 = vsel %vm777_vm0, %v4364_v31, %v7880_v2  ;;  %v3133_v31 = vld [vmem:[#allocation2 + $0x151] sm:$0xff] }
 0x57b   : > { %v4429_v4 = vsel %vm4420_vm12, %v4396_v20, %v7885_v54  ;;  %v4430_v28 = vsel %vm4420_vm12, %v4397_v49, %v7886_v46  ;;  %v3134_v54 = vld [vmem:[#allocation2 + $0x159] sm:$0xff]  ;;  %v4302_v20 = vsel %vm2946_vm9, %v10489_v35, %v7866_v27 }
 0x57c   : > { %8173 = vrot.lane.b32.xlu1 %v8172_v5, %s8894_s17  ;;  %v7904_v22 = vpop.permute.xlu0 %7903 }
 0x57d   : > { %v7906_v44 = vunpack.i.h.bf16 %v7904_v22  ;;  %v7905_v48 = vunpack.i.l.bf16 %v7904_v22 }
 0x57e   : > { %v10718_v29 = vpop.permute.xlu1 %7893  ;;  %8193 = vrot.lane.b32.xlu0 %v8167_v16, %s8896_s26  ;;  %v10729_v16 = vld [vmem:[#allocation2 + $0x158] sm:$0xff] }
 0x57f   : > { %v4461_v57 = vsel %vm2301_vm4, %v4429_v4, %v7905_v48  ;;  %v4462_v18 = vsel %vm2301_vm4, %v4430_v28, %v7906_v44  ;;  %v7891_v44 = vunpack.i.h.bf16 %v10708_v6  ;;  %v7890_v48 = vunpack.i.l.bf16 %v10708_v6  ;;  %v3165_v6 = vld [vmem:[#allocation2 + $0x152] sm:$0xff]  ;;  %v3166_v28 = vld [vmem:[#allocation2 + $0x15a] sm:$0xff] }
 0x580   : > { %8183 = vrot.lane.b32.xlu1 %v8172_v5, %s8893_s21  ;;  %v7909_v25 = vpop.permute.xlu0 %7908  ;;  %v7896_v1 = vunpack.i.h.bf16 %v10718_v29  ;;  %v7895_v21 = vunpack.i.l.bf16 %v10718_v29 }
 0x581   : > { %v7911_v23 = vunpack.i.h.bf16 %v7909_v25  ;;  %v7910_v24 = vunpack.i.l.bf16 %v7909_v25  ;;  %v7871_v25 = vunpack.i.h.bf16 %v10700_v42  ;;  %v8212_v42 = vpack.i.bf16 %v3134_v54, %v3133_v31 }
 0x582   : > { %v7899_v39 = vpop.permute.xlu1 %7898  ;;  %8198 = vrot.lane.b32.xlu0 %v8172_v5, %s8886_s19  ;;  %v10736_v5 = vld [vmem:[#allocation2 + $0x150] sm:$0xff] }
 0x583   : > { %v4494_v38 = vsel %vm4485_vm13, %v4461_v57, %v7910_v24  ;;  %v4495_v63 = vsel %vm4485_vm13, %v4462_v18, %v7911_v23  ;;  %v8207_v9 = vpack.i.bf16 %v10729_v16, %v10736_v5  ;;  %v4301_v24 = vsel %vm2946_vm9, %v10493_v30, %v7865_v13 }
 0x584   : > { %8188 = vrot.lane.b32.xlu1 %v8177_v3, %s8885_s2  ;;  %v7914_v47 = vpop.permute.xlu0 %7913  ;;  %v7901_v49 = vunpack.i.h.bf16 %v7899_v39  ;;  %v7900_v4 = vunpack.i.l.bf16 %v7899_v39  ;;  %v4334_v29 = vsel %vm660_vm1, %v4302_v20, %v7871_v25 }
 0x585   : > { %v7916_v22 = vunpack.i.h.bf16 %v7914_v47  ;;  %v7915_v59 = vunpack.i.l.bf16 %v7914_v47  ;;  %v4333_v47 = vsel %vm660_vm1, %v4301_v24, %v7870_v12  ;;  %v4888_v24 = vld [vmem:[#allocation17] sm:$0xf] }
 0x586   : > { %v10740_v43 = vpop.permute.xlu1 %7918  ;;  %8203 = vrot.lane.b32.xlu0 %v8177_v3, %s8897_s0  ;;  %v4366_v30 = vsel %vm4355_vm11, %v4333_v47, %v7890_v48  ;;  %6924 = vmatprep.subr.msk.bf16.mxu0 %vm4658_vm10, %v4888_v24 }
 0x587   : > { %v4526_v2 = vsel %vm2334_vm5, %v4494_v38, %v7915_v59  ;;  %v4527_v46 = vsel %vm2334_vm5, %v4495_v63, %v7916_v22  ;;  %v4367_v59 = vsel %vm4355_vm11, %v4334_v29, %v7891_v44  ;;  %v4398_v38 = vsel %vm777_vm0, %v4366_v30, %v7895_v21 }
 0x588   : > { %v4554_v14 = vpack.c.bf16 %v4527_v46, %v4526_v2  ;;  %8208 = vrot.lane.b32.xlu1 %v8207_v9, %s8896_s26  ;;  %v10752_v3 = vpop.permute.xlu0 %7923  ;;  %v4399_v35 = vsel %vm777_vm0, %v4367_v59, %v7896_v1  ;;  %v8217_v63 = vpack.i.bf16 %v3166_v28, %v3165_v6  ;;  %v3261_v6 = vld [vmem:[#allocation2 + $0x16a] sm:$0xff]  ;;  %v3262_v28 = vld [vmem:[#allocation2 + $0x172] sm:$0xff]  ;;  %v7921_v30 = vunpack.i.h.bf16 %v10740_v43 }
 0x589   : > { %v4432_v27 = vsel %vm4420_vm12, %v4399_v35, %v7901_v49  ;;  %v3229_v59 = vld [vmem:[#allocation2 + $0x169] sm:$0xff] }
 0x58a   : > { %v7929_v23 = vpop.permute.xlu1 %7928  ;;  %8223 = vrot.lane.b32.xlu0 %v8207_v9, %s8890_s18  ;;  %6697 = vmatprep.mubr.msk.bf16.mxu0 %vm4609_vm14, %v4554_v14  ;;  %v4431_v9 = vsel %vm4420_vm12, %v4398_v38, %v7900_v4  ;;  %v10788_v4 = vld [vmem:[#allocation2 + $0x168] sm:$0xff]  ;;  %v7920_v38 = vunpack.i.l.bf16 %v10740_v43 }
 0x58b   : > { %v7931_v57 = vunpack.i.h.bf16 %v7929_v23  ;;  %v7930_v18 = vunpack.i.l.bf16 %v7929_v23  ;;  %v10784_v23 = vld [vmem:[#allocation2 + $0x170] sm:$0xff] }
 0x58c   : > { %8213 = vrot.lane.b32.xlu1 %v8212_v42, %s8886_s19  ;;  %v7939_v22 = vpop.permute.xlu0 %7938  ;;  %v8247_v29 = vpack.i.bf16 %v10784_v23, %v10788_v4 }
 0x58d   : > { %v4464_v46 = vsel %vm2301_vm4, %v4432_v27, %v7931_v57  ;;  %v4463_v54 = vsel %vm2301_vm4, %v4431_v9, %v7930_v18  ;;  %v7941_v25 = vunpack.i.h.bf16 %v7939_v22  ;;  %v7940_v12 = vunpack.i.l.bf16 %v7939_v22  ;;  %v2991_v9 = vld [vmem:[#allocation2 + $0x90] sm:$0xff]  ;;  %v2992_v27 = vld [vmem:[#allocation2 + $0x98] sm:$0xff] }
 0x58e   : > { %v7934_v39 = vpop.permute.xlu1 %7933  ;;  %8228 = vrot.lane.b32.xlu0 %v8212_v42, %s8894_s17  ;;  %v4938_v57 = vsel %vm4658_vm10, %v4888_v24, 0  ;;  %v8257_v22 = vpack.i.bf16 %v3262_v28, %v3261_v6 }
 0x58f   : > { %v7936_v13 = vunpack.i.h.bf16 %v7934_v39  ;;  %v7935_v2 = vunpack.i.l.bf16 %v7934_v39  ;;  %6722 = vmatpush3.bf16.msra.mxu0 %v4938_v57 }
 0x590   : > { %8218 = vrot.lane.b32.xlu1 %v8217_v63, %s8897_s0  ;;  %v7954_v14 = vpop.permute.xlu0 %7953 }
 0x591   : > { %v4496_v44 = vsel %vm4485_vm13, %v4463_v54, %v7935_v2  ;;  %v4497_v48 = vsel %vm4485_vm13, %v4464_v46, %v7936_v13  ;;  %v7926_v13 = vunpack.i.h.bf16 %v10752_v3  ;;  %v7925_v2 = vunpack.i.l.bf16 %v10752_v3 }
 0x592   : > { %v10779_v31 = vpop.permute.xlu1 %7943  ;;  %8233 = vrot.lane.b32.xlu0 %v8217_v63, %s8891_s29  ;;  %v4528_v1 = vsel %vm2334_vm5, %v4496_v44, %v7940_v12  ;;  %v4529_v21 = vsel %vm2334_vm5, %v4497_v48, %v7941_v25  ;;  %v4303_v46 = vsel %vm2946_vm9, %v2991_v9, %v7920_v38  ;;  %v4304_v54 = vsel %vm2946_vm9, %v2992_v27, %v7921_v30  ;;  %v3106_v30 = vld [vmem:[#allocation2 + $0x188] sm:$0xff] }
 0x593   : > { %v4555_v49 = vpack.c.bf16 %v4529_v21, %v4528_v1  ;;  %v7956_v25 = vunpack.i.h.bf16 %v7954_v14  ;;  %v7955_v43 = vunpack.i.l.bf16 %v7954_v14  ;;  %v4335_v3 = vsel %vm660_vm1, %v4303_v46, %v7925_v2 }
 0x594   : > { %8238 = vrot.lane.b32.xlu1 %v8212_v42, %s8893_s21  ;;  %v7959_v20 = vpop.permute.xlu0 %7958  ;;  %v3230_v42 = vld [vmem:[#allocation2 + $0x171] sm:$0xff] }
 0x595   : > { %6698 = vmatmul.mubr.msk.bf16.gmra.mrb[8].mxu0 %vm4609_vm14, %v4555_v49  ;;  %v8252_v39 = vpack.i.bf16 %v3230_v42, %v3229_v59  ;;  %v7961_v44 = vunpack.i.h.bf16 %v7959_v20  ;;  %v7960_v48 = vunpack.i.l.bf16 %v7959_v20  ;;  %v4336_v49 = vsel %vm660_vm1, %v4304_v54, %v7926_v13  ;;  %v3105_v54 = vld [vmem:[#allocation2 + $0x180] sm:$0xff] }
 0x596   : > { %v10791_v47 = vpop.permute.xlu1 %7948  ;;  %8243 = vrot.lane.b32.xlu0 %v8217_v63, %s8885_s2  ;;  %v4368_v57 = vsel %vm4355_vm11, %v4335_v3, %v7955_v43  ;;  %v4369_v14 = vsel %vm4355_vm11, %v4336_v49, %v7956_v25  ;;  %v3138_v49 = vld [vmem:[#allocation2 + $0x189] sm:$0xff] }
 0x597   : > { %v4400_v20 = vsel %vm777_vm0, %v4368_v57, %v7960_v48  ;;  %v7946_v48 = vunpack.i.h.bf16 %v10779_v31  ;;  %v7951_v3 = vunpack.i.h.bf16 %v10791_v47 }
 0x598   : > { %8248 = vrot.lane.b32.xlu1 %v8247_v29, %s8890_s18  ;;  %v7964_v18 = vpop.permute.xlu0 %7963 }
 0x599   : > { %v7966_v1 = vunpack.i.h.bf16 %v7964_v18  ;;  %v7965_v21 = vunpack.i.l.bf16 %v7964_v18  ;;  %v4401_v18 = vsel %vm777_vm0, %v4369_v14, %v7961_v44  ;;  %v8287_v44 = vpack.i.bf16 %v3106_v30, %v3105_v54 }
 0x59a   : > { %v10800_v35 = vpop.permute.xlu1 %7968  ;;  %8258 = vrot.lane.b32.xlu0 %v8257_v22, %s8891_s29 }
 0x59b   : > { %v4433_v38 = vsel %vm4420_vm12, %v4400_v20, %v7965_v21  ;;  %v4434_v9 = vsel %vm4420_vm12, %v4401_v18, %v7966_v1  ;;  %v7945_v1 = vunpack.i.l.bf16 %v10779_v31  ;;  %v7970_v14 = vunpack.i.l.bf16 %v10800_v35  ;;  %v2993_v31 = vld [vmem:[#allocation2 + $0xa8] sm:$0xff] }
 0x59c   : > { %8253 = vrot.lane.b32.xlu1 %v8252_v39, %s8894_s17  ;;  %v7984_v63 = vpop.permute.xlu0 %7983 }
 0x59d   : > { %v7986_v6 = vunpack.i.h.bf16 %v7984_v63  ;;  %v7985_v28 = vunpack.i.l.bf16 %v7984_v63 }
 0x59e   : > { %v10808_v12 = vpop.permute.xlu1 %7973  ;;  %8273 = vrot.lane.b32.xlu0 %v8247_v29, %s8896_s26 }
 0x59f   : > { %v4465_v27 = vsel %vm2301_vm4, %v4433_v38, %v7985_v28  ;;  %v4466_v13 = vsel %vm2301_vm4, %v4434_v9, %v7986_v6  ;;  %v7950_v6 = vunpack.i.l.bf16 %v10791_v47  ;;  %v7976_v20 = vunpack.i.h.bf16 %v10808_v12  ;;  %v3265_v38 = vld [vmem:[#allocation2 + $0x19a] sm:$0xff] }
 0x5a0   : > { %8263 = vrot.lane.b32.xlu1 %v8252_v39, %s8893_s21  ;;  %v7989_v24 = vpop.permute.xlu0 %7988  ;;  %v7975_v18 = vunpack.i.l.bf16 %v10808_v12  ;;  %v4305_v9 = vsel %vm2946_vm9, %v2993_v31, %v7945_v1 }
 0x5a1   : > { %v7991_v42 = vunpack.i.h.bf16 %v7989_v24  ;;  %v7990_v59 = vunpack.i.l.bf16 %v7989_v24  ;;  %v4337_v12 = vsel %vm660_vm1, %v4305_v9, %v7950_v6 }
 0x5a2   : > { %v10816_v29 = vpop.permute.xlu1 %7978  ;;  %8278 = vrot.lane.b32.xlu0 %v8252_v39, %s8886_s19 }
 0x5a3   : > { %v4498_v39 = vsel %vm4485_vm13, %v4465_v27, %v7990_v59  ;;  %v4499_v25 = vsel %vm4485_vm13, %v4466_v13, %v7991_v42  ;;  %v3137_v42 = vld [vmem:[#allocation2 + $0x181] sm:$0xff]  ;;  %v2994_v59 = vld [vmem:[#allocation2 + $0xb0] sm:$0xff]  ;;  %v7980_v27 = vunpack.i.l.bf16 %v10816_v29 }
 0x5a4   : > { %8268 = vrot.lane.b32.xlu1 %v8257_v22, %s8885_s2  ;;  %v7994_v63 = vpop.permute.xlu0 %7993  ;;  %v8292_v47 = vpack.i.bf16 %v3138_v49, %v3137_v42  ;;  %v3169_v13 = vld [vmem:[#allocation2 + $0x182] sm:$0xff] }
 0x5a5   : > { %v7996_v2 = vunpack.i.h.bf16 %v7994_v63  ;;  %v7995_v46 = vunpack.i.l.bf16 %v7994_v63  ;;  %v4306_v63 = vsel %vm2946_vm9, %v2994_v59, %v7946_v48  ;;  %v4370_v48 = vsel %vm4355_vm11, %v4337_v12, %v7970_v14 }
 0x5a6   : > { %v10828_v43 = vpop.permute.xlu1 %7998  ;;  %8283 = vrot.lane.b32.xlu0 %v8257_v22, %s8897_s0  ;;  %v7971_v22 = vunpack.i.h.bf16 %v10800_v35  ;;  %v7981_v35 = vunpack.i.h.bf16 %v10816_v29  ;;  %v4338_v54 = vsel %vm660_vm1, %v4306_v63, %v7951_v3 }
 0x5a7   : > { %v4530_v21 = vsel %vm2334_vm5, %v4498_v39, %v7995_v46  ;;  %v4531_v24 = vsel %vm2334_vm5, %v4499_v25, %v7996_v2  ;;  %v3170_v2 = vld [vmem:[#allocation2 + $0x18a] sm:$0xff]  ;;  %v3266_v46 = vld [vmem:[#allocation2 + $0x1a2] sm:$0xff]  ;;  %v8000_v12 = vunpack.i.l.bf16 %v10828_v43 }
 0x5a8   : > { %v4556_v28 = vpack.c.bf16 %v4531_v24, %v4530_v21  ;;  %8288 = vrot.lane.b32.xlu1 %v8287_v44, %s8896_s26  ;;  %v10838_v57 = vpop.permute.xlu0 %8003  ;;  %v4371_v1 = vsel %vm4355_vm11, %v4338_v54, %v7971_v22  ;;  %v4402_v21 = vsel %vm777_vm0, %v4370_v48, %v7975_v18  ;;  %v8297_v49 = vpack.i.bf16 %v3170_v2, %v3169_v13  ;;  %s8898_s26 = smov [#allocation26]  }
 0x5a9   : > { %v4403_v29 = vsel %vm777_vm0, %v4371_v1, %v7976_v20  ;;  %v8317_v6 = vpack.i.bf16 %v3266_v46, %v3265_v38  ;;  %v4435_v3 = vsel %vm4420_vm12, %v4402_v21, %v7980_v27  ;;  %v8001_v46 = vunpack.i.h.bf16 %v10828_v43 }
 0x5aa   : > { %v8009_v30 = vpop.permute.xlu1 %8008  ;;  %8303 = vrot.lane.b32.xlu0 %v8287_v44, %s8890_s18  ;;  %6701 = vmatprep.mubr.msk.bf16.mxu0 %vm4609_vm14, %v4556_v28  ;;  %v4436_v28 = vsel %vm4420_vm12, %v4403_v29, %v7981_v35  ;;  %s11737_s18 = sld [smem:[#allocation52_spill]] }
 0x5ab   : > { %v8011_v39 = vunpack.i.h.bf16 %v8009_v30  ;;  %v8010_v25 = vunpack.i.l.bf16 %v8009_v30 }
 0x5ac   : > { %8293 = vrot.lane.b32.xlu1 %v8292_v47, %s8886_s19  ;;  %v8019_v44 = vpop.permute.xlu0 %8018 }
 0x5ad   : > { %v4468_v59 = vsel %vm2301_vm4, %v4436_v28, %v8011_v39  ;;  %v4467_v22 = vsel %vm2301_vm4, %v4435_v3, %v8010_v25  ;;  %v8021_v14 = vunpack.i.h.bf16 %v8019_v44  ;;  %v8020_v30 = vunpack.i.l.bf16 %v8019_v44  ;;  %v2995_v25 = vld [vmem:[#allocation2 + $0xc0] sm:$0xff]  ;;  %v2996_v44 = vld [vmem:[#allocation2 + $0xc8] sm:$0xff] }
 0x5ae   : > { %v8014_v24 = vpop.permute.xlu1 %8013  ;;  %8308 = vrot.lane.b32.xlu0 %v8292_v47, %s8894_s17  ;;  %v4307_v1 = vsel %vm2946_vm9, %v2995_v25, %v8000_v12  ;;  %v4308_v48 = vsel %vm2946_vm9, %v2996_v44, %v8001_v46 }
 0x5af   : > { %v8016_v42 = vunpack.i.h.bf16 %v8014_v24  ;;  %v8015_v31 = vunpack.i.l.bf16 %v8014_v24 }
 0x5b0   : > { %8298 = vrot.lane.b32.xlu1 %v8297_v49, %s8897_s0  ;;  %v8034_v20 = vpop.permute.xlu0 %8033  ;;  %s8774_s0 = sshll.u32 %s8898_s26, 4  ;;  %s8775_s0 = int_to_ptr.vmem [resolvable:$false] %s8774_s0 }
 0x5b1   : > { %v4500_v18 = vsel %vm4485_vm13, %v4467_v22, %v8015_v31  ;;  %v4501_v47 = vsel %vm4485_vm13, %v4468_v59, %v8016_v42  ;;  %v8036_v43 = vunpack.i.h.bf16 %v8034_v20  ;;  %v8035_v21 = vunpack.i.l.bf16 %v8034_v20 }
 0x5b2   : > { %v10865_v38 = vpop.permute.xlu1 %8023  ;;  %8313 = vrot.lane.b32.xlu0 %v8297_v49, %s8891_s29  ;;  %v4532_v9 = vsel %vm2334_vm5, %v4500_v18, %v8020_v30  ;;  %v4533_v63 = vsel %vm2334_vm5, %v4501_v47, %v8021_v14 }
 0x5b3   : > { %v4557_v27 = vpack.c.bf16 %v4533_v63, %v4532_v9  ;;  %v8026_v12 = vunpack.i.h.bf16 %v10865_v38 }
 0x5b4   : > { %8318 = vrot.lane.b32.xlu1 %v8317_v6, %s8891_s29  ;;  %v8039_v35 = vpop.permute.xlu0 %8038 }
 0x5b5   : > { %6702 = vmatmul.mubr.msk.bf16.gmra.mrb[12].mxu0 %vm4609_vm14, %v4557_v27 }
 0x5b6   : > { %v10872_v13 = vpop.permute.xlu1 %8028  ;;  %5117 = vrot.lane.b32.xlu0 %v9511_v11, %s8889_s28  ;;  %v8006_v11 = vunpack.i.h.bf16 %v10838_v57 }
 0x5b7   : > { %v8031_v44 = vunpack.i.h.bf16 %v10872_v13 }
 0x5b8   : > { %5119 = vrot.lane.b32.xlu1 %v9507_v10, %s8889_s28  ;;  %v8044_v2 = vpop.permute.xlu0 %8043  ;;  %v8005_v10 = vunpack.i.l.bf16 %v10838_v57  ;;  %v4340_v57 = vsel %vm660_vm1, %v4308_v48, %v8006_v11  ;;  %v8030_v11 = vunpack.i.l.bf16 %v10872_v13 }
 0x5b9   : > { %v8046_v24 = vunpack.i.h.bf16 %v8044_v2  ;;  %v8045_v49 = vunpack.i.l.bf16 %v8044_v2  ;;  %v4373_v59 = vsel %vm4355_vm11, %v4340_v57, %v8036_v43  ;;  %v2997_v43 = vld [vmem:[#allocation2 + $0xd8] sm:$0xff] }
 0x5ba   : > { %v10880_v54 = vpop.permute.xlu1 %8048  ;;  %5121 = vrot.lane.b32.xlu0 %v9531_v36, %s8889_s28  ;;  %v8041_v36 = vunpack.i.h.bf16 %v8039_v35  ;;  %v4339_v3 = vsel %vm660_vm1, %v4307_v1, %v8005_v10 }
 0x5bb   : > { %v4372_v31 = vsel %vm4355_vm11, %v4339_v3, %v8035_v21  ;;  %v8050_v48 = vunpack.i.l.bf16 %v10880_v54 }
 0x5bc   : > { %5123 = vrot.lane.b32.xlu1 %v9527_v34, %s8889_s28  ;;  %v8064_v39 = vpop.permute.xlu0 %8063  ;;  %v8040_v34 = vunpack.i.l.bf16 %v8039_v35 }
 0x5bd   : > { %v8066_v28 = vunpack.i.h.bf16 %v8064_v39  ;;  %v8065_v42 = vunpack.i.l.bf16 %v8064_v39 }
 0x5be   : > { %v10890_v29 = vpop.permute.xlu1 %8053  ;;  %5125 = vrot.lane.b32.xlu0 %v9550_v53, %s8889_s28  ;;  %v4404_v30 = vsel %vm777_vm0, %v4372_v31, %v8040_v34 }
 0x5bf   : > { %v4437_v20 = vsel %vm4420_vm12, %v4404_v30, %v8045_v49  ;;  %v8056_v21 = vunpack.i.h.bf16 %v10890_v29 }
 0x5c0   : > { %5127 = vrot.lane.b32.xlu1 %v9546_v52, %s8889_s28  ;;  %v8069_v6 = vpop.permute.xlu0 %8068  ;;  %v4405_v52 = vsel %vm777_vm0, %v4373_v59, %v8041_v36  ;;  %v4469_v9 = vsel %vm2301_vm4, %v4437_v20, %v8065_v42  ;;  %v8055_v36 = vunpack.i.l.bf16 %v10890_v29 }
 0x5c1   : > { %v8071_v22 = vunpack.i.h.bf16 %v8069_v6  ;;  %v8070_v53 = vunpack.i.l.bf16 %v8069_v6  ;;  %v4438_v18 = vsel %vm4420_vm12, %v4405_v52, %v8046_v24 }
 0x5c2   : > { %v8059_v14 = vpop.permute.xlu1 %8058  ;;  %5129 = vrot.lane.b32.xlu0 %v9573_v17, %s8889_s28  ;;  %v4470_v63 = vsel %vm2301_vm4, %v4438_v18, %v8066_v28 }
 0x5c3   : > { %v4502_v17 = vsel %vm4485_vm13, %v4469_v9, %v8070_v53  ;;  %v4503_v2 = vsel %vm4485_vm13, %v4470_v63, %v8071_v22  ;;  %v8061_v24 = vunpack.i.h.bf16 %v8059_v14  ;;  %v8060_v49 = vunpack.i.l.bf16 %v8059_v14 }
 0x5c4   : > { %5131 = vrot.lane.b32.xlu1 %v9570_v15, %s8889_s28  ;;  %v8074_v47 = vpop.permute.xlu0 %8073  ;;  %v8025_v15 = vunpack.i.l.bf16 %v10865_v38  ;;  %v2998_v38 = vld [vmem:[#allocation2 + $0xe0] sm:$0xff] }
 0x5c5   : > { %v8076_v35 = vunpack.i.h.bf16 %v8074_v47  ;;  %v8075_v27 = vunpack.i.l.bf16 %v8074_v47  ;;  %v4310_v13 = vsel %vm2946_vm9, %v2998_v38, %v8026_v12  ;;  %v11728_v47 = vld [vmem:[#allocation40_spill] sm:$0xff]  ;;  %v2999_v38 = vld [vmem:[#allocation2 + $0xf0] sm:$0xff] }
 0x5c6   : > { %v10912_v46 = vpop.permute.xlu1 %8078  ;;  %5133 = vrot.lane.b32.xlu0 %v9593_v40, %s8889_s28  ;;  %v8051_v40 = vunpack.i.h.bf16 %v10880_v54  ;;  %v4342_v6 = vsel %vm660_vm1, %v4310_v13, %v8031_v44 }
 0x5c7   : > { %v4534_v39 = vsel %vm2334_vm5, %v4502_v17, %v8075_v27  ;;  %v4535_v25 = vsel %vm2334_vm5, %v4503_v2, %v8076_v35  ;;  %v10953_v35 = vld [vmem:[#allocation15] sm:$0xf]  ;;  %v11729_v17 = vld [vmem:[#allocation42_spill] sm:$0xff] }
 0x5c8   : > { %v4558_v10 = vpack.c.bf16 %v4535_v25, %v4534_v39  ;;  %5135 = vrot.lane.b32.xlu1 %v9586_v37, %s8889_s28  ;;  %v10924_v1 = vpop.permute.xlu0 %8083  ;;  %v4309_v37 = vsel %vm2946_vm9, %v2997_v43, %v8025_v15  ;;  %6925 = vmatprep.subr.msk.bf16.mxu0 %vm4658_vm10, %v10953_v35  ;;  %v11730_v15 = vld [vmem:[#allocation41_spill] sm:$0xff] }
 0x5c9   : > { %v4341_v54 = vsel %vm660_vm1, %v4309_v37, %v8030_v11 }
 0x5ca   : > { %v8089_v34 = vpop.permute.xlu1 %8088  ;;  %5137 = vrot.lane.b32.xlu0 %v9611_v0, %s8889_s28  ;;  %6705 = vmatprep.mubr.msk.bf16.mxu0 %vm4609_vm14, %v4558_v10  ;;  %v4375_v0 = vsel %vm4355_vm11, %v4342_v6, %v8051_v40  ;;  %v4374_v28 = vsel %vm4355_vm11, %v4341_v54, %v8050_v48  ;;  %v8081_v10 = vunpack.i.h.bf16 %v10912_v46  ;;  %v8080_v40 = vunpack.i.l.bf16 %v10912_v46 }
 0x5cb   : > { %v8091_v57 = vunpack.i.h.bf16 %v8089_v34  ;;  %v8090_v3 = vunpack.i.l.bf16 %v8089_v34  ;;  %v4406_v42 = vsel %vm777_vm0, %v4374_v28, %v8055_v36  ;;  %v4407_v31 = vsel %vm777_vm0, %v4375_v0, %v8056_v21  ;;  %v3000_v21 = vld [vmem:[#allocation2 + $0xf8] sm:$0xff] }
 0x5cc   : > { %5139 = vrot.lane.b32.xlu1 %v9608_v60, %s8889_s28  ;;  %v8099_v29 = vpop.permute.xlu0 %8098  ;;  %v4439_v22 = vsel %vm4420_vm12, %v4406_v42, %v8060_v49  ;;  %v4440_v53 = vsel %vm4420_vm12, %v4407_v31, %v8061_v24  ;;  %v8086_v36 = vunpack.i.h.bf16 %v10924_v1  ;;  %v8085_v34 = vunpack.i.l.bf16 %v10924_v1 }
 0x5cd   : > { %v4472_v60 = vsel %vm2301_vm4, %v4440_v53, %v8091_v57  ;;  %v4471_v52 = vsel %vm2301_vm4, %v4439_v22, %v8090_v3  ;;  %v8101_v20 = vunpack.i.h.bf16 %v8099_v29  ;;  %v8100_v18 = vunpack.i.l.bf16 %v8099_v29 }
 0x5ce   : > { %v8094_v59 = vpop.permute.xlu1 %8093  ;;  %5141 = vrot.lane.b32.xlu0 %v9633_v26, %s8889_s28  ;;  %v4311_v37 = vsel %vm2946_vm9, %v2999_v38, %v8080_v40  ;;  %v4312_v13 = vsel %vm2946_vm9, %v3000_v21, %v8081_v10 }
 0x5cf   : > { %v8096_v14 = vunpack.i.h.bf16 %v8094_v59  ;;  %v8095_v30 = vunpack.i.l.bf16 %v8094_v59  ;;  %v4344_v0 = vsel %vm660_vm1, %v4312_v13, %v8086_v36  ;;  %v4343_v28 = vsel %vm660_vm1, %v4311_v37, %v8085_v34  ;;  %v3001_v34 = vld [vmem:[#allocation2 + $0x108] sm:$0xff]  ;;  %v3002_v37 = vld [vmem:[#allocation2 + $0x110] sm:$0xff] }
 0x5d0   : > { %5143 = vrot.lane.b32.xlu1 %v11728_v47, %s8889_s28  ;;  %v8114_v9 = vpop.permute.xlu0 %8113 }
 0x5d1   : > { %v4504_v63 = vsel %vm4485_vm13, %v4471_v52, %v8095_v30  ;;  %v4505_v26 = vsel %vm4485_vm13, %v4472_v60, %v8096_v14  ;;  %v8116_v24 = vunpack.i.h.bf16 %v8114_v9  ;;  %v8115_v49 = vunpack.i.l.bf16 %v8114_v9 }
 0x5d2   : > { %v10955_v27 = vpop.permute.xlu1 %8103  ;;  %5145 = vrot.lane.b32.xlu0 %v11729_v17, %s8889_s28  ;;  %v4536_v2 = vsel %vm2334_vm5, %v4504_v63, %v8100_v18  ;;  %v4537_v12 = vsel %vm2334_vm5, %v4505_v26, %v8101_v20 }
 0x5d3   : > { %v4559_v25 = vpack.c.bf16 %v4537_v12, %v4536_v2  ;;  %v4376_v1 = vsel %vm4355_vm11, %v4343_v28, %v8115_v49  ;;  %v4377_v59 = vsel %vm4355_vm11, %v4344_v0, %v8116_v24 }
 0x5d4   : > { %5147 = vrot.lane.b32.xlu1 %v11730_v15, %s8889_s28  ;;  %v8119_v39 = vpop.permute.xlu0 %8118  ;;  %v8106_v15 = vunpack.i.h.bf16 %v10955_v27 }
 0x5d5   : > { %6706 = vmatmul.mubr.msk.bf16.gmra.mrb[16].mxu0 %vm4609_vm14, %v4559_v25  ;;  %v8121_v6 = vunpack.i.h.bf16 %v8119_v39  ;;  %v8120_v57 = vunpack.i.l.bf16 %v8119_v39  ;;  %v8105_v39 = vunpack.i.l.bf16 %v10955_v27 }
 0x5d6   : > { %v10966_v44 = vpop.permute.xlu1 %8108 }
 0x5d7   : > { %v4408_v30 = vsel %vm777_vm0, %v4376_v1, %v8120_v57  ;;  %v4409_v60 = vsel %vm777_vm0, %v4377_v59, %v8121_v6  ;;  %v8111_v10 = vunpack.i.h.bf16 %v10966_v44  ;;  %v8110_v40 = vunpack.i.l.bf16 %v10966_v44 }
 0x5d8   : > { %v8124_v11 = vpop.permute.xlu0 %8123  ;;  %v4313_v49 = vsel %vm2946_vm9, %v3001_v34, %v8105_v39  ;;  %v4314_v6 = vsel %vm2946_vm9, %v3002_v37, %v8106_v15 }
 0x5d9   : > { %v8126_v3 = vunpack.i.h.bf16 %v8124_v11  ;;  %v8125_v46 = vunpack.i.l.bf16 %v8124_v11 }
 0x5da   : > { %v10970_v48 = vpop.permute.xlu1 %8128 }
 0x5db   : > { %v4441_v52 = vsel %vm4420_vm12, %v4408_v30, %v8125_v46  ;;  %v4442_v20 = vsel %vm4420_vm12, %v4409_v60, %v8126_v3  ;;  %v8131_v21 = vunpack.i.h.bf16 %v10970_v48  ;;  %v8130_v36 = vunpack.i.l.bf16 %v10970_v48 }
 0x5dc   : > { %v8144_v43 = vpop.permute.xlu0 %8143  ;;  %v4345_v3 = vsel %vm660_vm1, %v4313_v49, %v8110_v40  ;;  %v4346_v46 = vsel %vm660_vm1, %v4314_v6, %v8111_v10 }
 0x5dd   : > { %v8146_v42 = vunpack.i.h.bf16 %v8144_v43  ;;  %v8145_v31 = vunpack.i.l.bf16 %v8144_v43  ;;  %v4379_v28 = vsel %vm4355_vm11, %v4346_v46, %v8131_v21  ;;  %v3003_v21 = vld [vmem:[#allocation2 + $0x120] sm:$0xff] }
 0x5de   : > { %v8134_v54 = vpop.permute.xlu1 %8133 }
 0x5df   : > { %v4473_v47 = vsel %vm2301_vm4, %v4441_v52, %v8145_v31  ;;  %v4474_v9 = vsel %vm2301_vm4, %v4442_v20, %v8146_v42  ;;  %v8136_v13 = vunpack.i.h.bf16 %v8134_v54  ;;  %v8135_v24 = vunpack.i.l.bf16 %v8134_v54 }
 0x5e0   : > { %v8149_v29 = vpop.permute.xlu0 %8148  ;;  %v4378_v54 = vsel %vm4355_vm11, %v4345_v3, %v8130_v36  ;;  %v3004_v36 = vld [vmem:[#allocation2 + $0x128] sm:$0xff] }
 0x5e1   : > { %v8151_v22 = vunpack.i.h.bf16 %v8149_v29  ;;  %v8150_v53 = vunpack.i.l.bf16 %v8149_v29  ;;  %v4410_v42 = vsel %vm777_vm0, %v4378_v54, %v8135_v24  ;;  %v4411_v31 = vsel %vm777_vm0, %v4379_v28, %v8136_v13 }
 0x5e2   : > { %v8139_v14 = vpop.permute.xlu1 %8138 }
 0x5e3   : > { %v4506_v17 = vsel %vm4485_vm13, %v4473_v47, %v8150_v53  ;;  %v4507_v2 = vsel %vm4485_vm13, %v4474_v9, %v8151_v22  ;;  %v8141_v57 = vunpack.i.h.bf16 %v8139_v14  ;;  %v8140_v44 = vunpack.i.l.bf16 %v8139_v14 }
 0x5e4   : > { %v8154_v18 = vpop.permute.xlu0 %8153 }
 0x5e5   : > { %v8156_v63 = vunpack.i.h.bf16 %v8154_v18  ;;  %v8155_v26 = vunpack.i.l.bf16 %v8154_v18  ;;  %v4443_v59 = vsel %vm4420_vm12, %v4410_v42, %v8140_v44  ;;  %v4444_v22 = vsel %vm4420_vm12, %v4411_v31, %v8141_v57 }
 0x5e6   : > { %v8159_v12 = vpop.permute.xlu1 %8158 }
 0x5e7   : > { %v4538_v25 = vsel %vm2334_vm5, %v4506_v17, %v8155_v26  ;;  %v4539_v11 = vsel %vm2334_vm5, %v4507_v2, %v8156_v63  ;;  %v8160_v10 = vunpack.i.l.bf16 %v8159_v12 }
 0x5e8   : > { %v4560_v43 = vpack.c.bf16 %v4539_v11, %v4538_v25  ;;  %v10994_v38 = vpop.permute.xlu0 %8163  ;;  %v8161_v11 = vunpack.i.h.bf16 %v8159_v12 }
 0x5e9   : > { %v8166_v34 = vunpack.i.h.bf16 %v10994_v38  ;;  %v8165_v37 = vunpack.i.l.bf16 %v10994_v38  ;;  %v4315_v13 = vsel %vm2946_vm9, %v3003_v21, %v8160_v10 }
 0x5ea   : > { %v8169_v27 = vpop.permute.xlu1 %8168  ;;  %6709 = vmatprep.mubr.msk.bf16.mxu0 %vm4609_vm14, %v4560_v43  ;;  %v4316_v24 = vsel %vm2946_vm9, %v3004_v36, %v8161_v11 }
 0x5eb   : > { %v8171_v29 = vunpack.i.h.bf16 %v8169_v27  ;;  %v8170_v0 = vunpack.i.l.bf16 %v8169_v27 }
 0x5ec   : > { %v8179_v48 = vpop.permute.xlu0 %8178 }
 0x5ed   : > { %v4476_v30 = vsel %vm2301_vm4, %v4444_v22, %v8171_v29  ;;  %v4475_v60 = vsel %vm2301_vm4, %v4443_v59, %v8170_v0  ;;  %v8181_v52 = vunpack.i.h.bf16 %v8179_v48  ;;  %v8180_v20 = vunpack.i.l.bf16 %v8179_v48 }
 0x5ee   : > { %v8174_v1 = vpop.permute.xlu1 %8173  ;;  %v4348_v29 = vsel %vm660_vm1, %v4316_v24, %v8166_v34  ;;  %v4347_v0 = vsel %vm660_vm1, %v4315_v13, %v8165_v37 }
 0x5ef   : > { %v8176_v53 = vunpack.i.h.bf16 %v8174_v1  ;;  %v8175_v14 = vunpack.i.l.bf16 %v8174_v1 }
 0x5f0   : > { %v8194_v18 = vpop.permute.xlu0 %8193 }
 0x5f1   : > { %v4508_v47 = vsel %vm4485_vm13, %v4475_v60, %v8175_v14  ;;  %v4509_v9 = vsel %vm4485_vm13, %v4476_v30, %v8176_v53  ;;  %v8196_v27 = vunpack.i.h.bf16 %v8194_v18  ;;  %v8195_v49 = vunpack.i.l.bf16 %v8194_v18 }
 0x5f2   : > { %v11013_v63 = vpop.permute.xlu1 %8183  ;;  %v4540_v26 = vsel %vm2334_vm5, %v4508_v47, %v8180_v20  ;;  %v4541_v17 = vsel %vm2334_vm5, %v4509_v9, %v8181_v52 }
 0x5f3   : > { %v4561_v15 = vpack.c.bf16 %v4541_v17, %v4540_v26  ;;  %v4380_v38 = vsel %vm4355_vm11, %v4347_v0, %v8195_v49  ;;  %v4381_v54 = vsel %vm4355_vm11, %v4348_v29, %v8196_v27  ;;  %v8186_v17 = vunpack.i.h.bf16 %v11013_v63 }
 0x5f4   : > { %v8199_v2 = vpop.permute.xlu0 %8198 }
 0x5f5   : > { %6710 = vmatmul.mubr.msk.bf16.gmra.mrb[20].mxu0 %vm4609_vm14, %v4561_v15  ;;  %v8201_v57 = vunpack.i.h.bf16 %v8199_v2  ;;  %v8200_v44 = vunpack.i.l.bf16 %v8199_v2  ;;  %v8185_v2 = vunpack.i.l.bf16 %v11013_v63  ;;  %v4318_v27 = vsel %vm2946_vm9, %v10694_v8, %v8186_v17 }
 0x5f6   : > { %v8189_v39 = vpop.permute.xlu1 %8188 }
 0x5f7   : > { %v4412_v59 = vsel %vm777_vm0, %v4380_v38, %v8200_v44  ;;  %v4413_v22 = vsel %vm777_vm0, %v4381_v54, %v8201_v57  ;;  %v8191_v11 = vunpack.i.h.bf16 %v8189_v39  ;;  %v8190_v10 = vunpack.i.l.bf16 %v8189_v39 }
 0x5f8   : > { %v8204_v25 = vpop.permute.xlu0 %8203  ;;  %v4317_v63 = vsel %vm2946_vm9, %v10697_v58, %v8185_v2 }
 0x5f9   : > { %v8206_v3 = vunpack.i.h.bf16 %v8204_v25  ;;  %v8205_v12 = vunpack.i.l.bf16 %v8204_v25  ;;  %v4349_v39 = vsel %vm660_vm1, %v4317_v63, %v8190_v10  ;;  %v4350_v44 = vsel %vm660_vm1, %v4318_v27, %v8191_v11 }
 0x5fa   : > { %v11018_v40 = vpop.permute.xlu1 %8208 }
 0x5fb   : > { %v4445_v53 = vsel %vm4420_vm12, %v4412_v59, %v8205_v12  ;;  %v4446_v14 = vsel %vm4420_vm12, %v4413_v22, %v8206_v3  ;;  %v8211_v36 = vunpack.i.h.bf16 %v11018_v40  ;;  %v8210_v34 = vunpack.i.l.bf16 %v11018_v40 }
 0x5fc   : > { %v8224_v43 = vpop.permute.xlu0 %8223 }
 0x5fd   : > { %v8226_v48 = vunpack.i.h.bf16 %v8224_v43  ;;  %v8225_v28 = vunpack.i.l.bf16 %v8224_v43 }
 0x5fe   : > { %v8214_v6 = vpop.permute.xlu1 %8213 }
 0x5ff   : > { %v4477_v60 = vsel %vm2301_vm4, %v4445_v53, %v8225_v28  ;;  %v4478_v52 = vsel %vm2301_vm4, %v4446_v14, %v8226_v48  ;;  %v8216_v37 = vunpack.i.h.bf16 %v8214_v6  ;;  %v8215_v13 = vunpack.i.l.bf16 %v8214_v6 }
 0x600   : > { %v8229_v46 = vpop.permute.xlu0 %8228  ;;  %v4383_v6 = vsel %vm4355_vm11, %v4350_v44, %v8211_v36 }
 0x601   : > { %v8231_v42 = vunpack.i.h.bf16 %v8229_v46  ;;  %v8230_v31 = vunpack.i.l.bf16 %v8229_v46  ;;  %v4382_v46 = vsel %vm4355_vm11, %v4349_v39, %v8210_v34  ;;  %v4415_v58 = vsel %vm777_vm0, %v4383_v6, %v8216_v37 }
 0x602   : > { %v8219_v1 = vpop.permute.xlu1 %8218  ;;  %v4414_v29 = vsel %vm777_vm0, %v4382_v46, %v8215_v13  ;;  %v7696_v34 = vunpack.i.h.bf16 %v10358_v55  ;;  %v7695_v37 = vunpack.i.l.bf16 %v10358_v55 }
 0x603   : > { %v4510_v47 = vsel %vm4485_vm13, %v4477_v60, %v8230_v31  ;;  %v4511_v9 = vsel %vm4485_vm13, %v4478_v52, %v8231_v42  ;;  %v8221_v49 = vunpack.i.h.bf16 %v8219_v1  ;;  %v8220_v57 = vunpack.i.l.bf16 %v8219_v1 }
 0x604   : > { %v8234_v30 = vpop.permute.xlu0 %8233 }
 0x605   : > { %v8236_v20 = vunpack.i.h.bf16 %v8234_v30  ;;  %v8235_v18 = vunpack.i.l.bf16 %v8234_v30  ;;  %v4447_v8 = vsel %vm4420_vm12, %v4414_v29, %v8220_v57  ;;  %v4448_v48 = vsel %vm4420_vm12, %v4415_v58, %v8221_v49 }
 0x606   : > { %v8239_v26 = vpop.permute.xlu1 %8238 }
 0x607   : > { %v4542_v15 = vsel %vm2334_vm5, %v4510_v47, %v8235_v18  ;;  %v4543_v25 = vsel %vm2334_vm5, %v4511_v9, %v8236_v20  ;;  %v8241_v18 = vunpack.i.h.bf16 %v8239_v26  ;;  %v8240_v47 = vunpack.i.l.bf16 %v8239_v26 }
 0x608   : > { %v4562_v43 = vpack.c.bf16 %v4543_v25, %v4542_v15  ;;  %v8244_v21 = vpop.permute.xlu0 %8243 }
 0x609   : > { %v8246_v17 = vunpack.i.h.bf16 %v8244_v21  ;;  %v8245_v2 = vunpack.i.l.bf16 %v8244_v21  ;;  %v4319_v25 = vsel %vm2946_vm9, %v10736_v5, %v8240_v47  ;;  %v4320_v11 = vsel %vm2946_vm9, %v10729_v16, %v8241_v18 }
 0x60a   : > { %v8249_v24 = vpop.permute.xlu1 %8248  ;;  %6713 = vmatprep.mubr.msk.bf16.mxu0 %vm4609_vm14, %v4562_v43  ;;  %v7700_v21 = vunpack.i.l.bf16 %v10367_v62 }
 0x60b   : > { %v8251_v3 = vunpack.i.h.bf16 %v8249_v24  ;;  %v8250_v12 = vunpack.i.l.bf16 %v8249_v24  ;;  %v7701_v24 = vunpack.i.h.bf16 %v10367_v62  ;;  %v4352_v63 = vsel %vm660_vm1, %v4320_v11, %v8246_v17 }
 0x60c   : > { %v8259_v40 = vpop.permute.xlu0 %8258  ;;  %v4351_v5 = vsel %vm660_vm1, %v4319_v25, %v8245_v2 }
 0x60d   : > { %v4480_v54 = vsel %vm2301_vm4, %v4448_v48, %v8251_v3  ;;  %v4479_v42 = vsel %vm2301_vm4, %v4447_v8, %v8250_v12  ;;  %v8261_v31 = vunpack.i.h.bf16 %v8259_v40  ;;  %v8260_v1 = vunpack.i.l.bf16 %v8259_v40 }
 0x60e   : > { %v8254_v0 = vpop.permute.xlu1 %8253 }
 0x60f   : > { %v8256_v28 = vunpack.i.h.bf16 %v8254_v0  ;;  %v8255_v38 = vunpack.i.l.bf16 %v8254_v0 }
 0x610   : > { %v8274_v59 = vpop.permute.xlu0 %8273 }
 0x611   : > { %v4512_v22 = vsel %vm4485_vm13, %v4479_v42, %v8255_v38  ;;  %v4513_v53 = vsel %vm4485_vm13, %v4480_v54, %v8256_v28  ;;  %v8276_v10 = vunpack.i.h.bf16 %v8274_v59  ;;  %v8275_v43 = vunpack.i.l.bf16 %v8274_v59 }
 0x612   : > { %v8264_v14 = vpop.permute.xlu1 %8263  ;;  %v4544_v30 = vsel %vm2334_vm5, %v4512_v22, %v8260_v1  ;;  %v4545_v60 = vsel %vm2334_vm5, %v4513_v53, %v8261_v31 }
 0x613   : > { %v4563_v20 = vpack.c.bf16 %v4545_v60, %v4544_v30  ;;  %v8266_v26 = vunpack.i.h.bf16 %v8264_v14  ;;  %v8265_v13 = vunpack.i.l.bf16 %v8264_v14  ;;  %v4384_v44 = vsel %vm4355_vm11, %v4351_v5, %v8275_v43 }
 0x614   : > { %v8279_v52 = vpop.permute.xlu0 %8278  ;;  %v4385_v3 = vsel %vm4355_vm11, %v4352_v63, %v8276_v10 }
 0x615   : > { %6714 = vmatmul.mubr.msk.bf16.gmra.mrb[24].mxu0 %vm4609_vm14, %v4563_v20  ;;  %v8281_v49 = vunpack.i.h.bf16 %v8279_v52  ;;  %v8280_v16 = vunpack.i.l.bf16 %v8279_v52  ;;  %v4321_v6 = vsel %vm2946_vm9, %v10788_v4, %v8265_v13  ;;  %v4322_v62 = vsel %vm2946_vm9, %v10784_v23, %v8266_v26 }
 0x616   : > { %v8269_v9 = vpop.permute.xlu1 %8268 }
 0x617   : > { %v8271_v57 = vunpack.i.h.bf16 %v8269_v9  ;;  %v8270_v39 = vunpack.i.l.bf16 %v8269_v9  ;;  %v4416_v38 = vsel %vm777_vm0, %v4384_v44, %v8280_v16  ;;  %v4417_v54 = vsel %vm777_vm0, %v4385_v3, %v8281_v49  ;;  %v11098_v49 = vld [vmem:[#allocation14] ss:$0 sm:$0xff] }
 0x618   : > { %v8284_v15 = vpop.permute.xlu0 %8283 }
 0x619   : > { %v8286_v55 = vunpack.i.h.bf16 %v8284_v15  ;;  %v8285_v12 = vunpack.i.l.bf16 %v8284_v15  ;;  %v4353_v42 = vsel %vm660_vm1, %v4321_v6, %v8270_v39  ;;  %v4354_v31 = vsel %vm660_vm1, %v4322_v62, %v8271_v57 }
 0x61a   : > { %v8289_v36 = vpop.permute.xlu1 %8288 }
 0x61b   : > { %v8291_v46 = vunpack.i.h.bf16 %v8289_v36  ;;  %v8290_v29 = vunpack.i.l.bf16 %v8289_v36  ;;  %v4449_v4 = vsel %vm4420_vm12, %v4416_v38, %v8285_v12  ;;  %v4450_v1 = vsel %vm4420_vm12, %v4417_v54, %v8286_v55  ;;  %v8338_v38 = vld [vmem:[#allocation18] sm:$0xff]  }
 0x61c   : > { %v8304_v27 = vpop.permute.xlu0 %8303 }
 0x61d   : > { %v8306_v58 = vunpack.i.h.bf16 %v8304_v27  ;;  %v8305_v0 = vunpack.i.l.bf16 %v8304_v27  ;;  %v4387_v53 = vsel %vm4355_vm11, %v4354_v31, %v8291_v46  ;;  %v4386_v14 = vsel %vm4355_vm11, %v4353_v42, %v8290_v29 }
 0x61e   : > { %v8294_v40 = vpop.permute.xlu1 %8293 }
 0x61f   : > { %v8296_v8 = vunpack.i.h.bf16 %v8294_v40  ;;  %v8295_v48 = vunpack.i.l.bf16 %v8294_v40  ;;  %v4481_v52 = vsel %vm2301_vm4, %v4449_v4, %v8305_v0  ;;  %v4482_v20 = vsel %vm2301_vm4, %v4450_v1, %v8306_v58 }
 0x620   : > { %v8309_v28 = vpop.permute.xlu0 %8308 }
 0x621   : > { %v8311_v23 = vunpack.i.h.bf16 %v8309_v28  ;;  %v8310_v59 = vunpack.i.l.bf16 %v8309_v28  ;;  %v4418_v18 = vsel %vm777_vm0, %v4386_v14, %v8295_v48  ;;  %v4419_v47 = vsel %vm777_vm0, %v4387_v53, %v8296_v8  ;;  %v11735_v53 = vld [vmem:[#allocation47_spill] sm:$0xff] }
 0x622   : > { %v8299_v22 = vpop.permute.xlu1 %8298  ;;  %v5198_v28 = vsel %vm4658_vm10, %v10953_v35, 0 }
 0x623   : > { %v8301_v30 = vunpack.i.h.bf16 %v8299_v22  ;;  %v8300_v60 = vunpack.i.l.bf16 %v8299_v22  ;;  %v4514_v11 = vsel %vm4485_vm13, %v4481_v52, %v8310_v59  ;;  %v4515_v10 = vsel %vm4485_vm13, %v4482_v20, %v8311_v23  ;;  %v11731_v59 = vld [vmem:[#allocation43_spill] sm:$0xff]  ;;  %v11733_v22 = vld [vmem:[#allocation45_spill] sm:$0xff] }
 0x624   : > { %v8314_v9 = vpop.permute.xlu0 %8313 }
 0x625   : > { %v4451_v17 = vsel %vm4420_vm12, %v4418_v18, %v8300_v60  ;;  %v4452_v2 = vsel %vm4420_vm12, %v4419_v47, %v8301_v30  ;;  %v8316_v15 = vunpack.i.h.bf16 %v8314_v9  ;;  %v8315_v25 = vunpack.i.l.bf16 %v8314_v9  ;;  %v11736_v9 = vld [vmem:[#allocation48_spill] sm:$0xff] }
 0x626   : > { %v4483_v43 = vsel %vm2301_vm4, %v4451_v17, %v7695_v37  ;;  %v4484_v36 = vsel %vm2301_vm4, %v4452_v2, %v7696_v34  ;;  %v8319_v26 = vpop.permute.xlu1 %8318 }
 0x627   : > { %v4546_v13 = vsel %vm2334_vm5, %v4514_v11, %v8315_v25  ;;  %v4547_v63 = vsel %vm2334_vm5, %v4515_v10, %v8316_v15  ;;  %v8321_v5 = vunpack.i.h.bf16 %v8319_v26  ;;  %v8320_v27 = vunpack.i.l.bf16 %v8319_v26 }
 0x628   : > { %v4564_v16 = vpack.c.bf16 %v4547_v63, %v4546_v13  ;;  %v4516_v57 = vsel %vm4485_vm13, %v4483_v43, %v7700_v21  ;;  %v4517_v39 = vsel %vm4485_vm13, %v4484_v36, %v7701_v24  ;;  %v6691_v3 = vpop.f32.mrb[0].mxu0  ;;  %v5118_v20 = vpop.permute.xlu0 %5117 }
 0x629   : > { %v4548_v44 = vsel %vm2334_vm5, %v4516_v57, %v8320_v27  ;;  %v4549_v37 = vsel %vm2334_vm5, %v4517_v39, %v8321_v5  ;;  %v4705_v55 = vadd.f32 %v6691_v3, %v11098_v49  ;;  %v4696_v12 = vpop.f32.mrb[1].mxu0 }
 0x62a   : > { %v4565_v34 = vpack.c.bf16 %v4549_v37, %v4548_v44  ;;  %6717 = vmatprep.mubr.msk.bf16.mxu0 %vm4609_vm14, %v4564_v16  ;;  %v4697_v40 = vadd.f32 %v11098_v49, %v4696_v12  ;;  %v6692_v6 = vpop.f32.mrb[2].mxu0  ;;  %v5120_v36 = vpop.permute.xlu1 %5119  ;;  %v8339_v44 = vld [vmem:[#allocation23] sm:$0xff]   ;;  %v8340_v37 = vld [vmem:[#allocation23 + $0x8] sm:$0xff]  }
 0x62b   : > { %v4708_v62 = vadd.f32 %v6692_v6, %v11098_v49  ;;  %v4699_v46 = vpop.f32.mrb[3].mxu0  ;;  %v4825_v21 = vmax.f32 %v4705_v55, 0.0  ;;  %6823 = vmatprep.subr.bf16.mxu1 %v8339_v44 }
 0x62c   : > { %6718 = vmatmul.mubr.msk.bf16.gmra.mrb[28].mxu0 %vm4609_vm14, %v4565_v34  ;;  %v4700_v24 = vadd.f32 %v11098_v49, %v4699_v46  ;;  %v4823_v58 = vmax.f32 %v4697_v40, 0.0  ;;  %v5122_v26 = vpop.permute.xlu0 %5121  ;;  %6824 = vmatpush3.bf16.msra.mxu1 %v8339_v44 }
 0x62d   : > { %6723 = vmatprep.mubr.msk.bf16.mxu0 %vm2946_vm9, %v10315_v41  ;;  %v4826_v29 = vmax.f32 %v4708_v62, 0.0  ;;  %6825 = vmatprep.subr.bf16.mxu1 %v8340_v37 }
 0x62e   : > { %v4824_v0 = vmax.f32 %v4700_v24, 0.0  ;;  %v5124_v13 = vpop.permute.xlu1 %5123 }
 0x62f   : > { %v11112_v8 = vpack.c.bf16 %v4826_v29, %v4825_v21 }
 0x630   : > { %v11114_v48 = vpack.c.bf16 %v4824_v0, %v4823_v58  ;;  %v5126_v63 = vpop.permute.xlu0 %5125  ;;  %6826 = vmatpush3.bf16.msra.mxu1 %v8340_v37 }
 0x632   : > { %v5128_v5 = vpop.permute.xlu1 %5127 }
 0x634   : > { %6724 = vmatmul.mubr.msk.bf16.vlgmr.msra.gmra.mrb[32].mxu0 %vm2946_vm9, %v10321_v56  ;;  %v5130_v27 = vpop.permute.xlu0 %5129 }
 0x635   : > { %6727 = vmatprep.mubr.msk.bf16.mxu0 %vm2946_vm9, %v10327_v61  ;;  %6756 = vmatpush3.bf16.msra.mxu0 %v5198_v28 }
 0x636   : > { %6789 = vmatprep.subr.bf16.mxu0 %v8338_v38  ;;  %v5132_v3 = vpop.permute.xlu1 %5131 }
 0x638   : > { %v5134_v12 = vpop.permute.xlu0 %5133 }
 0x63a   : > { %v5136_v28 = vpop.permute.xlu1 %5135 }
 0x63c   : > { %6728 = vmatmul.mubr.msk.bf16.gmra.mrb[36].mxu0 %vm2946_vm9, %v10333_v7 }
 0x63d   : > { %6731 = vmatprep.mubr.msk.bf16.mxu0 %vm2946_vm9, %v10339_v33 }
 0x644   : > { %6732 = vmatmul.mubr.msk.bf16.gmra.mrb[40].mxu0 %vm2946_vm9, %v10345_v32 }
 0x645   : > { %6735 = vmatprep.mubr.msk.bf16.mxu0 %vm2946_vm9, %v10351_v45 }
 0x648   : > { %v6695_v41 = vpop.f32.mrb[4].mxu0 }
 0x649   : > { %v4721_v56 = vadd.f32 %v6695_v41, %v11098_v49  ;;  %v4712_v35 = vpop.f32.mrb[5].mxu0  ;;  %v5140_v41 = vpop.permute.xlu1 %5139 }
 0x64a   : > { %v4713_v61 = vadd.f32 %v11098_v49, %v4712_v35  ;;  %v6696_v54 = vpop.f32.mrb[6].mxu0 }
 0x64b   : > { %v4724_v42 = vadd.f32 %v6696_v54, %v11098_v49  ;;  %v4715_v31 = vpop.f32.mrb[7].mxu0  ;;  %v4829_v33 = vmax.f32 %v4721_v56, 0.0 }
 0x64c   : > { %6736 = vmatmul.mubr.msk.bf16.gmra.mrb[44].mxu0 %vm2946_vm9, %v10361_v50  ;;  %v4716_v7 = vadd.f32 %v11098_v49, %v4715_v31  ;;  %v4827_v45 = vmax.f32 %v4713_v61, 0.0  ;;  %v11732_v50 = vld [vmem:[#allocation44_spill] sm:$0xff] }
 0x64d   : > { %6739 = vmatprep.mubr.msk.bf16.mxu0 %vm2946_vm9, %v10371_v19  ;;  %v4830_v32 = vmax.f32 %v4724_v42, 0.0  ;;  %v11734_v19 = vld [vmem:[#allocation46_spill] sm:$0xff]  ;;  %v5144_v35 = vpop.permute.xlu1 %5143 }
 0x64e   : > { %v4828_v4 = vmax.f32 %v4716_v7, 0.0 }
 0x64f   : > { %v11138_v1 = vpack.c.bf16 %v4830_v32, %v4829_v33 }
 0x650   : > { %v11140_v23 = vpack.c.bf16 %v4828_v4, %v4827_v45 }
 0x651   : > { %v5148_v7 = vpop.permute.xlu1 %5147 }
 0x654   : > { %6740 = vmatmul.mubr.msk.bf16.gmra.mrb[48].mxu0 %vm2946_vm9, %v10379_v51 }
 0x655   : > { %6743 = vmatprep.mubr.msk.bf16.mxu0 %vm2946_vm9, %v11731_v59 }
 0x65c   : > { %6744 = vmatmul.mubr.msk.bf16.gmra.mrb[52].mxu0 %vm2946_vm9, %v11732_v50 }
 0x65d   : > { %6747 = vmatprep.mubr.msk.bf16.mxu0 %vm2946_vm9, %v11733_v22 }
 0x664   : > { %6748 = vmatmul.mubr.msk.bf16.gmra.mrb[56].mxu0 %vm2946_vm9, %v11734_v19 }
 0x665   : > { %6751 = vmatprep.mubr.msk.bf16.mxu0 %vm2946_vm9, %v11735_v53 }
 0x668   : > { %v6699_v14 = vpop.f32.mrb[8].mxu0 }
 0x669   : > { %v4737_v30 = vadd.f32 %v6699_v14, %v11098_v49  ;;  %v4728_v60 = vpop.f32.mrb[9].mxu0 }
 0x66a   : > { %v4729_v51 = vadd.f32 %v11098_v49, %v4728_v60  ;;  %v6700_v52 = vpop.f32.mrb[10].mxu0 }
 0x66b   : > { %v4740_v18 = vadd.f32 %v6700_v52, %v11098_v49  ;;  %v4731_v47 = vpop.f32.mrb[11].mxu0  ;;  %v4833_v2 = vmax.f32 %v4737_v30, 0.0 }
 0x66c   : > { %6752 = vmatmul.mubr.msk.bf16.gmra.mrb[60].mxu0 %vm2946_vm9, %v11736_v9  ;;  %v4732_v17 = vadd.f32 %v11098_v49, %v4731_v47  ;;  %v4831_v25 = vmax.f32 %v4729_v51, 0.0 }
 0x66d   : > { %6757 = vmatprep.mubr.msk.bf16.mxu0 %vm2946_vm9, %v5118_v20  ;;  %v4834_v15 = vmax.f32 %v4740_v18, 0.0 }
 0x66e   : > { %v4832_v11 = vmax.f32 %v4732_v17, 0.0 }
 0x66f   : > { %v11161_v10 = vpack.c.bf16 %v4834_v15, %v4833_v2 }
 0x670   : > { %v11163_v43 = vpack.c.bf16 %v4832_v11, %v4831_v25 }
 0x674   : > { %6758 = vmatmul.mubr.msk.bf16.vlgmr.msra.gmra.mrb[32].mxu0 %vm2946_vm9, %v5120_v36 }
 0x675   : > { %6761 = vmatprep.mubr.msk.bf16.mxu0 %vm2946_vm9, %v5122_v26  ;;  %6790 = vmatpush3.bf16.msra.mxu0 %v8338_v38  ;;  %v5138_v38 = vpop.permute.xlu0 %5137 }
 0x679   : > { %v5142_v56 = vpop.permute.xlu0 %5141 }
 0x67c   : > { %6762 = vmatmul.mubr.msk.bf16.gmra.mrb[36].mxu0 %vm2946_vm9, %v5124_v13 }
 0x67d   : > { %6765 = vmatprep.mubr.msk.bf16.mxu0 %vm2946_vm9, %v5126_v63  ;;  %v5146_v61 = vpop.permute.xlu0 %5145 }
 0x684   : > { %6766 = vmatmul.mubr.msk.bf16.gmra.mrb[40].mxu0 %vm2946_vm9, %v5128_v5 }
 0x685   : > { %6769 = vmatprep.mubr.msk.bf16.mxu0 %vm2946_vm9, %v5130_v27 }
 0x688   : > { %v6703_v16 = vpop.f32.mrb[12].mxu0 }
 0x689   : > { %v4753_v57 = vadd.f32 %v6703_v16, %v11098_v49  ;;  %v4744_v39 = vpop.f32.mrb[13].mxu0 }
 0x68a   : > { %v4745_v34 = vadd.f32 %v11098_v49, %v4744_v39  ;;  %v6704_v55 = vpop.f32.mrb[14].mxu0 }
 0x68b   : > { %v4756_v40 = vadd.f32 %v6704_v55, %v11098_v49  ;;  %v4747_v6 = vpop.f32.mrb[15].mxu0  ;;  %v4837_v46 = vmax.f32 %v4753_v57, 0.0 }
 0x68c   : > { %6770 = vmatmul.mubr.msk.bf16.gmra.mrb[44].mxu0 %vm2946_vm9, %v5132_v3  ;;  %v4748_v62 = vadd.f32 %v11098_v49, %v4747_v6  ;;  %v4835_v21 = vmax.f32 %v4745_v34, 0.0 }
 0x68d   : > { %6773 = vmatprep.mubr.msk.bf16.mxu0 %vm2946_vm9, %v5134_v12  ;;  %v4838_v24 = vmax.f32 %v4756_v40, 0.0 }
 0x68e   : > { %v4836_v29 = vmax.f32 %v4748_v62, 0.0 }
 0x68f   : > { %v5368_v58 = vpack.c.bf16 %v4838_v24, %v4837_v46 }
 0x690   : > { %v5367_v0 = vpack.c.bf16 %v4836_v29, %v4835_v21 }
 0x694   : > { %6774 = vmatmul.mubr.msk.bf16.gmra.mrb[48].mxu0 %vm2946_vm9, %v5136_v28  ;;  %v5730_v28 = vlaneseq }
 0x695   : > { %6777 = vmatprep.mubr.msk.bf16.mxu0 %vm2946_vm9, %v5138_v38 }
 0x696   : > { %v5731_v38 = vshrl.u32 %v5730_v28, 7 }
 0x69c   : > { %6778 = vmatmul.mubr.msk.bf16.gmra.mrb[52].mxu0 %vm2946_vm9, %v5140_v41  ;;  %v11222_v41 = vld [vmem:[#allocation20] ss:$0 sm:$0xff] }
 0x69d   : > { %6781 = vmatprep.mubr.msk.bf16.mxu0 %vm2946_vm9, %v5142_v56  ;;  %v5732_v56 = vsub.s32 0, %v5731_v38 }
 0x6a4   : > { %6782 = vmatmul.mubr.msk.bf16.gmra.mrb[56].mxu0 %vm2946_vm9, %v5144_v35 }
 0x6a5   : > { %6785 = vmatprep.mubr.msk.bf16.mxu0 %vm2946_vm9, %v5146_v61  ;;  %v5729_v61 = vld [vmem:[#allocation21] sm:$0x3] }
 0x6a8   : > { %v6707_v54 = vpop.f32.mrb[16].mxu0 }
 0x6a9   : > { %v4769_v42 = vadd.f32 %v6707_v54, %v11098_v49  ;;  %v4760_v31 = vpop.f32.mrb[17].mxu0  ;;  %v5768_v54 = vsub.s32 1, %v5731_v38 }
 0x6aa   : > { %v4761_v33 = vadd.f32 %v11098_v49, %v4760_v31  ;;  %v6708_v32 = vpop.f32.mrb[18].mxu0 }
 0x6ab   : > { %v4772_v45 = vadd.f32 %v6708_v32, %v11098_v49  ;;  %v4763_v4 = vpop.f32.mrb[19].mxu0  ;;  %v4841_v50 = vmax.f32 %v4769_v42, 0.0  ;;  %v11226_v32 = vrot.slane %v5729_v61, %v5732_v56 }
 0x6ac   : > { %6786 = vmatmul.mubr.msk.bf16.gmra.mrb[60].mxu0 %vm2946_vm9, %v5148_v7  ;;  %v4764_v59 = vadd.f32 %v11098_v49, %v4763_v4  ;;  %v4839_v19 = vmax.f32 %v4761_v33, 0.0 }
 0x6ad   : > { %6791 = vmatprep.mubr.msk.bf16.mxu0 %vm660_vm1, %v11114_v48  ;;  %v4842_v22 = vmax.f32 %v4772_v45, 0.0 }
 0x6ae   : > { %v4840_v53 = vmax.f32 %v4764_v59, 0.0 }
 0x6af   : > { %v5370_v14 = vpack.c.bf16 %v4842_v22, %v4841_v50  ;;  %v11231_v22 = vld [vmem:[%s9371_s20 + $0x10] sm:$0xff] }
 0x6b0   : > { %v5369_v30 = vpack.c.bf16 %v4840_v53, %v4839_v19  ;;  %v11234_v53 = vrot.slane %v5729_v61, %v5768_v54 }
 0x6b4   : > { %6792 = vmatmul.mubr.msk.bf16.vlgmr.msra.gmra.mrb[32].mxu0 %vm660_vm1, %v11112_v8 }
 0x6b5   : > { %6795 = vmatprep.mubr.msk.bf16.mxu0 %vm660_vm1, %v11140_v23 }
 0x6bc   : > { %6796 = vmatmul.mubr.msk.bf16.gmra.mrb[36].mxu0 %vm660_vm1, %v11138_v1 }
 0x6bd   : > { %6799 = vmatprep.mubr.msk.bf16.mxu0 %vm660_vm1, %v11163_v43 }
 0x6c4   : > { %6800 = vmatmul.mubr.msk.bf16.gmra.mrb[40].mxu0 %vm660_vm1, %v11161_v10 }
 0x6c5   : > { %6803 = vmatprep.mubr.msk.bf16.mxu0 %vm660_vm1, %v5367_v0 }
 0x6c8   : > { %v6711_v48 = vpop.f32.mrb[20].mxu0 }
 0x6c9   : > { %v4785_v60 = vadd.f32 %v6711_v48, %v11098_v49  ;;  %v4776_v51 = vpop.f32.mrb[21].mxu0 }
 0x6ca   : > { %v4777_v8 = vadd.f32 %v11098_v49, %v4776_v51  ;;  %v6712_v52 = vpop.f32.mrb[22].mxu0 }
 0x6cb   : > { %v4788_v23 = vadd.f32 %v6712_v52, %v11098_v49  ;;  %v4779_v20 = vpop.f32.mrb[23].mxu0  ;;  %v4845_v18 = vmax.f32 %v4785_v60, 0.0 }
 0x6cc   : > { %6804 = vmatmul.mubr.msk.bf16.gmra.mrb[44].mxu0 %vm660_vm1, %v5368_v58  ;;  %v4780_v1 = vadd.f32 %v11098_v49, %v4779_v20  ;;  %v4843_v9 = vmax.f32 %v4777_v8, 0.0  ;;  %v11242_v8 = vld [vmem:[%s9371_s20 + $0x18] sm:$0xff]  ;;  %v11247_v20 = vld [vmem:[%s9371_s20 + $0x8] sm:$0xff] }
 0x6cd   : > { %6807 = vmatprep.mubr.msk.bf16.mxu0 %vm660_vm1, %v5369_v30  ;;  %v4846_v47 = vmax.f32 %v4788_v23, 0.0  ;;  %v11237_v30 = vld [vmem:[%s9371_s20] sm:$0xff] }
 0x6ce   : > { %v4844_v17 = vmax.f32 %v4780_v1, 0.0 }
 0x6cf   : > { %v5372_v2 = vpack.c.bf16 %v4846_v47, %v4845_v18 }
 0x6d0   : > { %v5371_v15 = vpack.c.bf16 %v4844_v17, %v4843_v9 }
 0x6d4   : > { %6808 = vmatmul.mubr.msk.bf16.gmra.mrb[48].mxu0 %vm660_vm1, %v5370_v14 }
 0x6d5   : > { %6811 = vmatprep.mubr.msk.bf16.mxu0 %vm660_vm1, %v5371_v15 }
 0x6dc   : > { %6812 = vmatmul.mubr.msk.bf16.gmra.mrb[52].mxu0 %vm660_vm1, %v5372_v2 }
 0x6e8   : > { %v6715_v25 = vpop.f32.mrb[24].mxu0 }
 0x6e9   : > { %v4801_v11 = vadd.f32 %v6715_v25, %v11098_v49  ;;  %v4792_v10 = vpop.f32.mrb[25].mxu0 }
 0x6ea   : > { %v4793_v43 = vadd.f32 %v11098_v49, %v4792_v10  ;;  %v6716_v36 = vpop.f32.mrb[26].mxu0 }
 0x6eb   : > { %v4804_v26 = vadd.f32 %v6716_v36, %v11098_v49  ;;  %v4795_v13 = vpop.f32.mrb[27].mxu0  ;;  %v4849_v5 = vmax.f32 %v4801_v11, 0.0 }
 0x6ec   : > { %v4796_v63 = vadd.f32 %v11098_v49, %v4795_v13  ;;  %v4847_v16 = vmax.f32 %v4793_v43, 0.0 }
 0x6ed   : > { %v4850_v27 = vmax.f32 %v4804_v26, 0.0 }
 0x6ee   : > { %v4848_v57 = vmax.f32 %v4796_v63, 0.0 }
 0x6ef   : > { %v5374_v39 = vpack.c.bf16 %v4850_v27, %v4849_v5 }
 0x6f0   : > { %v5373_v44 = vpack.c.bf16 %v4848_v57, %v4847_v16 }
 0x6f2   : > { %6815 = vmatprep.mubr.msk.bf16.mxu0 %vm660_vm1, %v5373_v44 }
 0x6f3   : > { %6816 = vmatmul.mubr.msk.bf16.gmra.mrb[56].mxu0 %vm660_vm1, %v5374_v39  ;;  %v11261_v39 = vld [vmem:[%s9371_s20 + $0x30] sm:$0xff] }
 0x6ff   : > { %v6719_v37 = vpop.f32.mrb[28].mxu0 }
 0x700   : > { %v4817_v3 = vadd.f32 %v6719_v37, %v11098_v49  ;;  %v4808_v34 = vpop.f32.mrb[29].mxu0 }
 0x701   : > { %v4809_v55 = vadd.f32 %v11098_v49, %v4808_v34  ;;  %v6720_v12 = vpop.f32.mrb[30].mxu0 }
 0x702   : > { %v4820_v40 = vadd.f32 %v6720_v12, %v11098_v49  ;;  %v4811_v6 = vpop.f32.mrb[31].mxu0  ;;  %v4853_v46 = vmax.f32 %v4817_v3, 0.0 }
 0x703   : > { %v4812_v62 = vadd.f32 %v11098_v49, %v4811_v6  ;;  %v4851_v21 = vmax.f32 %v4809_v55, 0.0  ;;  %v11265_v55 = vld [vmem:[%s9371_s20 + $0x20] sm:$0xff] }
 0x704   : > { %v4854_v24 = vmax.f32 %v4820_v40, 0.0 }
 0x705   : > { %v4852_v29 = vmax.f32 %v4812_v62, 0.0 }
 0x706   : > { %v5376_v58 = vpack.c.bf16 %v4854_v24, %v4853_v46  ;;  %v11270_v46 = vld [vmem:[%s9371_s20 + $0x38] sm:$0xff] }
 0x707   : > { %v5375_v0 = vpack.c.bf16 %v4852_v29, %v4851_v21  ;;  %v11275_v29 = vld [vmem:[%s9371_s20 + $0x28] sm:$0xff] }
 0x709   : > { %6819 = vmatprep.mubr.msk.bf16.mxu0 %vm660_vm1, %v5375_v0 }
 0x70a   : > { %6820 = vmatmul.mubr.msk.bf16.gmra.mrb[60].mxu0 %vm660_vm1, %v5376_v58 }
 0x787   : > { %v6793_v35 = vpop.f32.mrb[32].mxu0 }
 0x788   : > { %v5635_v49 = vadd.f32 %v6793_v35, %v11222_v41  ;;  %v5467_v42 = vpop.f32.mrb[33].mxu0 }
 0x789   : > { %v5633_v31 = vadd.f32 %v11222_v41, %v5467_v42  ;;  %v6794_v7 = vpop.f32.mrb[34].mxu0 }
 0x78a   : > { %v5667_v33 = vmax.f32 %v5635_v49, 0.0  ;;  %v5636_v45 = vadd.f32 %v6794_v7, %v11222_v41  ;;  %v5470_v4 = vpop.f32.mrb[35].mxu0 }
 0x78b   : > { %v5665_v59 = vmax.f32 %v5633_v31, 0.0  ;;  %v5634_v50 = vadd.f32 %v11222_v41, %v5470_v4 }
 0x78c   : > { %v5699_v19 = vadd.f32 %v11231_v22, %v5667_v33  ;;  %v5668_v14 = vmax.f32 %v5636_v45, 0.0 }
 0x78d   : > { %v5697_v48 = vadd.f32 %v11237_v30, %v5665_v59  ;;  %v5666_v60 = vmax.f32 %v5634_v50, 0.0 }
 0x78e   : > { %v5736_v51 = vmul.f32 %v11226_v32, %v5699_v19  ;;  %v5700_v52 = vadd.f32 %v11242_v8, %v5668_v14 }
 0x78f   : > { %v5734_v23 = vmul.f32 %v11226_v32, %v5697_v48  ;;  %v5698_v1 = vadd.f32 %v11247_v20, %v5666_v60  ;;  %v6797_v18 = vpop.f32.mrb[36].mxu0  ;;  %v11291_v60 = vld [vmem:[%s9371_s20 + $0x50] sm:$0xff] }
 0x790   : > { %v5772_v47 = vadd.f32 %v11234_v53, %v5736_v51  ;;  %v5737_v9 = vmul.f32 %v11226_v32, %v5700_v52  ;;  %v5639_v17 = vadd.f32 %v6797_v18, %v11222_v41  ;;  %v5483_v2 = vpop.f32.mrb[37].mxu0  ;;  %v11295_v18 = vld [vmem:[%s9371_s20 + $0x40] sm:$0xff] }
 0x791   : > { %v5770_v15 = vadd.f32 %v11234_v53, %v5734_v23  ;;  %v5735_v25 = vmul.f32 %v11226_v32, %v5698_v1  ;;  %v5637_v11 = vadd.f32 %v11222_v41, %v5483_v2  ;;  %v6798_v10 = vpop.f32.mrb[38].mxu0  ;;  %v11300_v2 = vld [vmem:[%s9371_s20 + $0x58] sm:$0xff] }
 0x792   : > { %v5773_v43 = vadd.f32 %v11234_v53, %v5737_v9  ;;  %v5671_v36 = vmax.f32 %v5639_v17, 0.0  ;;  %v5640_v26 = vadd.f32 %v6798_v10, %v11222_v41  ;;  %v5486_v13 = vpop.f32.mrb[39].mxu0  ;;  %v5804_v16 = vmax.f32 %v5772_v47, 0.0  ;;  %v11305_v10 = vld [vmem:[%s9371_s20 + $0x48] sm:$0xff] }
 0x793   : > { %v5771_v63 = vadd.f32 %v11234_v53, %v5735_v25  ;;  %v5669_v5 = vmax.f32 %v5637_v11, 0.0  ;;  %v5638_v27 = vadd.f32 %v11222_v41, %v5486_v13  ;;  %v5802_v3 = vmax.f32 %v5770_v15, 0.0 }
 0x794   : > { %v5805_v57 = vmax.f32 %v5773_v43, 0.0  ;;  %v5703_v44 = vadd.f32 %v11261_v39, %v5671_v36  ;;  %v5672_v37 = vmax.f32 %v5640_v26, 0.0 }
 0x795   : > { %v5803_v34 = vmax.f32 %v5771_v63, 0.0  ;;  %v5701_v12 = vadd.f32 %v11265_v55, %v5669_v5  ;;  %v5670_v40 = vmax.f32 %v5638_v27, 0.0 }
 0x796   : > { %v5835_v6 = vpack.c.bf16 %v5805_v57, %v5804_v16  ;;  %v5740_v62 = vmul.f32 %v11226_v32, %v5703_v44  ;;  %v5704_v24 = vadd.f32 %v11270_v46, %v5672_v37 }
 0x797   : > { %v5738_v21 = vmul.f32 %v11226_v32, %v5701_v12  ;;  %v5702_v58 = vadd.f32 %v11275_v29, %v5670_v40  ;;  %v6801_v0 = vpop.f32.mrb[40].mxu0  ;;  %v5834_v28 = vpack.c.bf16 %v5803_v34, %v5802_v3 }
 0x798   : > { %v5776_v38 = vadd.f32 %v11234_v53, %v5740_v62  ;;  %v5741_v56 = vmul.f32 %v11226_v32, %v5704_v24  ;;  %v5643_v35 = vadd.f32 %v6801_v0, %v11222_v41  ;;  %v5499_v61 = vpop.f32.mrb[41].mxu0  ;;  %v11321_v0 = vld [vmem:[%s9371_s20 + $0x70] sm:$0xff] }
 0x799   : > { %v5774_v49 = vadd.f32 %v11234_v53, %v5738_v21  ;;  %v5739_v54 = vmul.f32 %v11226_v32, %v5702_v58  ;;  %v5641_v42 = vadd.f32 %v11222_v41, %v5499_v61  ;;  %v6802_v31 = vpop.f32.mrb[42].mxu0  ;;  %6827 = vmatprep.mubr.msk.bf16.mxu1 %vm777_vm0, %v5834_v28  ;;  %v11325_v61 = vld [vmem:[%s9371_s20 + $0x60] sm:$0xff] }
 0x79a   : > { %v5777_v7 = vadd.f32 %v11234_v53, %v5741_v56  ;;  %v5675_v33 = vmax.f32 %v5643_v35, 0.0  ;;  %v5644_v45 = vadd.f32 %v6802_v31, %v11222_v41  ;;  %v5502_v4 = vpop.f32.mrb[43].mxu0  ;;  %6828 = vmatmul.mubr.msk.bf16.vlgmr.msra.gmra.mrb[96].mxu1 %vm777_vm0, %v5835_v6  ;;  %v5808_v14 = vmax.f32 %v5776_v38, 0.0  ;;  %v11330_v31 = vld [vmem:[%s9371_s20 + $0x78] sm:$0xff] }
 0x79b   : > { %v5775_v59 = vadd.f32 %v11234_v53, %v5739_v54  ;;  %v5673_v50 = vmax.f32 %v5641_v42, 0.0  ;;  %v5642_v19 = vadd.f32 %v11222_v41, %v5502_v4  ;;  %v5806_v23 = vmax.f32 %v5774_v49, 0.0  ;;  %v11335_v4 = vld [vmem:[%s9371_s20 + $0x68] sm:$0xff] }
 0x79c   : > { %v5809_v48 = vmax.f32 %v5777_v7, 0.0  ;;  %v5707_v51 = vadd.f32 %v11291_v60, %v5675_v33  ;;  %v5676_v52 = vmax.f32 %v5644_v45, 0.0 }
 0x79d   : > { %v5807_v1 = vmax.f32 %v5775_v59, 0.0  ;;  %v5705_v47 = vadd.f32 %v11295_v18, %v5673_v50  ;;  %v5674_v9 = vmax.f32 %v5642_v19, 0.0 }
 0x79e   : > { %v5744_v17 = vmul.f32 %v11226_v32, %v5707_v51  ;;  %v5708_v15 = vadd.f32 %v11300_v2, %v5676_v52  ;;  %v5837_v25 = vpack.c.bf16 %v5809_v48, %v5808_v14 }
 0x79f   : > { %v5742_v11 = vmul.f32 %v11226_v32, %v5705_v47  ;;  %v5706_v43 = vadd.f32 %v11305_v10, %v5674_v9  ;;  %v6805_v36 = vpop.f32.mrb[44].mxu0  ;;  %v5836_v26 = vpack.c.bf16 %v5807_v1, %v5806_v23 }
 0x7a0   : > { %v5780_v13 = vadd.f32 %v11234_v53, %v5744_v17  ;;  %v5745_v63 = vmul.f32 %v11226_v32, %v5708_v15  ;;  %v5647_v5 = vadd.f32 %v6805_v36, %v11222_v41  ;;  %v5515_v27 = vpop.f32.mrb[45].mxu0 }
 0x7a1   : > { %v5778_v16 = vadd.f32 %v11234_v53, %v5742_v11  ;;  %v5743_v57 = vmul.f32 %v11226_v32, %v5706_v43  ;;  %v5645_v44 = vadd.f32 %v11222_v41, %v5515_v27  ;;  %v6806_v37 = vpop.f32.mrb[46].mxu0  ;;  %6831 = vmatprep.mubr.msk.bf16.mxu1 %vm777_vm0, %v5836_v26 }
 0x7a2   : > { %v5781_v3 = vadd.f32 %v11234_v53, %v5745_v63  ;;  %v5679_v34 = vmax.f32 %v5647_v5, 0.0  ;;  %v5648_v12 = vadd.f32 %v6806_v37, %v11222_v41  ;;  %v5518_v40 = vpop.f32.mrb[47].mxu0  ;;  %6832 = vmatmul.mubr.msk.bf16.gmra.mrb[100].mxu1 %vm777_vm0, %v5837_v25  ;;  %v5812_v21 = vmax.f32 %v5780_v13, 0.0  ;;  %v11351_v5 = vld [vmem:[%s9371_s20 + $0x90] sm:$0xff]  ;;  %v11355_v37 = vld [vmem:[%s9371_s20 + $0x80] sm:$0xff] }
 0x7a3   : > { %v5779_v6 = vadd.f32 %v11234_v53, %v5743_v57  ;;  %v5677_v62 = vmax.f32 %v5645_v44, 0.0  ;;  %v5646_v24 = vadd.f32 %v11222_v41, %v5518_v40  ;;  %v5810_v56 = vmax.f32 %v5778_v16, 0.0  ;;  %v11360_v40 = vld [vmem:[%s9371_s20 + $0x98] sm:$0xff] }
 0x7a4   : > { %v5813_v58 = vmax.f32 %v5781_v3, 0.0  ;;  %v5711_v28 = vadd.f32 %v11321_v0, %v5679_v34  ;;  %v5680_v38 = vmax.f32 %v5648_v12, 0.0 }
 0x7a5   : > { %v5811_v35 = vmax.f32 %v5779_v6, 0.0  ;;  %v5709_v49 = vadd.f32 %v11325_v61, %v5677_v62  ;;  %v5678_v54 = vmax.f32 %v5646_v24, 0.0 }
 0x7a6   : > { %v5748_v42 = vmul.f32 %v11226_v32, %v5711_v28  ;;  %v5712_v7 = vadd.f32 %v11330_v31, %v5680_v38  ;;  %v5839_v33 = vpack.c.bf16 %v5813_v58, %v5812_v21  ;;  %v11365_v21 = vld [vmem:[%s9371_s20 + $0x88] sm:$0xff] }
 0x7a7   : > { %v5746_v45 = vmul.f32 %v11226_v32, %v5709_v49  ;;  %v5710_v59 = vadd.f32 %v11335_v4, %v5678_v54  ;;  %v6809_v50 = vpop.f32.mrb[48].mxu0  ;;  %v5838_v19 = vpack.c.bf16 %v5811_v35, %v5810_v56 }
 0x7a8   : > { %v5784_v14 = vadd.f32 %v11234_v53, %v5748_v42  ;;  %v5749_v48 = vmul.f32 %v11226_v32, %v5712_v7  ;;  %v5651_v51 = vadd.f32 %v6809_v50, %v11222_v41  ;;  %v5531_v52 = vpop.f32.mrb[49].mxu0 }
 0x7a9   : > { %v5782_v23 = vadd.f32 %v11234_v53, %v5746_v45  ;;  %v5747_v1 = vmul.f32 %v11226_v32, %v5710_v59  ;;  %v5649_v47 = vadd.f32 %v11222_v41, %v5531_v52  ;;  %v6810_v9 = vpop.f32.mrb[50].mxu0  ;;  %6835 = vmatprep.mubr.msk.bf16.mxu1 %vm777_vm0, %v5838_v19 }
 0x7aa   : > { %v5785_v17 = vadd.f32 %v11234_v53, %v5749_v48  ;;  %v5683_v15 = vmax.f32 %v5651_v51, 0.0  ;;  %v5652_v25 = vadd.f32 %v6810_v9, %v11222_v41  ;;  %v5534_v11 = vpop.f32.mrb[51].mxu0  ;;  %6836 = vmatmul.mubr.msk.bf16.gmra.mrb[104].mxu1 %vm777_vm0, %v5839_v33  ;;  %v5816_v13 = vmax.f32 %v5784_v14, 0.0 }
 0x7ab   : > { %v5783_v43 = vadd.f32 %v11234_v53, %v5747_v1  ;;  %v5681_v36 = vmax.f32 %v5649_v47, 0.0  ;;  %v5650_v26 = vadd.f32 %v11222_v41, %v5534_v11  ;;  %v5814_v57 = vmax.f32 %v5782_v23, 0.0  ;;  %v11381_v47 = vld [vmem:[%s9371_s20 + $0xb0] sm:$0xff]  ;;  %v11385_v11 = vld [vmem:[%s9371_s20 + $0xa0] sm:$0xff] }
 0x7ac   : > { %v5817_v63 = vmax.f32 %v5785_v17, 0.0  ;;  %v5715_v27 = vadd.f32 %v11351_v5, %v5683_v15  ;;  %v5684_v16 = vmax.f32 %v5652_v25, 0.0 }
 0x7ad   : > { %v5815_v44 = vmax.f32 %v5783_v43, 0.0  ;;  %v5713_v3 = vadd.f32 %v11355_v37, %v5681_v36  ;;  %v5682_v34 = vmax.f32 %v5650_v26, 0.0 }
 0x7ae   : > { %v5752_v12 = vmul.f32 %v11226_v32, %v5715_v27  ;;  %v5716_v6 = vadd.f32 %v11360_v40, %v5684_v16  ;;  %v5841_v62 = vpack.c.bf16 %v5817_v63, %v5816_v13  ;;  %v11390_v13 = vld [vmem:[%s9371_s20 + $0xb8] sm:$0xff] }
 0x7af   : > { %v5750_v24 = vmul.f32 %v11226_v32, %v5713_v3  ;;  %v5714_v58 = vadd.f32 %v11365_v21, %v5682_v34  ;;  %v6813_v28 = vpop.f32.mrb[52].mxu0  ;;  %v5840_v38 = vpack.c.bf16 %v5815_v44, %v5814_v57  ;;  %v11395_v57 = vld [vmem:[%s9371_s20 + $0xa8] sm:$0xff] }
 0x7b0   : > { %v5788_v56 = vadd.f32 %v11234_v53, %v5752_v12  ;;  %v5753_v35 = vmul.f32 %v11226_v32, %v5716_v6  ;;  %v5655_v49 = vadd.f32 %v6813_v28, %v11222_v41  ;;  %v5547_v54 = vpop.f32.mrb[53].mxu0 }
 0x7b1   : > { %v5786_v42 = vadd.f32 %v11234_v53, %v5750_v24  ;;  %v5751_v7 = vmul.f32 %v11226_v32, %v5714_v58  ;;  %v5653_v33 = vadd.f32 %v11222_v41, %v5547_v54  ;;  %v6814_v45 = vpop.f32.mrb[54].mxu0  ;;  %6839 = vmatprep.mubr.msk.bf16.mxu1 %vm777_vm0, %v5840_v38 }
 0x7b2   : > { %v5789_v59 = vadd.f32 %v11234_v53, %v5753_v35  ;;  %v5687_v50 = vmax.f32 %v5655_v49, 0.0  ;;  %v5656_v19 = vadd.f32 %v6814_v45, %v11222_v41  ;;  %v5550_v14 = vpop.f32.mrb[55].mxu0  ;;  %6840 = vmatmul.mubr.msk.bf16.gmra.mrb[108].mxu1 %vm777_vm0, %v5841_v62  ;;  %v5820_v23 = vmax.f32 %v5788_v56, 0.0 }
 0x7b3   : > { %v5787_v48 = vadd.f32 %v11234_v53, %v5751_v7  ;;  %v5685_v51 = vmax.f32 %v5653_v33, 0.0  ;;  %v5654_v52 = vadd.f32 %v11222_v41, %v5550_v14  ;;  %v5818_v15 = vmax.f32 %v5786_v42, 0.0 }
 0x7b4   : > { %v5821_v1 = vmax.f32 %v5789_v59, 0.0  ;;  %v5719_v9 = vadd.f32 %v11381_v47, %v5687_v50  ;;  %v5688_v17 = vmax.f32 %v5656_v19, 0.0 }
 0x7b5   : > { %v5819_v25 = vmax.f32 %v5787_v48, 0.0  ;;  %v5717_v43 = vadd.f32 %v11385_v11, %v5685_v51  ;;  %v5686_v36 = vmax.f32 %v5654_v52, 0.0  ;;  %v11413_v52 = vld [vmem:[%s9371_s20 + $0xd0] sm:$0xff] }
 0x7b6   : > { %v5756_v26 = vmul.f32 %v11226_v32, %v5719_v9  ;;  %v5720_v63 = vadd.f32 %v11390_v13, %v5688_v17  ;;  %v5843_v27 = vpack.c.bf16 %v5821_v1, %v5820_v23  ;;  %v11417_v9 = vld [vmem:[%s9371_s20 + $0xc0] sm:$0xff] }
 0x7b7   : > { %v5754_v16 = vmul.f32 %v11226_v32, %v5717_v43  ;;  %v5718_v44 = vadd.f32 %v11395_v57, %v5686_v36  ;;  %v5842_v3 = vpack.c.bf16 %v5819_v25, %v5818_v15  ;;  %v11422_v43 = vld [vmem:[%s9371_s20 + $0xd8] sm:$0xff] }
 0x7b8   : > { %v5792_v34 = vadd.f32 %v11234_v53, %v5756_v26  ;;  %v5757_v12 = vmul.f32 %v11226_v32, %v5720_v63  ;;  %v11427_v63 = vld [vmem:[%s9371_s20 + $0xc8] sm:$0xff] }
 0x7b9   : > { %v5790_v6 = vadd.f32 %v11234_v53, %v5754_v16  ;;  %v5755_v62 = vmul.f32 %v11226_v32, %v5718_v44  ;;  %6843 = vmatprep.mubr.msk.bf16.mxu1 %vm777_vm0, %v5842_v3 }
 0x7ba   : > { %v5793_v24 = vadd.f32 %v11234_v53, %v5757_v12  ;;  %6844 = vmatmul.mubr.msk.bf16.gmra.mrb[112].mxu1 %vm777_vm0, %v5843_v27  ;;  %v5824_v28 = vmax.f32 %v5792_v34, 0.0 }
 0x7bb   : > { %v5791_v58 = vadd.f32 %v11234_v53, %v5755_v62  ;;  %v5822_v56 = vmax.f32 %v5790_v6, 0.0 }
 0x7bc   : > { %v5825_v38 = vmax.f32 %v5793_v24, 0.0 }
 0x7bd   : > { %v5823_v35 = vmax.f32 %v5791_v58, 0.0 }
 0x7be   : > { %v5845_v49 = vpack.c.bf16 %v5825_v38, %v5824_v28 }
 0x7bf   : > { %v5844_v54 = vpack.c.bf16 %v5823_v35, %v5822_v56 }
 0x7c1   : > { %6847 = vmatprep.mubr.msk.bf16.mxu1 %vm777_vm0, %v5844_v54 }
 0x7c2   : > { %6848 = vmatmul.mubr.msk.bf16.gmra.mrb[116].mxu1 %vm777_vm0, %v5845_v49 }
 0x7c6   : > { %v6817_v42 = vpop.f32.mrb[56].mxu0 }
 0x7c7   : > { %v5659_v7 = vadd.f32 %v6817_v42, %v11222_v41  ;;  %v5563_v33 = vpop.f32.mrb[57].mxu0 }
 0x7c8   : > { %v5657_v45 = vadd.f32 %v11222_v41, %v5563_v33  ;;  %v6818_v59 = vpop.f32.mrb[58].mxu0 }
 0x7c9   : > { %v5691_v50 = vmax.f32 %v5659_v7, 0.0  ;;  %v5660_v19 = vadd.f32 %v6818_v59, %v11222_v41  ;;  %v5566_v14 = vpop.f32.mrb[59].mxu0 }
 0x7ca   : > { %v5689_v48 = vmax.f32 %v5657_v45, 0.0  ;;  %v5658_v51 = vadd.f32 %v11222_v41, %v5566_v14  ;;  %v11443_v14 = vld [vmem:[%s9371_s20 + $0xf0] sm:$0xff] }
 0x7cb   : > { %v5723_v23 = vadd.f32 %v11413_v52, %v5691_v50  ;;  %v5692_v1 = vmax.f32 %v5660_v19, 0.0 }
 0x7cc   : > { %v5721_v17 = vadd.f32 %v11417_v9, %v5689_v48  ;;  %v5690_v15 = vmax.f32 %v5658_v51, 0.0 }
 0x7cd   : > { %v5760_v25 = vmul.f32 %v11226_v32, %v5723_v23  ;;  %v5724_v36 = vadd.f32 %v11422_v43, %v5692_v1  ;;  %v11447_v23 = vld [vmem:[%s9371_s20 + $0xe0] sm:$0xff] }
 0x7ce   : > { %v5758_v26 = vmul.f32 %v11226_v32, %v5721_v17  ;;  %v5722_v27 = vadd.f32 %v11427_v63, %v5690_v15 }
 0x7cf   : > { %v5796_v16 = vadd.f32 %v11234_v53, %v5760_v25  ;;  %v5761_v44 = vmul.f32 %v11226_v32, %v5724_v36  ;;  %v11452_v25 = vld [vmem:[%s9371_s20 + $0xf8] sm:$0xff] }
 0x7d0   : > { %v5794_v3 = vadd.f32 %v11234_v53, %v5758_v26  ;;  %v5759_v34 = vmul.f32 %v11226_v32, %v5722_v27  ;;  %v11457_v27 = vld [vmem:[%s9371_s20 + $0xe8] sm:$0xff]  ;;  %s11478_s20 = scalar_lea.vmem [#allocation26], %s6377_s1  ;;  %s6534_s1 = sshll.u32 %s11704_s22, 12 }
 0x7d1   : > { %v5797_v12 = vadd.f32 %v11234_v53, %v5761_v44  ;;  %v5828_v62 = vmax.f32 %v5796_v16, 0.0  ;;  %s6160_s2 = sshll.u32 %s11478_s20, 4  ;;  %s11600_s29 = scalar_lea.hbm %s11737_s18, %s6534_s1  ;;  %s11605_s2 = int_to_ptr.vmem [resolvable:$true] %s6160_s2 }
 0x7d2   : > { %v5795_v6 = vadd.f32 %v11234_v53, %v5759_v34  ;;  %v5826_v58 = vmax.f32 %v5794_v3, 0.0  ;;  %s8770_s17 = scalar_lea.vmem %s11605_s2, 4096  ;;  %s8776_s1 = scalar_lea.vmem %s8775_s0, 8192 }
 0x7d3   : > { %v5829_v24 = vmax.f32 %v5797_v12, 0.0  ;;  %p8771_p6 = scmp.ne.s32.totalorder %s11605_s2, %s8770_s17  ;;  %p8777_p5 = scmp.lt.s32.totalorder %s11605_s2, %s8775_s0 }
 0x7d4   : > { %v5827_v28 = vmax.f32 %v5795_v6, 0.0  ;;  %p8778_p9 = scmp.lt.s32.totalorder %s8776_s1, %s8770_s17 }
 0x7d5   : > { %v5847_v38 = vpack.c.bf16 %v5829_v24, %v5828_v62  ;;  %p8772_p11 = pnand %p8771_p6, %p11738_p10 }
 0x7d6   : > { %v5846_v56 = vpack.c.bf16 %v5827_v28, %v5826_v58  ;;  %p8779_p7 = por %p8778_p9, %p8777_p5 }
 0x7d7   : > { %p8773_p0 = pneg %p8772_p11 }
 0x7d8   : > { %6851 = vmatprep.mubr.msk.bf16.mxu1 %vm777_vm0, %v5846_v56 }
 0x7d9   : > { %6852 = vmatmul.mubr.msk.bf16.gmra.mrb[120].mxu1 %vm777_vm0, %v5847_v38  ;;  %p8780_p4 = pnand %p8779_p7, %p8773_p0 }
 0x7dd   : > { %v6821_v35 = vpop.f32.mrb[60].mxu0 }
 0x7de   : > { %v5663_v49 = vadd.f32 %v6821_v35, %v11222_v41  ;;  %v5579_v54 = vpop.f32.mrb[61].mxu0  ;;  %v11468_v35 = vld [vmem:[#allocation24] ss:$0 sm:$0xff] }
 0x7df   : > { %v5661_v42 = vadd.f32 %v11222_v41, %v5579_v54  ;;  %v6822_v7 = vpop.f32.mrb[62].mxu0 }
 0x7e0   : > { %v5695_v33 = vmax.f32 %v5663_v49, 0.0  ;;  %v5664_v45 = vadd.f32 %v6822_v7, %v11222_v41  ;;  %v5582_v59 = vpop.f32.mrb[63].mxu0 }
 0x7e1   : > { %v5693_v50 = vmax.f32 %v5661_v42, 0.0  ;;  %v5662_v19 = vadd.f32 %v11222_v41, %v5582_v59 }
 0x7e2   : > { %v5727_v48 = vadd.f32 %v11443_v14, %v5695_v33  ;;  %v5696_v51 = vmax.f32 %v5664_v45, 0.0 }
 0x7e3   : > { %v5725_v1 = vadd.f32 %v11447_v23, %v5693_v50  ;;  %v5694_v17 = vmax.f32 %v5662_v19, 0.0 }
 0x7e4   : > { %v5764_v15 = vmul.f32 %v11226_v32, %v5727_v48  ;;  %v5728_v36 = vadd.f32 %v11452_v25, %v5696_v51 }
 0x7e5   : > { %v5762_v26 = vmul.f32 %v11226_v32, %v5725_v1  ;;  %v5726_v41 = vadd.f32 %v11457_v27, %v5694_v17 }
 0x7e6   : > { %v5800_v16 = vadd.f32 %v11234_v53, %v5764_v15  ;;  %v5765_v44 = vmul.f32 %v11226_v32, %v5728_v36 }
 0x7e7   : > { %v5798_v3 = vadd.f32 %v11234_v53, %v5762_v26  ;;  %v5763_v34 = vmul.f32 %v11226_v32, %v5726_v41 }
 0x7e8   : > { %v5801_v12 = vadd.f32 %v11234_v53, %v5765_v44  ;;  %v5832_v62 = vmax.f32 %v5800_v16, 0.0 }
 0x7e9   : > { %v5799_v6 = vadd.f32 %v11234_v53, %v5763_v34  ;;  %v5830_v58 = vmax.f32 %v5798_v3, 0.0 }
 0x7ea   : > { %v5833_v24 = vmax.f32 %v5801_v12, 0.0 }
 0x7eb   : > { %v5831_v28 = vmax.f32 %v5799_v6, 0.0 }
 0x7ec   : > { %v5849_v38 = vpack.c.bf16 %v5833_v24, %v5832_v62 }
 0x7ed   : > { %v5848_v56 = vpack.c.bf16 %v5831_v28, %v5830_v58 }
 0x7ef   : > { %6855 = vmatprep.mubr.msk.bf16.mxu1 %vm777_vm0, %v5848_v56 }
 0x7f0   : > { %6856 = vmatmul.mubr.msk.bf16.gmra.mrb[124].mxu1 %vm777_vm0, %v5849_v38 }
 0x86d   : > { %v6829_v49 = vpop.f32.mrb[96].mxu1 }
 0x86e   : > { %v5964_v32 = vadd.f32 %v6829_v49, %v11468_v35  ;;  %v5955_v54 = vpop.f32.mrb[97].mxu1 }
 0x86f   : > { %v5956_v42 = vadd.f32 %v11468_v35, %v5955_v54  ;;  %v6830_v53 = vpop.f32.mrb[98].mxu1 }
 0x870   : > { %v6084_v7 = vadd.f32 %v11231_v22, %v5964_v32  ;;  %v5967_v33 = vadd.f32 %v6830_v53, %v11468_v35  ;;  %v5958_v45 = vpop.f32.mrb[99].mxu1 }
 0x871   : > { %v6082_v59 = vadd.f32 %v11237_v30, %v5956_v42  ;;  %v5959_v50 = vadd.f32 %v11468_v35, %v5958_v45 }
 0x872   : > { %6116 = vst.msk [vmem:[%s11478_s20 + $0x10] sm:$0xff] %vm777_vm0, %v6084_v7  ;;  %v6085_v19 = vadd.f32 %v11242_v8, %v5967_v33 }
 0x873   : > { %6114 = vst.msk [vmem:[%s11478_s20] sm:$0xff] %vm777_vm0, %v6082_v59  ;;  %v6083_v22 = vadd.f32 %v11247_v20, %v5959_v50 }
 0x874   : > { %6117 = vst.msk [vmem:[%s11478_s20 + $0x18] sm:$0xff] %vm777_vm0, %v6085_v19 }
 0x875   : > { %6115 = vst.msk [vmem:[%s11478_s20 + $0x8] sm:$0xff] %vm777_vm0, %v6083_v22  ;;  %v6833_v30 = vpop.f32.mrb[100].mxu1 }
 0x876   : > { %v5980_v48 = vadd.f32 %v6833_v30, %v11468_v35  ;;  %v5971_v51 = vpop.f32.mrb[101].mxu1 }
 0x877   : > { %v5972_v1 = vadd.f32 %v11468_v35, %v5971_v51  ;;  %v6834_v17 = vpop.f32.mrb[102].mxu1 }
 0x878   : > { %v6088_v8 = vadd.f32 %v11261_v39, %v5980_v48  ;;  %v5983_v15 = vadd.f32 %v6834_v17, %v11468_v35  ;;  %v5974_v36 = vpop.f32.mrb[103].mxu1 }
 0x879   : > { %v6086_v20 = vadd.f32 %v11265_v55, %v5972_v1  ;;  %v5975_v26 = vadd.f32 %v11468_v35, %v5974_v36 }
 0x87a   : > { %6120 = vst.msk [vmem:[%s11478_s20 + $0x30] sm:$0xff] %vm777_vm0, %v6088_v8  ;;  %v6089_v41 = vadd.f32 %v11270_v46, %v5983_v15 }
 0x87b   : > { %6118 = vst.msk [vmem:[%s11478_s20 + $0x20] sm:$0xff] %vm777_vm0, %v6086_v20  ;;  %v6087_v16 = vadd.f32 %v11275_v29, %v5975_v26 }
 0x87c   : > { %6121 = vst.msk [vmem:[%s11478_s20 + $0x38] sm:$0xff] %vm777_vm0, %v6089_v41 }
 0x87d   : > { %6119 = vst.msk [vmem:[%s11478_s20 + $0x28] sm:$0xff] %vm777_vm0, %v6087_v16  ;;  %v6837_v39 = vpop.f32.mrb[104].mxu1 }
 0x87e   : > { %v5996_v55 = vadd.f32 %v6837_v39, %v11468_v35  ;;  %v5987_v44 = vpop.f32.mrb[105].mxu1 }
 0x87f   : > { %v5988_v3 = vadd.f32 %v11468_v35, %v5987_v44  ;;  %v6838_v34 = vpop.f32.mrb[106].mxu1 }
 0x880   : > { %v6092_v46 = vadd.f32 %v11291_v60, %v5996_v55  ;;  %v5999_v12 = vadd.f32 %v6838_v34, %v11468_v35  ;;  %v5990_v6 = vpop.f32.mrb[107].mxu1 }
 0x881   : > { %v6090_v29 = vadd.f32 %v11295_v18, %v5988_v3  ;;  %v5991_v62 = vadd.f32 %v11468_v35, %v5990_v6 }
 0x882   : > { %6124 = vst.msk [vmem:[%s11478_s20 + $0x50] sm:$0xff] %vm777_vm0, %v6092_v46  ;;  %v6093_v24 = vadd.f32 %v11300_v2, %v5999_v12 }
 0x883   : > { %6122 = vst.msk [vmem:[%s11478_s20 + $0x40] sm:$0xff] %vm777_vm0, %v6090_v29  ;;  %v6091_v58 = vadd.f32 %v11305_v10, %v5991_v62 }
 0x884   : > { %6125 = vst.msk [vmem:[%s11478_s20 + $0x58] sm:$0xff] %vm777_vm0, %v6093_v24 }
 0x885   : > { %6123 = vst.msk [vmem:[%s11478_s20 + $0x48] sm:$0xff] %vm777_vm0, %v6091_v58  ;;  %v6841_v60 = vpop.f32.mrb[108].mxu1 }
 0x886   : > { %v6012_v18 = vadd.f32 %v6841_v60, %v11468_v35  ;;  %v6003_v28 = vpop.f32.mrb[109].mxu1 }
 0x887   : > { %v6004_v38 = vadd.f32 %v11468_v35, %v6003_v28  ;;  %v6842_v56 = vpop.f32.mrb[110].mxu1 }
 0x888   : > { %v6096_v2 = vadd.f32 %v11321_v0, %v6012_v18  ;;  %v6015_v49 = vadd.f32 %v6842_v56, %v11468_v35  ;;  %v6006_v32 = vpop.f32.mrb[111].mxu1 }
 0x889   : > { %v6094_v10 = vadd.f32 %v11325_v61, %v6004_v38  ;;  %v6007_v54 = vadd.f32 %v11468_v35, %v6006_v32 }
 0x88a   : > { %6128 = vst.msk [vmem:[%s11478_s20 + $0x70] sm:$0xff] %vm777_vm0, %v6096_v2  ;;  %v6097_v42 = vadd.f32 %v11330_v31, %v6015_v49 }
 0x88b   : > { %6126 = vst.msk [vmem:[%s11478_s20 + $0x60] sm:$0xff] %vm777_vm0, %v6094_v10  ;;  %v6095_v53 = vadd.f32 %v11335_v4, %v6007_v54 }
 0x88c   : > { %6129 = vst.msk [vmem:[%s11478_s20 + $0x78] sm:$0xff] %vm777_vm0, %v6097_v42 }
 0x88d   : > { %6127 = vst.msk [vmem:[%s11478_s20 + $0x68] sm:$0xff] %vm777_vm0, %v6095_v53  ;;  %v6845_v0 = vpop.f32.mrb[112].mxu1 }
 0x88e   : > { %v6028_v61 = vadd.f32 %v6845_v0, %v11468_v35  ;;  %v6019_v7 = vpop.f32.mrb[113].mxu1 }
 0x88f   : > { %v6020_v33 = vadd.f32 %v11468_v35, %v6019_v7  ;;  %v6846_v45 = vpop.f32.mrb[114].mxu1 }
 0x890   : > { %v6100_v31 = vadd.f32 %v11351_v5, %v6028_v61  ;;  %v6031_v59 = vadd.f32 %v6846_v45, %v11468_v35  ;;  %v6022_v50 = vpop.f32.mrb[115].mxu1 }
 0x891   : > { %v6098_v4 = vadd.f32 %v11355_v37, %v6020_v33  ;;  %v6023_v19 = vadd.f32 %v11468_v35, %v6022_v50 }
 0x892   : > { %6132 = vst.msk [vmem:[%s11478_s20 + $0x90] sm:$0xff] %vm777_vm0, %v6100_v31  ;;  %v6101_v22 = vadd.f32 %v11360_v40, %v6031_v59 }
 0x893   : > { %6130 = vst.msk [vmem:[%s11478_s20 + $0x80] sm:$0xff] %vm777_vm0, %v6098_v4  ;;  %v6099_v30 = vadd.f32 %v11365_v21, %v6023_v19 }
 0x894   : > { %6133 = vst.msk [vmem:[%s11478_s20 + $0x98] sm:$0xff] %vm777_vm0, %v6101_v22 }
 0x895   : > { %6131 = vst.msk [vmem:[%s11478_s20 + $0x88] sm:$0xff] %vm777_vm0, %v6099_v30  ;;  %v6849_v5 = vpop.f32.mrb[116].mxu1 }
 0x896   : > { %v6044_v37 = vadd.f32 %v6849_v5, %v11468_v35  ;;  %v6035_v48 = vpop.f32.mrb[117].mxu1 }
 0x897   : > { %v6036_v51 = vadd.f32 %v11468_v35, %v6035_v48  ;;  %v6850_v1 = vpop.f32.mrb[118].mxu1 }
 0x898   : > { %v6104_v40 = vadd.f32 %v11381_v47, %v6044_v37  ;;  %v6047_v17 = vadd.f32 %v6850_v1, %v11468_v35  ;;  %v6038_v8 = vpop.f32.mrb[119].mxu1 }
 0x899   : > { %v6102_v21 = vadd.f32 %v11385_v11, %v6036_v51  ;;  %v6039_v15 = vadd.f32 %v11468_v35, %v6038_v8 }
 0x89a   : > { %6136 = vst.msk [vmem:[%s11478_s20 + $0xb0] sm:$0xff] %vm777_vm0, %v6104_v40  ;;  %v6105_v36 = vadd.f32 %v11390_v13, %v6047_v17 }
 0x89b   : > { %6134 = vst.msk [vmem:[%s11478_s20 + $0xa0] sm:$0xff] %vm777_vm0, %v6102_v21  ;;  %v6103_v20 = vadd.f32 %v11395_v57, %v6039_v15 }
 0x89c   : > { %6137 = vst.msk [vmem:[%s11478_s20 + $0xb8] sm:$0xff] %vm777_vm0, %v6105_v36 }
 0x89d   : > { %6135 = vst.msk [vmem:[%s11478_s20 + $0xa8] sm:$0xff] %vm777_vm0, %v6103_v20 }
 0x8ac   : > { %v6853_v47 = vpop.f32.mrb[120].mxu1 }
 0x8ad   : > { %v6060_v11 = vadd.f32 %v6853_v47, %v11468_v35  ;;  %v6051_v26 = vpop.f32.mrb[121].mxu1 }
 0x8ae   : > { %v6052_v41 = vadd.f32 %v11468_v35, %v6051_v26  ;;  %v6854_v16 = vpop.f32.mrb[122].mxu1 }
 0x8af   : > { %v6108_v13 = vadd.f32 %v11413_v52, %v6060_v11  ;;  %v6063_v39 = vadd.f32 %v6854_v16, %v11468_v35  ;;  %v6054_v55 = vpop.f32.mrb[123].mxu1 }
 0x8b0   : > { %v6106_v57 = vadd.f32 %v11417_v9, %v6052_v41  ;;  %v6055_v44 = vadd.f32 %v11468_v35, %v6054_v55 }
 0x8b1   : > { %6140 = vst.msk [vmem:[%s11478_s20 + $0xd0] sm:$0xff] %vm777_vm0, %v6108_v13  ;;  %v6109_v3 = vadd.f32 %v11422_v43, %v6063_v39 }
 0x8b2   : > { %6138 = vst.msk [vmem:[%s11478_s20 + $0xc0] sm:$0xff] %vm777_vm0, %v6106_v57  ;;  %v6107_v34 = vadd.f32 %v11427_v63, %v6055_v44 }
 0x8b3   : > { %6141 = vst.msk [vmem:[%s11478_s20 + $0xd8] sm:$0xff] %vm777_vm0, %v6109_v3 }
 0x8b4   : > { %6139 = vst.msk [vmem:[%s11478_s20 + $0xc8] sm:$0xff] %vm777_vm0, %v6107_v34 }
 0x8c3   : > { %v6857_v52 = vpop.f32.mrb[124].mxu1 }
 0x8c4   : > { %v6076_v9 = vadd.f32 %v6857_v52, %v11468_v35  ;;  %v6067_v46 = vpop.f32.mrb[125].mxu1 }
 0x8c5   : > { %v6068_v12 = vadd.f32 %v11468_v35, %v6067_v46  ;;  %v6858_v6 = vpop.f32.mrb[126].mxu1 }
 0x8c6   : > { %v6112_v43 = vadd.f32 %v11443_v14, %v6076_v9  ;;  %v6079_v63 = vadd.f32 %v6858_v6, %v11468_v35  ;;  %v6070_v29 = vpop.f32.mrb[127].mxu1 }
 0x8c7   : > { %v6110_v62 = vadd.f32 %v11447_v23, %v6068_v12  ;;  %v6071_v24 = vadd.f32 %v11468_v35, %v6070_v29 }
 0x8c8   : > { %6144 = vst.msk [vmem:[%s11478_s20 + $0xf0] sm:$0xff] %vm777_vm0, %v6112_v43  ;;  %v6113_v58 = vadd.f32 %v11452_v25, %v6079_v63 }
 0x8c9   : > { %6142 = vst.msk [vmem:[%s11478_s20 + $0xe0] sm:$0xff] %vm777_vm0, %v6110_v62  ;;  %v6111_v14 = vadd.f32 %v11457_v27, %v6071_v24 }
 0x8ca   : > { %6145 = vst.msk [vmem:[%s11478_s20 + $0xf8] sm:$0xff] %vm777_vm0, %v6113_v58 }
 0x8cb   : > { %6143 = vst.msk [vmem:[%s11478_s20 + $0xe8] sm:$0xff] %vm777_vm0, %v6111_v14 }
 0x8cc   : > { %8783 = shalt.err (!%p8780_p4)
}
 0x8cd   : > { %s8784_s20 = scalar_lea.hbm %s11600_s29, 4096  ;;  %s8788_s26 = scalar_lea.hbm %s11737_s18, 8192 }
 0x8ce   : > { %p8785_p12 = scmp.ne.s32.totalorder %s11600_s29, %s8784_s20  ;;  %p8789_p3 = scmp.lt.u32.totalorder %s11600_s29, %s11737_s18 }
 0x8cf   : > { %p8790_p2 = scmp.lt.u32.totalorder %s8788_s26, %s8784_s20  ;;  %p8792_p6 = scmp.lt.u32.totalorder %s8784_s20, %s11600_s29 }
 0x8d0   : > { %p8786_p13 = pnand %p8785_p12, %p11738_p10 }
 0x8d1   : > { %p8791_p8 = por %p8790_p2, %p8789_p3 }
 0x8d2   : > { %p8787_p1 = pneg %p8786_p13 }
 0x8d3   : > { %p8793_p11 = por %p8792_p6, %p8791_p8 }
 0x8d5   : > { %p8794_p0 = pnand %p8793_p11, %p8787_p1 }
 0x8d7   : > { %8797 = shalt.err (!%p8794_p0)
}
 0x8d8   : > { %s8899_s17 = smov 128   ;;  %s11739_s1 = scalar_lea.sflag [#allocation5], %s9365_s24 }
 0x8d9   : > { %6980 = dma.vmem_to_hbm [thread:$0]  (%p11738_p10), %s11605_s2, 4096, %s11600_s29, %s11739_s1, %s8899_s17, %s8899_s17, %s8893_s21  }
 0x8da PF: > { %s11740_s19 = sld [smem:[#allocation36_spill]]  ;;  %p11741_p5 = scmp.ne.s32.totalorder %s11698_s25, 0 }
 0x8db   : > { %p11742_p9 = scmp.ge.s32.totalorder %s8864_s16, 2 }
 0x8dd   : > { %p7027_p7 = pnand %p11742_p9, %p11741_p5 }
 0x8e0   : > { %s6175_s22 = sand.u32 1, %s11740_s19  }
 0x8e1   : > { %s6176_s20 = scalar_lea.sflag [#allocation5], %s6175_s22 }
 0x8e2   : > { %8847 = dma.done.wait (!%p7027_p7), %s6176_s20, 4096  }
 0x8e3   : > { %8849 = vsyncadd (!%p7027_p7), %s6176_s20, 4294963200  ;;  %s11743_s29 = sld [smem:[#allocation37_spill]]  ;;  %p34_p4 = scmp.ge.s32.totalorder %s9292_s23, 4  }
 0x8e4   : > { %s11744_s30 = smov %s8860_s15  ;;  %s11745_s15 = smov %s9304_s27 }
 0x8e5   : > { %s11746_s16 = smov %s9292_s23  ;;  %36 = sbr.rel (!%p34_p4) target bundleno = 17 (0x11), region = 176 }
 0x8ec   :  { %6181 = vsyncpa [#allocation4], 1 }
 0x8ed   :  { %6183 = vsyncpa [#allocation4 + $0x1], 1 }
 0x8ee   :  { %6184 = vsyncpa [#allocation7], 1 }
 0x8ef   :  { %6185 = vsyncpa [#allocation10], 1 }
 0x8f0   :  { %6186 = vsyncpa [#allocation13], 1 }
 0x8f1   :  { %6187 = vsyncpa [#allocation16], 1 }
 0x8f2   :  { %6188 = vsyncpa [#allocation19], 1 }
 0x8f3   :  { %6189 = vsyncpa [#allocation22], 1 }
 0x8f4   :  { %6190 = vsyncpa [#allocation25], 1 }
 0x8f5   :  { %6191 = vsyncpa [#allocation5], 1 }
 0x8f6   :  { %6193 = vsyncpa [#allocation5 + $0x1], 1 }

</bundles_post_ra>
